<compile_context>
chip_gen: v7x
topology: tpu7x:2x2x1
jax: 0.10.0
libtpu: 0.0.40
codegen_flags: <defaults>
</compile_context>

<pallas_src>
import functools

import jax
import jax.numpy as jnp
from jax.experimental import pallas as pl
from jax.experimental.pallas import tpu as pltpu


def _vmem_limit_bytes():
    """~3/4 of the physical VMEM of the current generation (96 MiB on
    v5e/v6e's 128 MiB, 48 MiB on v7x's 64 MiB), with a safe fallback."""
    try:
        cap = int(pltpu.get_tpu_info().vmem_capacity_bytes)
    except Exception:
        cap = 64 * 1024 * 1024
    return max(32 * 1024 * 1024, (cap * 3) // 4)


# --------------------------- shared attention math ---------------------------

def _attention(Wh, mask, afc2d, *, alpha, precise):
    """Attention core for one GAT layer (no output activation).

    Wh     : (B, N, F) float32 projected features
    mask   : (B, N, N) bool    True where an edge exists
    afc2d  : (1, F)    float32 attn_fc weight
    returns softmax(mask(e / ||e||_F)) @ Wh   as float32 (B, N, F)
    """
    B, N, F = Wh.shape

    # e[b,i,j] = sum_f LeakyReLU(Wh[b,i,f] + Wh[b,j,f]) * afc[f]
    # Accumulated with the neighbour axis N in lanes (fully lane-dense VPU
    # work); the reduction over F is a statically-unrolled accumulate, so no
    # (B, *, N, F) intermediate and no cross-lane (XLU) reduce is needed.
    WhT = jnp.transpose(Wh, (0, 2, 1))                   # (B, F, N), one-time XLU
    e = jnp.zeros((B, N, N), jnp.float32)
    for f in range(F):
        s = Wh[:, :, f:f + 1] + WhT[:, f:f + 1, :]       # (B,N,1)+(B,1,N)->(B,N,N)
        s = jnp.maximum(s, alpha * s)                    # LeakyReLU(alpha)
        e = e + s * afc2d[0, f]

    # e = e / ||e||_F (global Frobenius norm over the *unmasked* tensor,
    # matching the reference which normalizes before masked_fill).
    inv_norm = jax.lax.rsqrt(jnp.sum(e * e) + jnp.float32(1e-30))
    e = e * inv_norm

    # Mask non-edges.  Large finite negative keeps exact softmax semantics for
    # rows with >=1 edge and avoids NaN for fully-masked rows (deliberate,
    # observable difference from the PyTorch -inf behaviour).
    e = jnp.where(mask, e, jnp.float32(-1e30))

    # Softmax over neighbours (last axis).
    m = jnp.max(e, axis=-1, keepdims=True)
    p = jnp.exp(e - m)
    denom = jnp.sum(p, axis=-1, keepdims=True)

    dn = (((2,), (1,)), ((0,), (0,)))                    # batched att @ Wh
    if precise:
        att = p / denom
        h = jax.lax.dot_general(att, Wh, dn, preferred_element_type=jnp.float32)
    else:
        att = p * pl.reciprocal(denom, approx=True)      # EUP slot
        h = jax.lax.dot_general(att.astype(jnp.bfloat16), Wh.astype(jnp.bfloat16),
                                dn, preferred_element_type=jnp.float32)
    return h                                             # (B, N, F) f32


# --------------------------- first layer: all heads fused --------------------

def _gat_heads_kernel(x_ref, adj_ref, w_ref, afc_ref, out_ref, *, alpha, precise):
    # One grid step == one attention head (grid axis is "parallel").
    x = x_ref[...]                                       # (B, N, Fin) bf16
    mask = adj_ref[...] != 0                             # (B, N, N) bool (no f32 adj)
    W = w_ref[0]                                         # (Fin, F) bf16
    afc2d = afc_ref[0]                                   # (1, F) f32

    B, N, Fin = x.shape
    F = W.shape[1]

    # Projection: one 2-D MXU matmul, bf16 in / f32 accumulate.
    Wh = jnp.dot(x.reshape(B * N, Fin), W,
                 preferred_element_type=jnp.float32).reshape(B, N, F)

    h = _attention(Wh, mask, afc2d, alpha=alpha, precise=precise)

    # concat=True path -> ELU (alpha=1.0, PyTorch default); min() keeps the
    # discarded branch finite.
    h = jnp.where(h > 0, h, jnp.exp(jnp.minimum(h, 0.0)) - 1.0)

    out_ref[0] = h.astype(out_ref.dtype)                 # bf16 inter-layer tensor


def gat_heads(x_bf, adj_i8, W_heads_bf, afc_heads, *, alpha=0.2, precise=False):
    """All heads of the first GAT layer in one pallas_call. Output (H,B,N,F) bf16."""
    B, N, Fin = x_bf.shape
    H, _, F = W_heads_bf.shape
    kern = functools.partial(_gat_heads_kernel, alpha=alpha, precise=precise)
    # NOTE: x and adj have constant index maps; Mosaic keeps them resident.
    # (pl.Buffered(1) would also drop the second buffer; left default for
    # lowering safety.)
    return pl.pallas_call(
        kern,
        out_shape=jax.ShapeDtypeStruct((H, B, N, F), jnp.bfloat16),
        grid=(H,),
        in_specs=[
            pl.BlockSpec((B, N, Fin), lambda h: (0, 0, 0)),   # x (resident)
            pl.BlockSpec((B, N, N), lambda h: (0, 0, 0)),     # adj int8 (resident)
            pl.BlockSpec((1, Fin, F), lambda h: (h, 0, 0)),   # per-head W
            pl.BlockSpec((1, 1, F), lambda h: (h, 0, 0)),     # per-head attn_fc
        ],
        out_specs=pl.BlockSpec((1, B, N, F), lambda h: (h, 0, 0, 0)),
        compiler_params=pltpu.CompilerParams(
            dimension_semantics=("parallel",),                # heads independent
            vmem_limit_bytes=_vmem_limit_bytes()),
    )(x_bf, adj_i8, W_heads_bf, afc_heads)


# --------------------------- output layer -----------------------------------

def _gat_out_kernel(h_ref, adj_ref, w_ref, afc_ref, out_ref, *, alpha, precise):
    # h_ref : (H, B, N, F) bf16 head-major outputs of the first layer
    # w_ref : (H, F, Fo)   bf16 output projection, split per head-block of rows
    H, B, N, F = h_ref.shape
    Fo = w_ref.shape[2]
    mask = adj_ref[...] != 0                             # (B, N, N) bool

    # concat_h(head_h) @ W_out == sum_h head_h @ W_out[h]: one batched
    # dot_general over the head axis (back-to-back MXU passes) + reduce,
    # instead of a Python loop of H small matmuls.
    h3 = h_ref[...].reshape(H, B * N, F)
    Wh = jax.lax.dot_general(h3, w_ref[...], (((2,), (1,)), ((0,), (0,))),
                             preferred_element_type=jnp.float32)   # (H, B*N, Fo)
    Wh = jnp.sum(Wh, axis=0).reshape(B, N, Fo)

    afc2d = afc_ref[...]                                 # (1, Fo) f32
    out = _attention(Wh, mask, afc2d, alpha=alpha, precise=precise)
    out_ref[...] = out.astype(out_ref.dtype)             # concat=False -> no act.


def gat_out(h_heads, adj_i8, W_out_hmajor, afc_out, *, alpha=0.2, precise=False):
    """Output GAT layer consuming the head-major bf16 tensor. Output (B,N,F_hid) f32."""
    H, B, N, F = h_heads.shape
    Fo = W_out_hmajor.shape[2]
    kern = functools.partial(_gat_out_kernel, alpha=alpha, precise=precise)
    vmem = pl.BlockSpec(memory_space=pltpu.MemorySpace.VMEM)
    # TODO(synk): for large N (and v7x's 2 TensorCores) split this layer into a
    # two-pass gridded scheme (pass 1: e + sum(e^2) per row tile; pass 2:
    # normalize/softmax/matmul per tile) so e never has to be fully resident.
    return pl.pallas_call(
        kern,
        out_shape=jax.ShapeDtypeStruct((B, N, Fo), jnp.float32),
        in_specs=[vmem, vmem, vmem, vmem],
        out_specs=vmem,
        compiler_params=pltpu.CompilerParams(
            vmem_limit_bytes=_vmem_limit_bytes()),
    )(h_heads, adj_i8, W_out_hmajor, afc_out)


# ---------------- parameter init (deterministic, shapes per __init__) --------

def _xavier_uniform(key, shape, fan_in, fan_out, gain=1.414):
    lim = gain * (6.0 / (fan_in + fan_out)) ** 0.5
    return jax.random.uniform(key, shape, jnp.float32, -lim, lim)


def _linear_weight(key, shape, fan_in):
    # nn.Linear(fan_in, 1, bias=False) default init ~ U(-1/sqrt(fan_in), 1/sqrt(fan_in))
    lim = 1.0 / (fan_in ** 0.5)
    return jax.random.uniform(key, shape, jnp.float32, -lim, lim)


def init_gat_params(key, n_features, n_hidden, n_heads=4):
    k0, k1, k2, k3 = jax.random.split(key, 4)
    # NOTE: parameter `a` ((2*F_out, 1)) and dropout exist in __init__ but are
    # unused in the reference forward pass, so they are omitted here.
    return {
        "W_heads": _xavier_uniform(k0, (n_heads, n_features, n_hidden),
                                   n_features, n_hidden),
        "afc_heads": _linear_weight(k1, (n_heads, 1, n_hidden), n_hidden),
        "W_out": _xavier_uniform(k2, (n_hidden * n_heads, n_hidden),
                                 n_hidden * n_heads, n_hidden),
        "afc_out": _linear_weight(k3, (1, n_hidden), n_hidden),
    }


def gat_forward(params, x, adj, alpha=0.2, precise=False):
    """Full GAT forward: 2 pallas_calls (fused heads layer + output layer)."""
    adj_i8 = (adj != 0).astype(jnp.int8)                  # 4x smaller HBM traffic
    x_bf = x.astype(jnp.bfloat16)                         # pre-cast once (MXU-native)
    W_heads_bf = params["W_heads"].astype(jnp.bfloat16)
    H, _, F = params["W_heads"].shape

    h_heads = gat_heads(x_bf, adj_i8, W_heads_bf, params["afc_heads"],
                        alpha=alpha, precise=precise)     # (H, B, N, F) bf16

    W_out_h = params["W_out"].reshape(H, F, -1).astype(jnp.bfloat16)  # (H, F, Fhid)
    return gat_out(h_heads, adj_i8, W_out_h, params["afc_out"],
                   alpha=alpha, precise=precise)          # (B, N, Fhid) f32


if __name__ == "__main__":
    key = jax.random.PRNGKey(0)
    kx, ka, kp = jax.random.split(key, 3)

    B, N, n_features, n_hidden, n_heads = 2, 16, 16, 32, 4

    x = jax.random.normal(kx, (B, N, n_features), jnp.float32)
    adj = (jax.random.uniform(ka, (B, N, N)) < 0.5)
    # add self-loops so no softmax row is fully masked
    adj = jnp.logical_or(adj, jnp.eye(N, dtype=bool)[None]).astype(jnp.int8)

    params = init_gat_params(kp, n_features, n_hidden, n_heads)

    out = jax.block_until_ready(gat_forward(params, x, adj))

    assert out.shape == (B, N, n_hidden), out.shape
    assert bool(jnp.all(jnp.isfinite(out)))
    print("KERNEL_OK")
</pallas_src>

<mosaic_0001>
module attributes {stable_mosaic.version = 11 : i64} {
  func.func @_gat_heads_kernel(%arg0: i32, %arg1: memref<2x16x16xbf16, #tpu.memory_space<vmem>>, %arg2: memref<2x16x16xi8, #tpu.memory_space<vmem>>, %arg3: memref<1x16x32xbf16, #tpu.memory_space<vmem>>, %arg4: memref<1x1x32xf32, #tpu.memory_space<vmem>>, %arg5: memref<1x2x16x32xbf16, #tpu.memory_space<vmem>>) attributes {dimension_semantics = [#tpu.dimension_semantics<parallel>], iteration_bounds = array<i64: 4>, scalar_prefetch = 0 : i64, scratch_operands = 0 : i64, tpu.core_type = #tpu.core_type<tc>, window_params = [{pipeline_mode = #tpu.pipeline_mode<synchronous>, transform_indices = @transform_0, window_bounds = array<i64: 2, 16, 16>}, {pipeline_mode = #tpu.pipeline_mode<synchronous>, transform_indices = @transform_1, window_bounds = array<i64: 2, 16, 16>}, {transform_indices = @transform_2, window_bounds = array<i64: 1, 16, 32>}, {transform_indices = @transform_3, window_bounds = array<i64: 1, 1, 32>}, {transform_indices = @transform_4, window_bounds = array<i64: 1, 2, 16, 32>}]} {
    %c0 = arith.constant 0 : index
    %c0_0 = arith.constant 0 : index
    %c0_1 = arith.constant 0 : index
    %0 = vector.load %arg1[%c0, %c0_0, %c0_1] : memref<2x16x16xbf16, #tpu.memory_space<vmem>>, vector<2x16x16xbf16>
    %c0_2 = arith.constant 0 : index
    %c0_3 = arith.constant 0 : index
    %c0_4 = arith.constant 0 : index
    %1 = vector.load %arg2[%c0_2, %c0_3, %c0_4] : memref<2x16x16xi8, #tpu.memory_space<vmem>>, vector<2x16x16xi8>
    %c0_i8 = arith.constant 0 : i8
    %2 = vector.broadcast %c0_i8 : i8 to vector<2x16x16xi8>
    %3 = arith.cmpi ne, %1, %2 : vector<2x16x16xi8>
    %c0_5 = arith.constant 0 : index
    %c0_6 = arith.constant 0 : index
    %c0_7 = arith.constant 0 : index
    %4 = vector.load %arg3[%c0_5, %c0_6, %c0_7] : memref<1x16x32xbf16, #tpu.memory_space<vmem>>, vector<1x16x32xbf16>
    %5 = vector.shape_cast %4 : vector<1x16x32xbf16> to vector<16x32xbf16>
    %c0_8 = arith.constant 0 : index
    %c0_9 = arith.constant 0 : index
    %c0_10 = arith.constant 0 : index
    %6 = vector.load %arg4[%c0_8, %c0_9, %c0_10] : memref<1x1x32xf32, #tpu.memory_space<vmem>>, vector<1x1x32xf32>
    %7 = vector.shape_cast %6 : vector<1x1x32xf32> to vector<1x32xf32>
    %8 = vector.shape_cast %0 : vector<2x16x16xbf16> to vector<32x16xbf16>
    %cst = arith.constant dense<0.000000e+00> : vector<32x32xf32>
    %9 = tpu.matmul %8, %5, %cst {dimension_numbers = #tpu.dot_dimension_numbers<[1], [0], [0], [1], [0, 0, 1, 1], [], []>} : vector<32x16xbf16>, vector<16x32xbf16>, vector<32x32xf32> -> vector<32x32xf32>
    %10 = vector.shape_cast %9 : vector<32x32xf32> to vector<2x16x32xf32>
    %11 = tpu.transpose %10, [0, 2, 1] : vector<2x16x32xf32> -> vector<2x32x16xf32>
    %cst_11 = arith.constant 0.000000e+00 : f32
    %12 = vector.broadcast %cst_11 : f32 to vector<2x16x16xf32>
    %13 = vector.extract_strided_slice %10 {offsets = [0, 0, 0], sizes = [2, 16, 1], strides = [1, 1, 1]} : vector<2x16x32xf32> to vector<2x16x1xf32>
    %14 = vector.extract_strided_slice %11 {offsets = [0, 0, 0], sizes = [2, 1, 16], strides = [1, 1, 1]} : vector<2x32x16xf32> to vector<2x1x16xf32>
    %15 = vector.broadcast %13 : vector<2x16x1xf32> to vector<2x16x16xf32>
    %16 = vector.broadcast %14 : vector<2x1x16xf32> to vector<2x16x16xf32>
    %17 = arith.addf %15, %16 : vector<2x16x16xf32>
    %cst_12 = arith.constant 2.000000e-01 : f32
    %18 = vector.broadcast %cst_12 : f32 to vector<2x16x16xf32>
    %19 = arith.mulf %18, %17 : vector<2x16x16xf32>
    %20 = arith.maximumf %17, %19 : vector<2x16x16xf32>
    %21 = vector.extract_strided_slice %7 {offsets = [0, 0], sizes = [1, 1], strides = [1, 1]} : vector<1x32xf32> to vector<1x1xf32>
    %22 = vector.extract %21[0, 0] : f32 from vector<1x1xf32>
    %23 = vector.broadcast %22 : f32 to vector<2x16x16xf32>
    %24 = arith.mulf %20, %23 : vector<2x16x16xf32>
    %25 = arith.addf %12, %24 : vector<2x16x16xf32>
    %26 = vector.extract_strided_slice %10 {offsets = [0, 0, 1], sizes = [2, 16, 1], strides = [1, 1, 1]} : vector<2x16x32xf32> to vector<2x16x1xf32>
    %27 = vector.extract_strided_slice %11 {offsets = [0, 1, 0], sizes = [2, 1, 16], strides = [1, 1, 1]} : vector<2x32x16xf32> to vector<2x1x16xf32>
    %28 = vector.broadcast %26 : vector<2x16x1xf32> to vector<2x16x16xf32>
    %29 = vector.broadcast %27 : vector<2x1x16xf32> to vector<2x16x16xf32>
    %30 = arith.addf %28, %29 : vector<2x16x16xf32>
    %cst_13 = arith.constant 2.000000e-01 : f32
    %31 = vector.broadcast %cst_13 : f32 to vector<2x16x16xf32>
    %32 = arith.mulf %31, %30 : vector<2x16x16xf32>
    %33 = arith.maximumf %30, %32 : vector<2x16x16xf32>
    %34 = vector.extract_strided_slice %7 {offsets = [0, 1], sizes = [1, 1], strides = [1, 1]} : vector<1x32xf32> to vector<1x1xf32>
    %35 = vector.extract %34[0, 0] : f32 from vector<1x1xf32>
    %36 = vector.broadcast %35 : f32 to vector<2x16x16xf32>
    %37 = arith.mulf %33, %36 : vector<2x16x16xf32>
    %38 = arith.addf %25, %37 : vector<2x16x16xf32>
    %39 = vector.extract_strided_slice %10 {offsets = [0, 0, 2], sizes = [2, 16, 1], strides = [1, 1, 1]} : vector<2x16x32xf32> to vector<2x16x1xf32>
    %40 = vector.extract_strided_slice %11 {offsets = [0, 2, 0], sizes = [2, 1, 16], strides = [1, 1, 1]} : vector<2x32x16xf32> to vector<2x1x16xf32>
    %41 = vector.broadcast %39 : vector<2x16x1xf32> to vector<2x16x16xf32>
    %42 = vector.broadcast %40 : vector<2x1x16xf32> to vector<2x16x16xf32>
    %43 = arith.addf %41, %42 : vector<2x16x16xf32>
    %cst_14 = arith.constant 2.000000e-01 : f32
    %44 = vector.broadcast %cst_14 : f32 to vector<2x16x16xf32>
    %45 = arith.mulf %44, %43 : vector<2x16x16xf32>
    %46 = arith.maximumf %43, %45 : vector<2x16x16xf32>
    %47 = vector.extract_strided_slice %7 {offsets = [0, 2], sizes = [1, 1], strides = [1, 1]} : vector<1x32xf32> to vector<1x1xf32>
    %48 = vector.extract %47[0, 0] : f32 from vector<1x1xf32>
    %49 = vector.broadcast %48 : f32 to vector<2x16x16xf32>
    %50 = arith.mulf %46, %49 : vector<2x16x16xf32>
    %51 = arith.addf %38, %50 : vector<2x16x16xf32>
    %52 = vector.extract_strided_slice %10 {offsets = [0, 0, 3], sizes = [2, 16, 1], strides = [1, 1, 1]} : vector<2x16x32xf32> to vector<2x16x1xf32>
    %53 = vector.extract_strided_slice %11 {offsets = [0, 3, 0], sizes = [2, 1, 16], strides = [1, 1, 1]} : vector<2x32x16xf32> to vector<2x1x16xf32>
    %54 = vector.broadcast %52 : vector<2x16x1xf32> to vector<2x16x16xf32>
    %55 = vector.broadcast %53 : vector<2x1x16xf32> to vector<2x16x16xf32>
    %56 = arith.addf %54, %55 : vector<2x16x16xf32>
    %cst_15 = arith.constant 2.000000e-01 : f32
    %57 = vector.broadcast %cst_15 : f32 to vector<2x16x16xf32>
    %58 = arith.mulf %57, %56 : vector<2x16x16xf32>
    %59 = arith.maximumf %56, %58 : vector<2x16x16xf32>
    %60 = vector.extract_strided_slice %7 {offsets = [0, 3], sizes = [1, 1], strides = [1, 1]} : vector<1x32xf32> to vector<1x1xf32>
    %61 = vector.extract %60[0, 0] : f32 from vector<1x1xf32>
    %62 = vector.broadcast %61 : f32 to vector<2x16x16xf32>
    %63 = arith.mulf %59, %62 : vector<2x16x16xf32>
    %64 = arith.addf %51, %63 : vector<2x16x16xf32>
    %65 = vector.extract_strided_slice %10 {offsets = [0, 0, 4], sizes = [2, 16, 1], strides = [1, 1, 1]} : vector<2x16x32xf32> to vector<2x16x1xf32>
    %66 = vector.extract_strided_slice %11 {offsets = [0, 4, 0], sizes = [2, 1, 16], strides = [1, 1, 1]} : vector<2x32x16xf32> to vector<2x1x16xf32>
    %67 = vector.broadcast %65 : vector<2x16x1xf32> to vector<2x16x16xf32>
    %68 = vector.broadcast %66 : vector<2x1x16xf32> to vector<2x16x16xf32>
    %69 = arith.addf %67, %68 : vector<2x16x16xf32>
    %cst_16 = arith.constant 2.000000e-01 : f32
    %70 = vector.broadcast %cst_16 : f32 to vector<2x16x16xf32>
    %71 = arith.mulf %70, %69 : vector<2x16x16xf32>
    %72 = arith.maximumf %69, %71 : vector<2x16x16xf32>
    %73 = vector.extract_strided_slice %7 {offsets = [0, 4], sizes = [1, 1], strides = [1, 1]} : vector<1x32xf32> to vector<1x1xf32>
    %74 = vector.extract %73[0, 0] : f32 from vector<1x1xf32>
    %75 = vector.broadcast %74 : f32 to vector<2x16x16xf32>
    %76 = arith.mulf %72, %75 : vector<2x16x16xf32>
    %77 = arith.addf %64, %76 : vector<2x16x16xf32>
    %78 = vector.extract_strided_slice %10 {offsets = [0, 0, 5], sizes = [2, 16, 1], strides = [1, 1, 1]} : vector<2x16x32xf32> to vector<2x16x1xf32>
    %79 = vector.extract_strided_slice %11 {offsets = [0, 5, 0], sizes = [2, 1, 16], strides = [1, 1, 1]} : vector<2x32x16xf32> to vector<2x1x16xf32>
    %80 = vector.broadcast %78 : vector<2x16x1xf32> to vector<2x16x16xf32>
    %81 = vector.broadcast %79 : vector<2x1x16xf32> to vector<2x16x16xf32>
    %82 = arith.addf %80, %81 : vector<2x16x16xf32>
    %cst_17 = arith.constant 2.000000e-01 : f32
    %83 = vector.broadcast %cst_17 : f32 to vector<2x16x16xf32>
    %84 = arith.mulf %83, %82 : vector<2x16x16xf32>
    %85 = arith.maximumf %82, %84 : vector<2x16x16xf32>
    %86 = vector.extract_strided_slice %7 {offsets = [0, 5], sizes = [1, 1], strides = [1, 1]} : vector<1x32xf32> to vector<1x1xf32>
    %87 = vector.extract %86[0, 0] : f32 from vector<1x1xf32>
    %88 = vector.broadcast %87 : f32 to vector<2x16x16xf32>
    %89 = arith.mulf %85, %88 : vector<2x16x16xf32>
    %90 = arith.addf %77, %89 : vector<2x16x16xf32>
    %91 = vector.extract_strided_slice %10 {offsets = [0, 0, 6], sizes = [2, 16, 1], strides = [1, 1, 1]} : vector<2x16x32xf32> to vector<2x16x1xf32>
    %92 = vector.extract_strided_slice %11 {offsets = [0, 6, 0], sizes = [2, 1, 16], strides = [1, 1, 1]} : vector<2x32x16xf32> to vector<2x1x16xf32>
    %93 = vector.broadcast %91 : vector<2x16x1xf32> to vector<2x16x16xf32>
    %94 = vector.broadcast %92 : vector<2x1x16xf32> to vector<2x16x16xf32>
    %95 = arith.addf %93, %94 : vector<2x16x16xf32>
    %cst_18 = arith.constant 2.000000e-01 : f32
    %96 = vector.broadcast %cst_18 : f32 to vector<2x16x16xf32>
    %97 = arith.mulf %96, %95 : vector<2x16x16xf32>
    %98 = arith.maximumf %95, %97 : vector<2x16x16xf32>
    %99 = vector.extract_strided_slice %7 {offsets = [0, 6], sizes = [1, 1], strides = [1, 1]} : vector<1x32xf32> to vector<1x1xf32>
    %100 = vector.extract %99[0, 0] : f32 from vector<1x1xf32>
    %101 = vector.broadcast %100 : f32 to vector<2x16x16xf32>
    %102 = arith.mulf %98, %101 : vector<2x16x16xf32>
    %103 = arith.addf %90, %102 : vector<2x16x16xf32>
    %104 = vector.extract_strided_slice %10 {offsets = [0, 0, 7], sizes = [2, 16, 1], strides = [1, 1, 1]} : vector<2x16x32xf32> to vector<2x16x1xf32>
    %105 = vector.extract_strided_slice %11 {offsets = [0, 7, 0], sizes = [2, 1, 16], strides = [1, 1, 1]} : vector<2x32x16xf32> to vector<2x1x16xf32>
    %106 = vector.broadcast %104 : vector<2x16x1xf32> to vector<2x16x16xf32>
    %107 = vector.broadcast %105 : vector<2x1x16xf32> to vector<2x16x16xf32>
    %108 = arith.addf %106, %107 : vector<2x16x16xf32>
    %cst_19 = arith.constant 2.000000e-01 : f32
    %109 = vector.broadcast %cst_19 : f32 to vector<2x16x16xf32>
    %110 = arith.mulf %109, %108 : vector<2x16x16xf32>
    %111 = arith.maximumf %108, %110 : vector<2x16x16xf32>
    %112 = vector.extract_strided_slice %7 {offsets = [0, 7], sizes = [1, 1], strides = [1, 1]} : vector<1x32xf32> to vector<1x1xf32>
    %113 = vector.extract %112[0, 0] : f32 from vector<1x1xf32>
    %114 = vector.broadcast %113 : f32 to vector<2x16x16xf32>
    %115 = arith.mulf %111, %114 : vector<2x16x16xf32>
    %116 = arith.addf %103, %115 : vector<2x16x16xf32>
    %117 = vector.extract_strided_slice %10 {offsets = [0, 0, 8], sizes = [2, 16, 1], strides = [1, 1, 1]} : vector<2x16x32xf32> to vector<2x16x1xf32>
    %118 = vector.extract_strided_slice %11 {offsets = [0, 8, 0], sizes = [2, 1, 16], strides = [1, 1, 1]} : vector<2x32x16xf32> to vector<2x1x16xf32>
    %119 = vector.broadcast %117 : vector<2x16x1xf32> to vector<2x16x16xf32>
    %120 = vector.broadcast %118 : vector<2x1x16xf32> to vector<2x16x16xf32>
    %121 = arith.addf %119, %120 : vector<2x16x16xf32>
    %cst_20 = arith.constant 2.000000e-01 : f32
    %122 = vector.broadcast %cst_20 : f32 to vector<2x16x16xf32>
    %123 = arith.mulf %122, %121 : vector<2x16x16xf32>
    %124 = arith.maximumf %121, %123 : vector<2x16x16xf32>
    %125 = vector.extract_strided_slice %7 {offsets = [0, 8], sizes = [1, 1], strides = [1, 1]} : vector<1x32xf32> to vector<1x1xf32>
    %126 = vector.extract %125[0, 0] : f32 from vector<1x1xf32>
    %127 = vector.broadcast %126 : f32 to vector<2x16x16xf32>
    %128 = arith.mulf %124, %127 : vector<2x16x16xf32>
    %129 = arith.addf %116, %128 : vector<2x16x16xf32>
    %130 = vector.extract_strided_slice %10 {offsets = [0, 0, 9], sizes = [2, 16, 1], strides = [1, 1, 1]} : vector<2x16x32xf32> to vector<2x16x1xf32>
    %131 = vector.extract_strided_slice %11 {offsets = [0, 9, 0], sizes = [2, 1, 16], strides = [1, 1, 1]} : vector<2x32x16xf32> to vector<2x1x16xf32>
    %132 = vector.broadcast %130 : vector<2x16x1xf32> to vector<2x16x16xf32>
    %133 = vector.broadcast %131 : vector<2x1x16xf32> to vector<2x16x16xf32>
    %134 = arith.addf %132, %133 : vector<2x16x16xf32>
    %cst_21 = arith.constant 2.000000e-01 : f32
    %135 = vector.broadcast %cst_21 : f32 to vector<2x16x16xf32>
    %136 = arith.mulf %135, %134 : vector<2x16x16xf32>
    %137 = arith.maximumf %134, %136 : vector<2x16x16xf32>
    %138 = vector.extract_strided_slice %7 {offsets = [0, 9], sizes = [1, 1], strides = [1, 1]} : vector<1x32xf32> to vector<1x1xf32>
    %139 = vector.extract %138[0, 0] : f32 from vector<1x1xf32>
    %140 = vector.broadcast %139 : f32 to vector<2x16x16xf32>
    %141 = arith.mulf %137, %140 : vector<2x16x16xf32>
    %142 = arith.addf %129, %141 : vector<2x16x16xf32>
    %143 = vector.extract_strided_slice %10 {offsets = [0, 0, 10], sizes = [2, 16, 1], strides = [1, 1, 1]} : vector<2x16x32xf32> to vector<2x16x1xf32>
    %144 = vector.extract_strided_slice %11 {offsets = [0, 10, 0], sizes = [2, 1, 16], strides = [1, 1, 1]} : vector<2x32x16xf32> to vector<2x1x16xf32>
    %145 = vector.broadcast %143 : vector<2x16x1xf32> to vector<2x16x16xf32>
    %146 = vector.broadcast %144 : vector<2x1x16xf32> to vector<2x16x16xf32>
    %147 = arith.addf %145, %146 : vector<2x16x16xf32>
    %cst_22 = arith.constant 2.000000e-01 : f32
    %148 = vector.broadcast %cst_22 : f32 to vector<2x16x16xf32>
    %149 = arith.mulf %148, %147 : vector<2x16x16xf32>
    %150 = arith.maximumf %147, %149 : vector<2x16x16xf32>
    %151 = vector.extract_strided_slice %7 {offsets = [0, 10], sizes = [1, 1], strides = [1, 1]} : vector<1x32xf32> to vector<1x1xf32>
    %152 = vector.extract %151[0, 0] : f32 from vector<1x1xf32>
    %153 = vector.broadcast %152 : f32 to vector<2x16x16xf32>
    %154 = arith.mulf %150, %153 : vector<2x16x16xf32>
    %155 = arith.addf %142, %154 : vector<2x16x16xf32>
    %156 = vector.extract_strided_slice %10 {offsets = [0, 0, 11], sizes = [2, 16, 1], strides = [1, 1, 1]} : vector<2x16x32xf32> to vector<2x16x1xf32>
    %157 = vector.extract_strided_slice %11 {offsets = [0, 11, 0], sizes = [2, 1, 16], strides = [1, 1, 1]} : vector<2x32x16xf32> to vector<2x1x16xf32>
    %158 = vector.broadcast %156 : vector<2x16x1xf32> to vector<2x16x16xf32>
    %159 = vector.broadcast %157 : vector<2x1x16xf32> to vector<2x16x16xf32>
    %160 = arith.addf %158, %159 : vector<2x16x16xf32>
    %cst_23 = arith.constant 2.000000e-01 : f32
    %161 = vector.broadcast %cst_23 : f32 to vector<2x16x16xf32>
    %162 = arith.mulf %161, %160 : vector<2x16x16xf32>
    %163 = arith.maximumf %160, %162 : vector<2x16x16xf32>
    %164 = vector.extract_strided_slice %7 {offsets = [0, 11], sizes = [1, 1], strides = [1, 1]} : vector<1x32xf32> to vector<1x1xf32>
    %165 = vector.extract %164[0, 0] : f32 from vector<1x1xf32>
    %166 = vector.broadcast %165 : f32 to vector<2x16x16xf32>
    %167 = arith.mulf %163, %166 : vector<2x16x16xf32>
    %168 = arith.addf %155, %167 : vector<2x16x16xf32>
    %169 = vector.extract_strided_slice %10 {offsets = [0, 0, 12], sizes = [2, 16, 1], strides = [1, 1, 1]} : vector<2x16x32xf32> to vector<2x16x1xf32>
    %170 = vector.extract_strided_slice %11 {offsets = [0, 12, 0], sizes = [2, 1, 16], strides = [1, 1, 1]} : vector<2x32x16xf32> to vector<2x1x16xf32>
    %171 = vector.broadcast %169 : vector<2x16x1xf32> to vector<2x16x16xf32>
    %172 = vector.broadcast %170 : vector<2x1x16xf32> to vector<2x16x16xf32>
    %173 = arith.addf %171, %172 : vector<2x16x16xf32>
    %cst_24 = arith.constant 2.000000e-01 : f32
    %174 = vector.broadcast %cst_24 : f32 to vector<2x16x16xf32>
    %175 = arith.mulf %174, %173 : vector<2x16x16xf32>
    %176 = arith.maximumf %173, %175 : vector<2x16x16xf32>
    %177 = vector.extract_strided_slice %7 {offsets = [0, 12], sizes = [1, 1], strides = [1, 1]} : vector<1x32xf32> to vector<1x1xf32>
    %178 = vector.extract %177[0, 0] : f32 from vector<1x1xf32>
    %179 = vector.broadcast %178 : f32 to vector<2x16x16xf32>
    %180 = arith.mulf %176, %179 : vector<2x16x16xf32>
    %181 = arith.addf %168, %180 : vector<2x16x16xf32>
    %182 = vector.extract_strided_slice %10 {offsets = [0, 0, 13], sizes = [2, 16, 1], strides = [1, 1, 1]} : vector<2x16x32xf32> to vector<2x16x1xf32>
    %183 = vector.extract_strided_slice %11 {offsets = [0, 13, 0], sizes = [2, 1, 16], strides = [1, 1, 1]} : vector<2x32x16xf32> to vector<2x1x16xf32>
    %184 = vector.broadcast %182 : vector<2x16x1xf32> to vector<2x16x16xf32>
    %185 = vector.broadcast %183 : vector<2x1x16xf32> to vector<2x16x16xf32>
    %186 = arith.addf %184, %185 : vector<2x16x16xf32>
    %cst_25 = arith.constant 2.000000e-01 : f32
    %187 = vector.broadcast %cst_25 : f32 to vector<2x16x16xf32>
    %188 = arith.mulf %187, %186 : vector<2x16x16xf32>
    %189 = arith.maximumf %186, %188 : vector<2x16x16xf32>
    %190 = vector.extract_strided_slice %7 {offsets = [0, 13], sizes = [1, 1], strides = [1, 1]} : vector<1x32xf32> to vector<1x1xf32>
    %191 = vector.extract %190[0, 0] : f32 from vector<1x1xf32>
    %192 = vector.broadcast %191 : f32 to vector<2x16x16xf32>
    %193 = arith.mulf %189, %192 : vector<2x16x16xf32>
    %194 = arith.addf %181, %193 : vector<2x16x16xf32>
    %195 = vector.extract_strided_slice %10 {offsets = [0, 0, 14], sizes = [2, 16, 1], strides = [1, 1, 1]} : vector<2x16x32xf32> to vector<2x16x1xf32>
    %196 = vector.extract_strided_slice %11 {offsets = [0, 14, 0], sizes = [2, 1, 16], strides = [1, 1, 1]} : vector<2x32x16xf32> to vector<2x1x16xf32>
    %197 = vector.broadcast %195 : vector<2x16x1xf32> to vector<2x16x16xf32>
    %198 = vector.broadcast %196 : vector<2x1x16xf32> to vector<2x16x16xf32>
    %199 = arith.addf %197, %198 : vector<2x16x16xf32>
    %cst_26 = arith.constant 2.000000e-01 : f32
    %200 = vector.broadcast %cst_26 : f32 to vector<2x16x16xf32>
    %201 = arith.mulf %200, %199 : vector<2x16x16xf32>
    %202 = arith.maximumf %199, %201 : vector<2x16x16xf32>
    %203 = vector.extract_strided_slice %7 {offsets = [0, 14], sizes = [1, 1], strides = [1, 1]} : vector<1x32xf32> to vector<1x1xf32>
    %204 = vector.extract %203[0, 0] : f32 from vector<1x1xf32>
    %205 = vector.broadcast %204 : f32 to vector<2x16x16xf32>
    %206 = arith.mulf %202, %205 : vector<2x16x16xf32>
    %207 = arith.addf %194, %206 : vector<2x16x16xf32>
    %208 = vector.extract_strided_slice %10 {offsets = [0, 0, 15], sizes = [2, 16, 1], strides = [1, 1, 1]} : vector<2x16x32xf32> to vector<2x16x1xf32>
    %209 = vector.extract_strided_slice %11 {offsets = [0, 15, 0], sizes = [2, 1, 16], strides = [1, 1, 1]} : vector<2x32x16xf32> to vector<2x1x16xf32>
    %210 = vector.broadcast %208 : vector<2x16x1xf32> to vector<2x16x16xf32>
    %211 = vector.broadcast %209 : vector<2x1x16xf32> to vector<2x16x16xf32>
    %212 = arith.addf %210, %211 : vector<2x16x16xf32>
    %cst_27 = arith.constant 2.000000e-01 : f32
    %213 = vector.broadcast %cst_27 : f32 to vector<2x16x16xf32>
    %214 = arith.mulf %213, %212 : vector<2x16x16xf32>
    %215 = arith.maximumf %212, %214 : vector<2x16x16xf32>
    %216 = vector.extract_strided_slice %7 {offsets = [0, 15], sizes = [1, 1], strides = [1, 1]} : vector<1x32xf32> to vector<1x1xf32>
    %217 = vector.extract %216[0, 0] : f32 from vector<1x1xf32>
    %218 = vector.broadcast %217 : f32 to vector<2x16x16xf32>
    %219 = arith.mulf %215, %218 : vector<2x16x16xf32>
    %220 = arith.addf %207, %219 : vector<2x16x16xf32>
    %221 = vector.extract_strided_slice %10 {offsets = [0, 0, 16], sizes = [2, 16, 1], strides = [1, 1, 1]} : vector<2x16x32xf32> to vector<2x16x1xf32>
    %222 = vector.extract_strided_slice %11 {offsets = [0, 16, 0], sizes = [2, 1, 16], strides = [1, 1, 1]} : vector<2x32x16xf32> to vector<2x1x16xf32>
    %223 = vector.broadcast %221 : vector<2x16x1xf32> to vector<2x16x16xf32>
    %224 = vector.broadcast %222 : vector<2x1x16xf32> to vector<2x16x16xf32>
    %225 = arith.addf %223, %224 : vector<2x16x16xf32>
    %cst_28 = arith.constant 2.000000e-01 : f32
    %226 = vector.broadcast %cst_28 : f32 to vector<2x16x16xf32>
    %227 = arith.mulf %226, %225 : vector<2x16x16xf32>
    %228 = arith.maximumf %225, %227 : vector<2x16x16xf32>
    %229 = vector.extract_strided_slice %7 {offsets = [0, 16], sizes = [1, 1], strides = [1, 1]} : vector<1x32xf32> to vector<1x1xf32>
    %230 = vector.extract %229[0, 0] : f32 from vector<1x1xf32>
    %231 = vector.broadcast %230 : f32 to vector<2x16x16xf32>
    %232 = arith.mulf %228, %231 : vector<2x16x16xf32>
    %233 = arith.addf %220, %232 : vector<2x16x16xf32>
    %234 = vector.extract_strided_slice %10 {offsets = [0, 0, 17], sizes = [2, 16, 1], strides = [1, 1, 1]} : vector<2x16x32xf32> to vector<2x16x1xf32>
    %235 = vector.extract_strided_slice %11 {offsets = [0, 17, 0], sizes = [2, 1, 16], strides = [1, 1, 1]} : vector<2x32x16xf32> to vector<2x1x16xf32>
    %236 = vector.broadcast %234 : vector<2x16x1xf32> to vector<2x16x16xf32>
    %237 = vector.broadcast %235 : vector<2x1x16xf32> to vector<2x16x16xf32>
    %238 = arith.addf %236, %237 : vector<2x16x16xf32>
    %cst_29 = arith.constant 2.000000e-01 : f32
    %239 = vector.broadcast %cst_29 : f32 to vector<2x16x16xf32>
    %240 = arith.mulf %239, %238 : vector<2x16x16xf32>
    %241 = arith.maximumf %238, %240 : vector<2x16x16xf32>
    %242 = vector.extract_strided_slice %7 {offsets = [0, 17], sizes = [1, 1], strides = [1, 1]} : vector<1x32xf32> to vector<1x1xf32>
    %243 = vector.extract %242[0, 0] : f32 from vector<1x1xf32>
    %244 = vector.broadcast %243 : f32 to vector<2x16x16xf32>
    %245 = arith.mulf %241, %244 : vector<2x16x16xf32>
    %246 = arith.addf %233, %245 : vector<2x16x16xf32>
    %247 = vector.extract_strided_slice %10 {offsets = [0, 0, 18], sizes = [2, 16, 1], strides = [1, 1, 1]} : vector<2x16x32xf32> to vector<2x16x1xf32>
    %248 = vector.extract_strided_slice %11 {offsets = [0, 18, 0], sizes = [2, 1, 16], strides = [1, 1, 1]} : vector<2x32x16xf32> to vector<2x1x16xf32>
    %249 = vector.broadcast %247 : vector<2x16x1xf32> to vector<2x16x16xf32>
    %250 = vector.broadcast %248 : vector<2x1x16xf32> to vector<2x16x16xf32>
    %251 = arith.addf %249, %250 : vector<2x16x16xf32>
    %cst_30 = arith.constant 2.000000e-01 : f32
    %252 = vector.broadcast %cst_30 : f32 to vector<2x16x16xf32>
    %253 = arith.mulf %252, %251 : vector<2x16x16xf32>
    %254 = arith.maximumf %251, %253 : vector<2x16x16xf32>
    %255 = vector.extract_strided_slice %7 {offsets = [0, 18], sizes = [1, 1], strides = [1, 1]} : vector<1x32xf32> to vector<1x1xf32>
    %256 = vector.extract %255[0, 0] : f32 from vector<1x1xf32>
    %257 = vector.broadcast %256 : f32 to vector<2x16x16xf32>
    %258 = arith.mulf %254, %257 : vector<2x16x16xf32>
    %259 = arith.addf %246, %258 : vector<2x16x16xf32>
    %260 = vector.extract_strided_slice %10 {offsets = [0, 0, 19], sizes = [2, 16, 1], strides = [1, 1, 1]} : vector<2x16x32xf32> to vector<2x16x1xf32>
    %261 = vector.extract_strided_slice %11 {offsets = [0, 19, 0], sizes = [2, 1, 16], strides = [1, 1, 1]} : vector<2x32x16xf32> to vector<2x1x16xf32>
    %262 = vector.broadcast %260 : vector<2x16x1xf32> to vector<2x16x16xf32>
    %263 = vector.broadcast %261 : vector<2x1x16xf32> to vector<2x16x16xf32>
    %264 = arith.addf %262, %263 : vector<2x16x16xf32>
    %cst_31 = arith.constant 2.000000e-01 : f32
    %265 = vector.broadcast %cst_31 : f32 to vector<2x16x16xf32>
    %266 = arith.mulf %265, %264 : vector<2x16x16xf32>
    %267 = arith.maximumf %264, %266 : vector<2x16x16xf32>
    %268 = vector.extract_strided_slice %7 {offsets = [0, 19], sizes = [1, 1], strides = [1, 1]} : vector<1x32xf32> to vector<1x1xf32>
    %269 = vector.extract %268[0, 0] : f32 from vector<1x1xf32>
    %270 = vector.broadcast %269 : f32 to vector<2x16x16xf32>
    %271 = arith.mulf %267, %270 : vector<2x16x16xf32>
    %272 = arith.addf %259, %271 : vector<2x16x16xf32>
    %273 = vector.extract_strided_slice %10 {offsets = [0, 0, 20], sizes = [2, 16, 1], strides = [1, 1, 1]} : vector<2x16x32xf32> to vector<2x16x1xf32>
    %274 = vector.extract_strided_slice %11 {offsets = [0, 20, 0], sizes = [2, 1, 16], strides = [1, 1, 1]} : vector<2x32x16xf32> to vector<2x1x16xf32>
    %275 = vector.broadcast %273 : vector<2x16x1xf32> to vector<2x16x16xf32>
    %276 = vector.broadcast %274 : vector<2x1x16xf32> to vector<2x16x16xf32>
    %277 = arith.addf %275, %276 : vector<2x16x16xf32>
    %cst_32 = arith.constant 2.000000e-01 : f32
    %278 = vector.broadcast %cst_32 : f32 to vector<2x16x16xf32>
    %279 = arith.mulf %278, %277 : vector<2x16x16xf32>
    %280 = arith.maximumf %277, %279 : vector<2x16x16xf32>
    %281 = vector.extract_strided_slice %7 {offsets = [0, 20], sizes = [1, 1], strides = [1, 1]} : vector<1x32xf32> to vector<1x1xf32>
    %282 = vector.extract %281[0, 0] : f32 from vector<1x1xf32>
    %283 = vector.broadcast %282 : f32 to vector<2x16x16xf32>
    %284 = arith.mulf %280, %283 : vector<2x16x16xf32>
    %285 = arith.addf %272, %284 : vector<2x16x16xf32>
    %286 = vector.extract_strided_slice %10 {offsets = [0, 0, 21], sizes = [2, 16, 1], strides = [1, 1, 1]} : vector<2x16x32xf32> to vector<2x16x1xf32>
    %287 = vector.extract_strided_slice %11 {offsets = [0, 21, 0], sizes = [2, 1, 16], strides = [1, 1, 1]} : vector<2x32x16xf32> to vector<2x1x16xf32>
    %288 = vector.broadcast %286 : vector<2x16x1xf32> to vector<2x16x16xf32>
    %289 = vector.broadcast %287 : vector<2x1x16xf32> to vector<2x16x16xf32>
    %290 = arith.addf %288, %289 : vector<2x16x16xf32>
    %cst_33 = arith.constant 2.000000e-01 : f32
    %291 = vector.broadcast %cst_33 : f32 to vector<2x16x16xf32>
    %292 = arith.mulf %291, %290 : vector<2x16x16xf32>
    %293 = arith.maximumf %290, %292 : vector<2x16x16xf32>
    %294 = vector.extract_strided_slice %7 {offsets = [0, 21], sizes = [1, 1], strides = [1, 1]} : vector<1x32xf32> to vector<1x1xf32>
    %295 = vector.extract %294[0, 0] : f32 from vector<1x1xf32>
    %296 = vector.broadcast %295 : f32 to vector<2x16x16xf32>
    %297 = arith.mulf %293, %296 : vector<2x16x16xf32>
    %298 = arith.addf %285, %297 : vector<2x16x16xf32>
    %299 = vector.extract_strided_slice %10 {offsets = [0, 0, 22], sizes = [2, 16, 1], strides = [1, 1, 1]} : vector<2x16x32xf32> to vector<2x16x1xf32>
    %300 = vector.extract_strided_slice %11 {offsets = [0, 22, 0], sizes = [2, 1, 16], strides = [1, 1, 1]} : vector<2x32x16xf32> to vector<2x1x16xf32>
    %301 = vector.broadcast %299 : vector<2x16x1xf32> to vector<2x16x16xf32>
    %302 = vector.broadcast %300 : vector<2x1x16xf32> to vector<2x16x16xf32>
    %303 = arith.addf %301, %302 : vector<2x16x16xf32>
    %cst_34 = arith.constant 2.000000e-01 : f32
    %304 = vector.broadcast %cst_34 : f32 to vector<2x16x16xf32>
    %305 = arith.mulf %304, %303 : vector<2x16x16xf32>
    %306 = arith.maximumf %303, %305 : vector<2x16x16xf32>
    %307 = vector.extract_strided_slice %7 {offsets = [0, 22], sizes = [1, 1], strides = [1, 1]} : vector<1x32xf32> to vector<1x1xf32>
    %308 = vector.extract %307[0, 0] : f32 from vector<1x1xf32>
    %309 = vector.broadcast %308 : f32 to vector<2x16x16xf32>
    %310 = arith.mulf %306, %309 : vector<2x16x16xf32>
    %311 = arith.addf %298, %310 : vector<2x16x16xf32>
    %312 = vector.extract_strided_slice %10 {offsets = [0, 0, 23], sizes = [2, 16, 1], strides = [1, 1, 1]} : vector<2x16x32xf32> to vector<2x16x1xf32>
    %313 = vector.extract_strided_slice %11 {offsets = [0, 23, 0], sizes = [2, 1, 16], strides = [1, 1, 1]} : vector<2x32x16xf32> to vector<2x1x16xf32>
    %314 = vector.broadcast %312 : vector<2x16x1xf32> to vector<2x16x16xf32>
    %315 = vector.broadcast %313 : vector<2x1x16xf32> to vector<2x16x16xf32>
    %316 = arith.addf %314, %315 : vector<2x16x16xf32>
    %cst_35 = arith.constant 2.000000e-01 : f32
    %317 = vector.broadcast %cst_35 : f32 to vector<2x16x16xf32>
    %318 = arith.mulf %317, %316 : vector<2x16x16xf32>
    %319 = arith.maximumf %316, %318 : vector<2x16x16xf32>
    %320 = vector.extract_strided_slice %7 {offsets = [0, 23], sizes = [1, 1], strides = [1, 1]} : vector<1x32xf32> to vector<1x1xf32>
    %321 = vector.extract %320[0, 0] : f32 from vector<1x1xf32>
    %322 = vector.broadcast %321 : f32 to vector<2x16x16xf32>
    %323 = arith.mulf %319, %322 : vector<2x16x16xf32>
    %324 = arith.addf %311, %323 : vector<2x16x16xf32>
    %325 = vector.extract_strided_slice %10 {offsets = [0, 0, 24], sizes = [2, 16, 1], strides = [1, 1, 1]} : vector<2x16x32xf32> to vector<2x16x1xf32>
    %326 = vector.extract_strided_slice %11 {offsets = [0, 24, 0], sizes = [2, 1, 16], strides = [1, 1, 1]} : vector<2x32x16xf32> to vector<2x1x16xf32>
    %327 = vector.broadcast %325 : vector<2x16x1xf32> to vector<2x16x16xf32>
    %328 = vector.broadcast %326 : vector<2x1x16xf32> to vector<2x16x16xf32>
    %329 = arith.addf %327, %328 : vector<2x16x16xf32>
    %cst_36 = arith.constant 2.000000e-01 : f32
    %330 = vector.broadcast %cst_36 : f32 to vector<2x16x16xf32>
    %331 = arith.mulf %330, %329 : vector<2x16x16xf32>
    %332 = arith.maximumf %329, %331 : vector<2x16x16xf32>
    %333 = vector.extract_strided_slice %7 {offsets = [0, 24], sizes = [1, 1], strides = [1, 1]} : vector<1x32xf32> to vector<1x1xf32>
    %334 = vector.extract %333[0, 0] : f32 from vector<1x1xf32>
    %335 = vector.broadcast %334 : f32 to vector<2x16x16xf32>
    %336 = arith.mulf %332, %335 : vector<2x16x16xf32>
    %337 = arith.addf %324, %336 : vector<2x16x16xf32>
    %338 = vector.extract_strided_slice %10 {offsets = [0, 0, 25], sizes = [2, 16, 1], strides = [1, 1, 1]} : vector<2x16x32xf32> to vector<2x16x1xf32>
    %339 = vector.extract_strided_slice %11 {offsets = [0, 25, 0], sizes = [2, 1, 16], strides = [1, 1, 1]} : vector<2x32x16xf32> to vector<2x1x16xf32>
    %340 = vector.broadcast %338 : vector<2x16x1xf32> to vector<2x16x16xf32>
    %341 = vector.broadcast %339 : vector<2x1x16xf32> to vector<2x16x16xf32>
    %342 = arith.addf %340, %341 : vector<2x16x16xf32>
    %cst_37 = arith.constant 2.000000e-01 : f32
    %343 = vector.broadcast %cst_37 : f32 to vector<2x16x16xf32>
    %344 = arith.mulf %343, %342 : vector<2x16x16xf32>
    %345 = arith.maximumf %342, %344 : vector<2x16x16xf32>
    %346 = vector.extract_strided_slice %7 {offsets = [0, 25], sizes = [1, 1], strides = [1, 1]} : vector<1x32xf32> to vector<1x1xf32>
    %347 = vector.extract %346[0, 0] : f32 from vector<1x1xf32>
    %348 = vector.broadcast %347 : f32 to vector<2x16x16xf32>
    %349 = arith.mulf %345, %348 : vector<2x16x16xf32>
    %350 = arith.addf %337, %349 : vector<2x16x16xf32>
    %351 = vector.extract_strided_slice %10 {offsets = [0, 0, 26], sizes = [2, 16, 1], strides = [1, 1, 1]} : vector<2x16x32xf32> to vector<2x16x1xf32>
    %352 = vector.extract_strided_slice %11 {offsets = [0, 26, 0], sizes = [2, 1, 16], strides = [1, 1, 1]} : vector<2x32x16xf32> to vector<2x1x16xf32>
    %353 = vector.broadcast %351 : vector<2x16x1xf32> to vector<2x16x16xf32>
    %354 = vector.broadcast %352 : vector<2x1x16xf32> to vector<2x16x16xf32>
    %355 = arith.addf %353, %354 : vector<2x16x16xf32>
    %cst_38 = arith.constant 2.000000e-01 : f32
    %356 = vector.broadcast %cst_38 : f32 to vector<2x16x16xf32>
    %357 = arith.mulf %356, %355 : vector<2x16x16xf32>
    %358 = arith.maximumf %355, %357 : vector<2x16x16xf32>
    %359 = vector.extract_strided_slice %7 {offsets = [0, 26], sizes = [1, 1], strides = [1, 1]} : vector<1x32xf32> to vector<1x1xf32>
    %360 = vector.extract %359[0, 0] : f32 from vector<1x1xf32>
    %361 = vector.broadcast %360 : f32 to vector<2x16x16xf32>
    %362 = arith.mulf %358, %361 : vector<2x16x16xf32>
    %363 = arith.addf %350, %362 : vector<2x16x16xf32>
    %364 = vector.extract_strided_slice %10 {offsets = [0, 0, 27], sizes = [2, 16, 1], strides = [1, 1, 1]} : vector<2x16x32xf32> to vector<2x16x1xf32>
    %365 = vector.extract_strided_slice %11 {offsets = [0, 27, 0], sizes = [2, 1, 16], strides = [1, 1, 1]} : vector<2x32x16xf32> to vector<2x1x16xf32>
    %366 = vector.broadcast %364 : vector<2x16x1xf32> to vector<2x16x16xf32>
    %367 = vector.broadcast %365 : vector<2x1x16xf32> to vector<2x16x16xf32>
    %368 = arith.addf %366, %367 : vector<2x16x16xf32>
    %cst_39 = arith.constant 2.000000e-01 : f32
    %369 = vector.broadcast %cst_39 : f32 to vector<2x16x16xf32>
    %370 = arith.mulf %369, %368 : vector<2x16x16xf32>
    %371 = arith.maximumf %368, %370 : vector<2x16x16xf32>
    %372 = vector.extract_strided_slice %7 {offsets = [0, 27], sizes = [1, 1], strides = [1, 1]} : vector<1x32xf32> to vector<1x1xf32>
    %373 = vector.extract %372[0, 0] : f32 from vector<1x1xf32>
    %374 = vector.broadcast %373 : f32 to vector<2x16x16xf32>
    %375 = arith.mulf %371, %374 : vector<2x16x16xf32>
    %376 = arith.addf %363, %375 : vector<2x16x16xf32>
    %377 = vector.extract_strided_slice %10 {offsets = [0, 0, 28], sizes = [2, 16, 1], strides = [1, 1, 1]} : vector<2x16x32xf32> to vector<2x16x1xf32>
    %378 = vector.extract_strided_slice %11 {offsets = [0, 28, 0], sizes = [2, 1, 16], strides = [1, 1, 1]} : vector<2x32x16xf32> to vector<2x1x16xf32>
    %379 = vector.broadcast %377 : vector<2x16x1xf32> to vector<2x16x16xf32>
    %380 = vector.broadcast %378 : vector<2x1x16xf32> to vector<2x16x16xf32>
    %381 = arith.addf %379, %380 : vector<2x16x16xf32>
    %cst_40 = arith.constant 2.000000e-01 : f32
    %382 = vector.broadcast %cst_40 : f32 to vector<2x16x16xf32>
    %383 = arith.mulf %382, %381 : vector<2x16x16xf32>
    %384 = arith.maximumf %381, %383 : vector<2x16x16xf32>
    %385 = vector.extract_strided_slice %7 {offsets = [0, 28], sizes = [1, 1], strides = [1, 1]} : vector<1x32xf32> to vector<1x1xf32>
    %386 = vector.extract %385[0, 0] : f32 from vector<1x1xf32>
    %387 = vector.broadcast %386 : f32 to vector<2x16x16xf32>
    %388 = arith.mulf %384, %387 : vector<2x16x16xf32>
    %389 = arith.addf %376, %388 : vector<2x16x16xf32>
    %390 = vector.extract_strided_slice %10 {offsets = [0, 0, 29], sizes = [2, 16, 1], strides = [1, 1, 1]} : vector<2x16x32xf32> to vector<2x16x1xf32>
    %391 = vector.extract_strided_slice %11 {offsets = [0, 29, 0], sizes = [2, 1, 16], strides = [1, 1, 1]} : vector<2x32x16xf32> to vector<2x1x16xf32>
    %392 = vector.broadcast %390 : vector<2x16x1xf32> to vector<2x16x16xf32>
    %393 = vector.broadcast %391 : vector<2x1x16xf32> to vector<2x16x16xf32>
    %394 = arith.addf %392, %393 : vector<2x16x16xf32>
    %cst_41 = arith.constant 2.000000e-01 : f32
    %395 = vector.broadcast %cst_41 : f32 to vector<2x16x16xf32>
    %396 = arith.mulf %395, %394 : vector<2x16x16xf32>
    %397 = arith.maximumf %394, %396 : vector<2x16x16xf32>
    %398 = vector.extract_strided_slice %7 {offsets = [0, 29], sizes = [1, 1], strides = [1, 1]} : vector<1x32xf32> to vector<1x1xf32>
    %399 = vector.extract %398[0, 0] : f32 from vector<1x1xf32>
    %400 = vector.broadcast %399 : f32 to vector<2x16x16xf32>
    %401 = arith.mulf %397, %400 : vector<2x16x16xf32>
    %402 = arith.addf %389, %401 : vector<2x16x16xf32>
    %403 = vector.extract_strided_slice %10 {offsets = [0, 0, 30], sizes = [2, 16, 1], strides = [1, 1, 1]} : vector<2x16x32xf32> to vector<2x16x1xf32>
    %404 = vector.extract_strided_slice %11 {offsets = [0, 30, 0], sizes = [2, 1, 16], strides = [1, 1, 1]} : vector<2x32x16xf32> to vector<2x1x16xf32>
    %405 = vector.broadcast %403 : vector<2x16x1xf32> to vector<2x16x16xf32>
    %406 = vector.broadcast %404 : vector<2x1x16xf32> to vector<2x16x16xf32>
    %407 = arith.addf %405, %406 : vector<2x16x16xf32>
    %cst_42 = arith.constant 2.000000e-01 : f32
    %408 = vector.broadcast %cst_42 : f32 to vector<2x16x16xf32>
    %409 = arith.mulf %408, %407 : vector<2x16x16xf32>
    %410 = arith.maximumf %407, %409 : vector<2x16x16xf32>
    %411 = vector.extract_strided_slice %7 {offsets = [0, 30], sizes = [1, 1], strides = [1, 1]} : vector<1x32xf32> to vector<1x1xf32>
    %412 = vector.extract %411[0, 0] : f32 from vector<1x1xf32>
    %413 = vector.broadcast %412 : f32 to vector<2x16x16xf32>
    %414 = arith.mulf %410, %413 : vector<2x16x16xf32>
    %415 = arith.addf %402, %414 : vector<2x16x16xf32>
    %416 = vector.extract_strided_slice %10 {offsets = [0, 0, 31], sizes = [2, 16, 1], strides = [1, 1, 1]} : vector<2x16x32xf32> to vector<2x16x1xf32>
    %417 = vector.extract_strided_slice %11 {offsets = [0, 31, 0], sizes = [2, 1, 16], strides = [1, 1, 1]} : vector<2x32x16xf32> to vector<2x1x16xf32>
    %418 = vector.broadcast %416 : vector<2x16x1xf32> to vector<2x16x16xf32>
    %419 = vector.broadcast %417 : vector<2x1x16xf32> to vector<2x16x16xf32>
    %420 = arith.addf %418, %419 : vector<2x16x16xf32>
    %cst_43 = arith.constant 2.000000e-01 : f32
    %421 = vector.broadcast %cst_43 : f32 to vector<2x16x16xf32>
    %422 = arith.mulf %421, %420 : vector<2x16x16xf32>
    %423 = arith.maximumf %420, %422 : vector<2x16x16xf32>
    %424 = vector.extract_strided_slice %7 {offsets = [0, 31], sizes = [1, 1], strides = [1, 1]} : vector<1x32xf32> to vector<1x1xf32>
    %425 = vector.extract %424[0, 0] : f32 from vector<1x1xf32>
    %426 = vector.broadcast %425 : f32 to vector<2x16x16xf32>
    %427 = arith.mulf %423, %426 : vector<2x16x16xf32>
    %428 = arith.addf %415, %427 : vector<2x16x16xf32>
    %429 = arith.mulf %428, %428 : vector<2x16x16xf32>
    %430 = vector.shape_cast %429 : vector<2x16x16xf32> to vector<1x2x16x16xf32>
    %cst_44 = arith.constant dense<0.000000e+00> : vector<1xf32>
    %431 = vector.multi_reduction <add>, %430, %cst_44 [1, 2, 3] : vector<1x2x16x16xf32> to vector<1xf32>
    %432 = vector.shape_cast %431 : vector<1xf32> to vector<1x1x1x1xf32>
    %433 = vector.extract %432[0, 0, 0, 0] : f32 from vector<1x1x1x1xf32>
    %cst_45 = arith.constant 1.000000e-30 : f32
    %434 = arith.addf %433, %cst_45 : f32
    %435 = math.rsqrt %434 : f32
    %436 = vector.broadcast %435 : f32 to vector<2x16x16xf32>
    %437 = arith.mulf %428, %436 : vector<2x16x16xf32>
    %cst_46 = arith.constant -1.000000e+30 : f32
    %438 = vector.broadcast %cst_46 : f32 to vector<2x16x16xf32>
    %439 = arith.select %3, %437, %438 : vector<2x16x16xi1>, vector<2x16x16xf32>
    %cst_47 = arith.constant dense<0xFF800000> : vector<2x16xf32>
    %440 = vector.multi_reduction <maximumf>, %439, %cst_47 [2] : vector<2x16x16xf32> to vector<2x16xf32>
    %441 = vector.shape_cast %440 : vector<2x16xf32> to vector<2x16x1xf32>
    %442 = vector.broadcast %441 : vector<2x16x1xf32> to vector<2x16x16xf32>
    %443 = arith.subf %439, %442 : vector<2x16x16xf32>
    %444 = math.exp %443 : vector<2x16x16xf32>
    %cst_48 = arith.constant dense<0.000000e+00> : vector<2x16xf32>
    %445 = vector.multi_reduction <add>, %444, %cst_48 [2] : vector<2x16x16xf32> to vector<2x16xf32>
    %446 = vector.shape_cast %445 : vector<2x16xf32> to vector<2x16x1xf32>
    %447 = tpu.reciprocal %446 {approx = true} : vector<2x16x1xf32> -> vector<2x16x1xf32>
    %448 = vector.broadcast %447 : vector<2x16x1xf32> to vector<2x16x16xf32>
    %449 = arith.mulf %444, %448 : vector<2x16x16xf32>
    %450 = arith.truncf %449 : vector<2x16x16xf32> to vector<2x16x16xbf16>
    %451 = arith.truncf %10 : vector<2x16x32xf32> to vector<2x16x32xbf16>
    %cst_49 = arith.constant dense<0.000000e+00> : vector<2x16x32xf32>
    %452 = tpu.matmul %450, %451, %cst_49 {dimension_numbers = #tpu.dot_dimension_numbers<[2], [1], [1], [2], [0, 0, 0, 1, 1, 2], [0], [0]>} : vector<2x16x16xbf16>, vector<2x16x32xbf16>, vector<2x16x32xf32> -> vector<2x16x32xf32>
    %cst_50 = arith.constant 0.000000e+00 : f32
    %453 = vector.broadcast %cst_50 : f32 to vector<2x16x32xf32>
    %454 = arith.cmpf ogt, %452, %453 : vector<2x16x32xf32>
    %cst_51 = arith.constant 0.000000e+00 : f32
    %455 = vector.broadcast %cst_51 : f32 to vector<2x16x32xf32>
    %456 = arith.minimumf %452, %455 : vector<2x16x32xf32>
    %457 = math.exp %456 : vector<2x16x32xf32>
    %cst_52 = arith.constant 1.000000e+00 : f32
    %458 = vector.broadcast %cst_52 : f32 to vector<2x16x32xf32>
    %459 = arith.subf %457, %458 : vector<2x16x32xf32>
    %460 = arith.select %454, %452, %459 : vector<2x16x32xi1>, vector<2x16x32xf32>
    %461 = arith.truncf %460 : vector<2x16x32xf32> to vector<2x16x32xbf16>
    %c0_53 = arith.constant 0 : index
    %c0_54 = arith.constant 0 : index
    %c0_55 = arith.constant 0 : index
    %c0_56 = arith.constant 0 : index
    %462 = vector.load %arg5[%c0_53, %c0_54, %c0_55, %c0_56] : memref<1x2x16x32xbf16, #tpu.memory_space<vmem>>, vector<1x2x16x32xbf16>
    %463 = vector.shape_cast %462 : vector<1x2x16x32xbf16> to vector<2x16x32xbf16>
    %464 = vector.shape_cast %461 : vector<2x16x32xbf16> to vector<1x2x16x32xbf16>
    tpu.vector_store %arg5[%c0_53, %c0_54, %c0_55, %c0_56], %464 {strides = array<i32>} : memref<1x2x16x32xbf16, #tpu.memory_space<vmem>>, vector<1x2x16x32xbf16>,
    return
  }
  func.func @transform_0(%arg0: i32) -> (i32, i32, i32) {
    %c0_i32 = arith.constant 0 : i32
    %c0_i32_0 = arith.constant 0 : i32
    %c0_i32_1 = arith.constant 0 : i32
    %c0_i32_2 = arith.constant 0 : i32
    return %c0_i32, %c0_i32_0, %c0_i32_1 : i32, i32, i32
  }
  func.func @transform_1(%arg0: i32) -> (i32, i32, i32) {
    %c0_i32 = arith.constant 0 : i32
    %c0_i32_0 = arith.constant 0 : i32
    %c0_i32_1 = arith.constant 0 : i32
    %c0_i32_2 = arith.constant 0 : i32
    return %c0_i32, %c0_i32_0, %c0_i32_1 : i32, i32, i32
  }
  func.func @transform_2(%arg0: i32) -> (i32, i32, i32) {
    %c0_i32 = arith.constant 0 : i32
    %c0_i32_0 = arith.constant 0 : i32
    %c0_i32_1 = arith.constant 0 : i32
    return %arg0, %c0_i32, %c0_i32_0 : i32, i32, i32
  }
  func.func @transform_3(%arg0: i32) -> (i32, i32, i32) {
    %c0_i32 = arith.constant 0 : i32
    %c0_i32_0 = arith.constant 0 : i32
    %c0_i32_1 = arith.constant 0 : i32
    return %arg0, %c0_i32, %c0_i32_0 : i32, i32, i32
  }
  func.func @transform_4(%arg0: i32) -> (i32, i32, i32, i32) {
    %c0_i32 = arith.constant 0 : i32
    %c0_i32_0 = arith.constant 0 : i32
    %c0_i32_1 = arith.constant 0 : i32
    %c0_i32_2 = arith.constant 0 : i32
    return %arg0, %c0_i32, %c0_i32_0, %c0_i32_1 : i32, i32, i32, i32
  }
}

</mosaic_0001>

<bundles_post_ra>
// kernel: tpu_custom_call.1
= control target key start
LH: loop header
LB: loop body
LE: loop exit
PB: predicated region body
PF: predicated region fallthrough
CT: control target
= control target key end

     0   :  { %s4269_s0 = inlined_call_operand.hbm [shape: bf16[2,16,16], index: 0, kind: input, shape index: {}]   ;;  %s4270_s1 = inlined_call_operand.hbm [shape: s8[2,16,16], index: 1, kind: input, shape index: {}]   ;;  %s4271_s2 = inlined_call_operand.hbm [shape: bf16[4,16,32], index: 2, kind: input, shape index: {}]   ;;  %s4272_s3 = inlined_call_operand.vmem [shape: f32[4,1,32], index: 3, kind: input, shape index: {}]   ;;  %s4273_s4 = inlined_call_operand.hbm [shape: bf16[4,2,16,32], index: 4, kind: output, shape index: {}]  }
   0x1   :  { %4334 = sst [smem:[#allocation39_spill]] %s4269_s0 }
   0x2   :  { %9 = vsyncpa [#allocation3], 0 }
   0x3   :  { %10 = vsyncpa [#allocation6], 0 }
   0x4   :  { %11 = vsyncpa [#allocation4], 0 }
   0x5   :  { %13 = vsyncpa [#allocation4 + $0x1], 0  ;;  %s2954_s15 = smov 0   ;;  %s2956_s16 = smov 0  }
   0x6   :  { %s2958_s17 = smov 0   ;;  %s2960_s18 = smov 0  }
   0x7 LB: > { %s2975_s19 = sadd.s32 4294967295, %s2852_s18   ;;  %s2290_s20 = sadd.s32 4294967294, %s2852_s18   ;;  %s2852_s18 = sphi %s2960_s18, %s4446_s18   ;;  %s2848_s17 = sphi %s2958_s17, %s4445_s17   ;;  %s2844_s16 = sphi %s2956_s16, %s4444_s16   ;;  %s2840_s15 = sphi %s2954_s15, %s4443_s15  }
   0x8   : > { %s2979_s21 = sadd.s32 1, %s2852_s18   ;;  %s68_s22 = sadd.s32 1, %s2848_s17 }
   0x9   : > { %s65_s23 = ssub.s32 %s2852_s18, %s2979_s21  ;;  %p75_p0 = scmp.ne.s32.totalorder %s2848_s17, %s2844_s16 }
   0xa   : > { %p66_p1 = scmp.eq.s32.totalorder %s65_s23, 0  ;;  %p76_p2 = scmp.eq.s32.totalorder %s2852_s18, 0 }
   0xb   : > { %p81_p3 = scmp.ne.s32.totalorder %s2844_s16, %s2840_s15  ;;  %p4274_p4 = scmp.eq.s32.totalorder %s2975_s19, 0 }
   0xc   : > { %s2991_s24 = scalar_select %p66_p1, %s2848_s17, %s68_s22  }
   0xd   : > { %p2993_p5 = por %p76_p2, %p75_p0  ;;  %p2999_p6 = por %p4274_p4, %p81_p3 }
   0xe   : > { %p131_p7 = scmp.eq.s32.totalorder %s2975_s19, 3  ;;  %p137_p8 = scmp.eq.s32.totalorder %s2290_s20, 3 }
   0xf   : > { %s4335_s25 = scalar_select %p2993_p5, 1, 0 }
  0x10   : > { %s4336_s26 = scalar_select %p2999_p6, 1, 0 }
  0x11   : > { %p2291_p9 = scmp.ge.s32.totalorder %s2852_s18, 1  ;;  %p144_p10 = scmp.lt.s32.totalorder %s2852_s18, 5 }
  0x12   : > { %p3006_p11 = por %p131_p7, %p75_p0  ;;  %p3010_p12 = por %p137_p8, %p81_p3 }
  0x13   : > { %p3014_p13 = pnand %p2291_p9, %p144_p10  ;;  %s2854_s30 = smov [#allocation2]  }
  0x14   : > { %s4337_s27 = scalar_select %p3006_p11, 1, 0 }
  0x15   : > { %s4338_s28 = scalar_select %p3010_p12, 1, 0 }
  0x16   : > { %s4339_s29 = scalar_select %p3014_p13, 1, 0 }
  0x17   : > { %p2434_p1 = pneg %p3014_p13  ;;  %s156_s5 = sshll.u32 %s2854_s30, 4  ;;  %s157_s5 = int_to_ptr.vmem [resolvable:$true] %s156_s5 }
  0x18   : > { %s2855_s7 = smov [#allocation5]   ;;  %s4341_s0 = sld [smem:[#allocation39_spill]] }
  0x19   : > { %p3022_p2 = pnand %p2434_p1, %p4274_p4  ;;  %s169_s8 = sshll.u32 %s2855_s7, 4  ;;  %s170_s8 = int_to_ptr.vmem [resolvable:$true] %s169_s8 }
  0x1b   : > { %p2694_p7 = pneg %p3022_p2 }
  0x1e   : > { %s2692_s11 = scalar_lea.hbm %s4341_s0, 256 }
  0x1f   : > { %p2693_p3 = scmp.ne.s32.totalorder %s4341_s0, %s2692_s11  ;;  %p2699_p10 = scmp.lt.u32.totalorder %s2692_s11, %s4341_s0 }
  0x21   : > { %p2695_p8 = pnand %p2694_p7, %p2693_p3 }
  0x23   : > { %p2696_p9 = pneg %p2695_p8 }
  0x25   : > { %p2701_p1 = pnand %p2699_p10, %p2696_p9 }
  0x27   : > { %2704 = shalt.err (!%p2701_p1)
}
  0x28   : > { %s2705_s22 = scalar_lea.vmem %s157_s5, 256  ;;  %p2713_p11 = scmp.lt.s32.totalorder %s157_s5, %s157_s5 }
  0x29   : > { %p2706_p4 = scmp.ne.s32.totalorder %s157_s5, %s2705_s22  ;;  %p2714_p6 = scmp.lt.s32.totalorder %s2705_s22, %s2705_s22 }
  0x2b   : > { %p2708_p0 = pnand %p2706_p4, %p2694_p7  ;;  %p2715_p13 = por %p2714_p6, %p2713_p11 }
  0x2d   : > { %p2709_p12 = pneg %p2708_p0 }
  0x2f   : > { %p2716_p5 = pnand %p2715_p13, %p2709_p12 }
  0x31   : > { %2719 = shalt.err (!%p2716_p5)
}
  0x32   : > { %s4279_s23 = smov 64   ;;  %s4280_s30 = smov 4  }
  0x33   : > { %2437 = dma.hbm_to_vmem [thread:$0]  (!%p3022_p2), %s4341_s0, 256, %s157_s5, [#allocation3], %s4279_s23, %s4279_s23, %s4280_s30  }
  0x34   : > { %p4342_p4 = scmp.ne.s32.totalorder %s4335_s25, 0  ;;  %p4343_p0 = scmp.lt.s32.totalorder %s2852_s18, 4 }
  0x35   : > { %s183_s11 = sand.u32 1, %s2852_s18   ;;  %s2720_s14 = scalar_lea.hbm %s4270_s1, 128 }
  0x36   : > { %p3056_p6 = pnand %p4343_p0, %p4342_p4  ;;  %p2721_p5 = scmp.ne.s32.totalorder %s4270_s1, %s2720_s14 }
  0x37   : > { %p2727_p13 = scmp.lt.u32.totalorder %s2720_s14, %s4270_s1 }
  0x38   : > { %s4344_s10 = scalar_select %p3056_p6, 1, 0 }
  0x39   : > { %p2723_p11 = pnand %p2721_p5, %p2694_p7 }
  0x3b   : > { %p2724_p12 = pneg %p2723_p11 }
  0x3d   : > { %p2729_p3 = pnand %p2727_p13, %p2724_p12 }
  0x3f   : > { %2732 = shalt.err (!%p2729_p3)
}
  0x40   : > { %s2733_s7 = scalar_lea.vmem %s170_s8, 128  ;;  %p2741_p1 = scmp.lt.s32.totalorder %s170_s8, %s170_s8 }
  0x41   : > { %p2734_p8 = scmp.ne.s32.totalorder %s170_s8, %s2733_s7  ;;  %p2742_p4 = scmp.lt.s32.totalorder %s2733_s7, %s2733_s7 }
  0x43   : > { %p2736_p9 = pnand %p2734_p8, %p2694_p7  ;;  %p2743_p0 = por %p2742_p4, %p2741_p1 }
  0x45   : > { %p2737_p10 = pneg %p2736_p9 }
  0x47   : > { %p2744_p6 = pnand %p2743_p0, %p2737_p10 }
  0x49   : > { %2747 = shalt.err (!%p2744_p6)
}
  0x4a   : > { %s2858_s9 = smov 32   ;;  %s2859_s12 = smov 2  }
  0x4b   : > { %2440 = dma.hbm_to_vmem [thread:$0]  (!%p3022_p2), %s4270_s1, 128, %s170_s8, [#allocation6], %s2858_s9, %s2858_s9, %s2859_s12  }
  0x4c   : > { %s185_s20 = sand.u32 1, %s2848_s17   ;;  %s2323_s25 = sshll.u32 %s2852_s18, 7 }
  0x4d   : > { %s2295_s22 = sshll.u32 %s185_s20, 3  ;;  %s3086_s23 = scalar_lea.hbm %s4271_s2, %s2323_s25 }
  0x4e   : > { %s187_s30 = scalar_lea.vmem [#allocation7], %s2295_s22  ;;  %s3090_s6 = scalar_lea.sflag [#allocation3], %s183_s11 }
  0x4f   : > { %s194_s0 = sshll.u32 %s187_s30, 4  ;;  %s2748_s13 = scalar_lea.hbm %s3086_s23, 128  ;;  %s3088_s0 = int_to_ptr.vmem [resolvable:$true] %s194_s0 }
  0x50   : > { %p2749_p2 = scmp.ne.s32.totalorder %s3086_s23, %s2748_s13  ;;  %p4345_p7 = scmp.ne.s32.totalorder %s4344_s10, 0 }
  0x51   : > { %s2753_s12 = scalar_lea.hbm %s4271_s2, 512  ;;  %p2754_p12 = scmp.lt.u32.totalorder %s3086_s23, %s4271_s2 }
  0x52   : > { %p2750_p6 = pneg %p4345_p7  ;;  %p2755_p13 = scmp.lt.u32.totalorder %s2753_s12, %s2748_s13 }
  0x53   : > { %p2757_p8 = scmp.lt.u32.totalorder %s2748_s13, %s3086_s23 }
  0x54   : > { %p2751_p5 = pnand %p2750_p6, %p2749_p2  ;;  %p2756_p3 = por %p2755_p13, %p2754_p12 }
  0x56   : > { %p2752_p11 = pneg %p2751_p5  ;;  %p2758_p9 = por %p2757_p8, %p2756_p3 }
  0x58   : > { %p2759_p10 = pnand %p2758_p9, %p2752_p11 }
  0x5a   : > { %2762 = shalt.err (!%p2759_p10)
}
  0x5b   : > { %s2763_s30 = scalar_lea.vmem %s3088_s0, 128  ;;  %s2860_s11 = smov [#allocation7]  }
  0x5c   : > { %p2764_p1 = scmp.ne.s32.totalorder %s3088_s0, %s2763_s30  ;;  %s2768_s22 = sshll.u32 %s2860_s11, 4  ;;  %s2769_s22 = int_to_ptr.vmem [resolvable:$false] %s2768_s22 }
  0x5d   : > { %s2770_s25 = scalar_lea.vmem %s2769_s22, 256  ;;  %p2771_p2 = scmp.lt.s32.totalorder %s3088_s0, %s2769_s22 }
  0x5e   : > { %p2766_p4 = pnand %p2764_p1, %p2750_p6  ;;  %p2772_p5 = scmp.lt.s32.totalorder %s2770_s25, %s2763_s30 }
  0x60   : > { %p2767_p0 = pneg %p2766_p4  ;;  %p2773_p12 = por %p2772_p5, %p2771_p2 }
  0x62   : > { %p2774_p13 = pnand %p2773_p12, %p2767_p0 }
  0x64   : > { %2777 = shalt.err (!%p2774_p13)
}
  0x65   : > { %s4346_s5 = smov 4   ;;  %s4347_s7 = smov 64  }
  0x66   : > { %2444 = dma.hbm_to_vmem [thread:$0]  (!%p4345_p7), %s3086_s23, 128, %s3088_s0, %s3090_s6, %s4347_s7, %s4347_s7, %s4346_s5  }
  0x67   : > { %p4348_p6 = scmp.ne.s32.totalorder %s4339_s29, 0 }
  0x69   : > { %212 = sbr.rel (%p4348_p6) target bundleno = 1785 (0x6f9), region = 36 }
  0x70   : > { %p4349_p11 = scmp.eq.s32.totalorder %s2975_s19, 0 }
  0x72   : > { %2823 = dma.done.wait (%p4349_p11), [#allocation3], 256   ;;  %p4350_p3 = pmov %p4349_p11 }
  0x74   : > { %2825 = vsyncadd (%p4350_p3), [#allocation3], 4294967040  ;;  %p4351_p8 = pmov %p4350_p3 }
  0x75   : > { %p4352_p9 = pmov %p4350_p3 }
  0x76   : > { %2827 = dma.done.wait (%p4351_p8), [#allocation6], 128  }
  0x77   : > { %2829 = vsyncadd (%p4352_p9), [#allocation6], 4294967168  ;;  %s222_s10 = sand.u32 1, %s2975_s19   ;;  %s3133_s0 = sand.u32 1, %s2844_s16  }
  0x78   : > { %s2301_s29 = sshll.u32 %s3133_s0, 3  ;;  %s223_s23 = scalar_lea.sflag [#allocation3], %s222_s10 }
  0x79   : > { %s226_s6 = scalar_lea.vmem [#allocation7], %s2301_s29  ;;  %p4353_p7 = scmp.ne.s32.totalorder %s4336_s26, 0 }
  0x7b   : > { %2831 = dma.done.wait (%p4353_p7), %s223_s23, 128  }
  0x7c   : > { %2833 = vsyncadd (%p4353_p7), %s223_s23, 4294967168  ;;  %p254_p10 = scmp.lt.s32.totalorder %s2975_s19, 3  ;;  %v4283_v0 = vmov 0   ;;  %v2663_v1 = vld [vmem:[%s226_s6] sm:$0xff]   ;;  %vm291_vm0 = vcmask 130048   ;;  %v2665_v3 = vld [vmem:[#allocation2 + $0x8] sm:$0xff]  }
  0x7d   : > { %2560 = vset.pattern.permute.xlu1 %v4283_v0  ;;  %v2664_v2 = vld [vmem:[#allocation2] sm:$0xff]   ;;  %2336 = vmatprep.subr.bf16.mxu0 %v2663_v1  ;;  %s2862_s26 = smov 125   ;;  %s2863_s14 = smov 124   ;;  %v4281_v5 = vmov 0.0   ;;  %v2882_v12 = vmov 2   ;;  %v2883_v13 = vmov 3  }
  0x7e   : > { %s255_s13 = scalar_select %p254_p10, %s2975_s19, 3  ;;  %2337 = vmatpush3.bf16.msra.mxu0 %v2663_v1  ;;  %2338 = vmatprep.mubr.msk.bf16.mxu0 %vm291_vm0, %v2664_v2  ;;  %v2884_v14 = vmov 1   ;;  %v2885_v16 = vmov 4   ;;  %v2886_v18 = vmov 5   ;;  %v2887_v20 = vmov 6  }
  0x7f   : > { %s2864_s20 = smov 122   ;;  %s2865_s30 = smov 120   ;;  %2348 = vmatprep.subr.bf16.mxu0 %v4281_v5  ;;  %2342 = vmatprep.subr.bf16.mxu1 %v4281_v5  ;;  %v2888_v21 = vmov 7   ;;  %v2889_v23 = vmov 8   ;;  %v2891_v25 = vmov 9   ;;  %v2893_v27 = vmov 10  }
  0x80   : > { %s256_s12 = scalar_lea.vmem %s4272_s3, %s255_s13  ;;  %s2866_s11 = smov 118   ;;  %v2895_v29 = vmov 11   ;;  %v2897_v31 = vmov 12   ;;  %vm2925_vm9 = vmmov 0   ;;  %vm2170_vm11 = vcmask 257024  }
  0x81   : > { %v3147_v4 = vld [vmem:[%s256_s12] sm:$0x1]  ;;  %2339 = vmatmul.mubr.msk.bf16.vlgmr.msra.gmra.mrb[0].mxu0 %vm291_vm0, %v2665_v3  ;;  %s2867_s22 = smov 116   ;;  %s2868_s25 = smov 114  }
  0x82   : > { %593 = vrot.lane.b32.xlu1 %v3147_v4, %s2862_s26  ;;  %2354 = vpush %v3147_v4  ;;  %s2869_s5 = smov 112   ;;  %s2870_s7 = smov 110  }
  0x83   : > { %s2871_s10 = smov 106   ;;  %s2872_s29 = smov 105  }
  0x84   : > { %s2873_s23 = smov 104   ;;  %s2874_s6 = smov 103  }
  0x85   : > { %s2875_s13 = smov 102   ;;  %s2876_s8 = smov 101  }
  0x86   : > { %641 = vrot.lane.b32.xlu1 %v3147_v4, %s2863_s14  ;;  %s2877_s9 = smov 100   ;;  %s2878_s12 = smov 99  }
  0x87   : > { %s2879_s26 = smov 98   ;;  %s2880_s14 = smov 97  }
  0x88   : > { %p4441_p4 = scmp.ne.s32.totalorder %s4337_s27, 0 }
  0x8a   : > { %737 = vrot.lane.b32.xlu1 %v3147_v4, %s2864_s20  ;;  %s2890_s20 = smov 127  }
  0x8e   : > { %833 = vrot.lane.b32.xlu1 %v3147_v4, %s2865_s30  ;;  %s2892_s30 = smov 126  }
  0x92   : > { %929 = vrot.lane.b32.xlu1 %v3147_v4, %s2866_s11  ;;  %s2894_s11 = smov 123  }
  0x96   : > { %1025 = vrot.lane.b32.xlu1 %v3147_v4, %s2867_s22  ;;  %s2896_s22 = smov 121  }
  0x9a   : > { %1121 = vrot.lane.b32.xlu1 %v3147_v4, %s2868_s25  ;;  %s2898_s25 = smov 119  }
  0x9e   : > { %1217 = vrot.lane.b32.xlu1 %v3147_v4, %s2869_s5  ;;  %s2899_s5 = smov 117  }
  0xa2   : > { %1313 = vrot.lane.b32.xlu1 %v3147_v4, %s2870_s7  ;;  %s2900_s7 = smov 115  }
  0xa6   : > { %1505 = vrot.lane.b32.xlu1 %v3147_v4, %s2871_s10  ;;  %s2901_s10 = smov 113  }
  0xaa   : > { %1553 = vrot.lane.b32.xlu1 %v3147_v4, %s2872_s29  ;;  %s2902_s29 = smov 111  }
  0xae   : > { %1601 = vrot.lane.b32.xlu1 %v3147_v4, %s2873_s23  ;;  %s2903_s23 = smov 109  }
  0xb2   : > { %1649 = vrot.lane.b32.xlu1 %v3147_v4, %s2874_s6  ;;  %s2904_s6 = smov 108  }
  0xb6   : > { %1697 = vrot.lane.b32.xlu1 %v3147_v4, %s2875_s13  ;;  %s2905_s13 = smov 107  }
  0xba   : > { %1745 = vrot.lane.b32.xlu1 %v3147_v4, %s2876_s8  ;;  %s2355_s8 = spop %2354 }
  0xbb   : > { %v3489_v5 = vstv %s2355_s8 }
  0xbe   : > { %1793 = vrot.lane.b32.xlu1 %v3147_v4, %s2877_s9 }
  0xc2   : > { %1841 = vrot.lane.b32.xlu1 %v3147_v4, %s2878_s12 }
  0xc6   : > { %1889 = vrot.lane.b32.xlu1 %v3147_v4, %s2879_s26 }
  0xca   : > { %1937 = vrot.lane.b32.xlu1 %v3147_v4, %s2880_s14 }
  0xf4   : > { %v3197_v15 = vpop.permute.xlu1 %593 }
  0xf8   : > { %v3201_v17 = vpop.permute.xlu1 %641 }
  0xfc   : > { %v3205_v19 = vpop.permute.xlu1 %737 }
 0x100   : > { %v3210_v22 = vpop.permute.xlu1 %833 }
 0x104   : > { %v3216_v24 = vpop.permute.xlu1 %929 }
 0x108   : > { %v3221_v26 = vpop.permute.xlu1 %1025 }
 0x10c   : > { %v3227_v28 = vpop.permute.xlu1 %1121 }
 0x110   : > { %v3232_v30 = vpop.permute.xlu1 %1217 }
 0x114   : > { %v3238_v32 = vpop.permute.xlu1 %1313 }
 0x118   : > { %v3244_v33 = vpop.permute.xlu1 %1505 }
 0x11c   : > { %v3251_v34 = vpop.permute.xlu1 %1553 }
 0x120   : > { %v3256_v35 = vpop.permute.xlu1 %1601 }
 0x124   : > { %v3262_v36 = vpop.permute.xlu1 %1649 }
 0x128   : > { %v3268_v37 = vpop.permute.xlu1 %1697 }
 0x12c   : > { %v3275_v38 = vpop.permute.xlu1 %1745 }
 0x130   : > { %v3282_v39 = vpop.permute.xlu1 %1793 }
 0x134   : > { %v3288_v40 = vpop.permute.xlu1 %1841 }
 0x138   : > { %v3294_v41 = vpop.permute.xlu1 %1889 }
 0x13c   : > { %v3301_v42 = vpop.permute.xlu1 %1937 }
 0x154   : > { %v3172_v6 = vpop.f32.mrb[0].mxu0 }
 0x155   : > { %379 = vxpose.xlu0.b32.start [1/2] (short) (narrow) %v3172_v6, 32  ;;  %423 = vperm.xlu1 %2560, %v3172_v6   ;;  %v3176_v7 = vpop.f32.mrb[1].mxu0 }
 0x156   : > { %v3178_v8 = vpop.f32.mrb[2].mxu0 }
 0x157   : > { %v3180_v9 = vpop.f32.mrb[3].mxu0  ;;  %v2041_v10 = vpack.c.bf16 %v3178_v8, %v3172_v6 }
 0x158   : > { %v2040_v11 = vpack.c.bf16 %v3180_v9, %v3176_v7 }
 0x159   : > { %2561 = vset.pattern.permute.xlu1 %v2882_v12  ;;  %380 = vxpose.xlu0.b32.end [2/2] (short) (narrow) %v3178_v8, 32 }
 0x15a   : > { %2349 = vmatpush3.bf16.msra.mxu0 %v2041_v10  ;;  %518 = vperm.xlu1 %2561, %v3172_v6  }
 0x15b   : > { %2343 = vmatpush3.bf16.msra.mxu1 %v2040_v11  ;;  %v2906_v11 = vmov 13  }
 0x15e   : > { %2562 = vset.pattern.permute.xlu1 %v2883_v13 }
 0x15f   : > { %566 = vperm.xlu1 %2562, %v3172_v6  }
 0x163   : > { %2563 = vset.pattern.permute.xlu1 %v4283_v0 }
 0x164   : > { %413 = vperm.xlu1 %2563, %v3176_v7  }
 0x168   : > { %2564 = vset.pattern.permute.xlu1 %v2884_v14 }
 0x169   : > { %462 = vperm.xlu1 %2564, %v3176_v7  }
 0x16d   : > { %2565 = vset.pattern.permute.xlu1 %v2882_v12 }
 0x16e   : > { %510 = vperm.xlu1 %2565, %v3176_v7  }
 0x172   : > { %2566 = vset.pattern.permute.xlu1 %v2885_v16 }
 0x173   : > { %606 = vperm.xlu1 %2566, %v3176_v7  }
 0x177   : > { %2567 = vset.pattern.permute.xlu1 %v2886_v18 }
 0x178   : > { %654 = vperm.xlu1 %2567, %v3176_v7  }
 0x17c   : > { %2568 = vset.pattern.permute.xlu1 %v2887_v20 }
 0x17d   : > { %702 = vperm.xlu1 %2568, %v3176_v7  }
 0x181   : > { %2569 = vset.pattern.permute.xlu1 %v2888_v21 }
 0x182   : > { %750 = vperm.xlu1 %2569, %v3176_v7   ;;  %2592 = vset.pattern.permute.xlu0 %v4283_v0 }
 0x186   : > { %2570 = vset.pattern.permute.xlu1 %v2889_v23 }
 0x187   : > { %798 = vperm.xlu1 %2570, %v3176_v7  }
 0x18a   : > { %497 = vrot.lane.b32.xlu0 %v3147_v4, %s2890_s20 }
 0x18b   : > { %2571 = vset.pattern.permute.xlu1 %v2891_v25 }
 0x18c   : > { %846 = vperm.xlu1 %2571, %v3176_v7  }
 0x18e   : > { %545 = vrot.lane.b32.xlu0 %v3147_v4, %s2892_s30 }
 0x190   : > { %2572 = vset.pattern.permute.xlu1 %v2893_v27 }
 0x191   : > { %894 = vperm.xlu1 %2572, %v3176_v7  }
 0x192   : > { %689 = vrot.lane.b32.xlu0 %v3147_v4, %s2894_s11 }
 0x195   : > { %2573 = vset.pattern.permute.xlu1 %v2895_v29 }
 0x196   : > { %942 = vperm.xlu1 %2573, %v3176_v7   ;;  %785 = vrot.lane.b32.xlu0 %v3147_v4, %s2896_s22 }
 0x19a   : > { %2574 = vset.pattern.permute.xlu1 %v2897_v31  ;;  %881 = vrot.lane.b32.xlu0 %v3147_v4, %s2898_s25 }
 0x19b   : > { %990 = vperm.xlu1 %2574, %v3176_v7  }
 0x19e   : > { %977 = vrot.lane.b32.xlu0 %v3147_v4, %s2899_s5 }
 0x19f   : > { %2575 = vset.pattern.permute.xlu1 %v4283_v0  ;;  %v4291_v0 = vmov 22  }
 0x1a0   : > { %428 = vperm.xlu1 %2575, %v3178_v8  }
 0x1a2   : > { %1073 = vrot.lane.b32.xlu0 %v3147_v4, %s2900_s7 }
 0x1a4   : > { %2576 = vset.pattern.permute.xlu1 %v2883_v13 }
 0x1a5   : > { %570 = vperm.xlu1 %2576, %v3178_v8  }
 0x1a6   : > { %1169 = vrot.lane.b32.xlu0 %v3147_v4, %s2901_s10 }
 0x1a9   : > { %2577 = vset.pattern.permute.xlu1 %v2885_v16 }
 0x1aa   : > { %1265 = vrot.lane.b32.xlu0 %v3147_v4, %s2902_s29  ;;  %618 = vperm.xlu1 %2577, %v3178_v8  }
 0x1ae   : > { %1361 = vrot.lane.b32.xlu0 %v3147_v4, %s2903_s23  ;;  %2578 = vset.pattern.permute.xlu1 %v2886_v18 }
 0x1af   : > { %666 = vperm.xlu1 %2578, %v3178_v8  }
 0x1b2   : > { %418 = vperm.xlu0 %2592, %v3180_v9  }
 0x1b3   : > { %2579 = vset.pattern.permute.xlu1 %v2887_v20 }
 0x1b4   : > { %714 = vperm.xlu1 %2579, %v3178_v8  }
 0x1b6   : > { %1409 = vrot.lane.b32.xlu0 %v3147_v4, %s2904_s6 }
 0x1b7   : > { %2593 = vset.pattern.permute.xlu0 %v2884_v14 }
 0x1b8   : > { %2580 = vset.pattern.permute.xlu1 %v2888_v21 }
 0x1b9   : > { %762 = vperm.xlu1 %2580, %v3178_v8  }
 0x1ba   : > { %470 = vperm.xlu0 %2593, %v3172_v6  }
 0x1bd   : > { %2581 = vset.pattern.permute.xlu1 %v2889_v23 }
 0x1be   : > { %810 = vperm.xlu1 %2581, %v3178_v8   ;;  %1457 = vrot.lane.b32.xlu0 %v3147_v4, %s2905_s13 }
 0x1c2   : > { %2582 = vset.pattern.permute.xlu1 %v2891_v25  ;;  %474 = vperm.xlu0 %2593, %v3178_v8  }
 0x1c3   : > { %858 = vperm.xlu1 %2582, %v3178_v8  }
 0x1c6   : > { %2594 = vset.pattern.permute.xlu0 %v2883_v13 }
 0x1c7   : > { %2583 = vset.pattern.permute.xlu1 %v2893_v27  ;;  %558 = vperm.xlu0 %2594, %v3176_v7  }
 0x1c8   : > { %906 = vperm.xlu1 %2583, %v3178_v8  }
 0x1cb   : > { %2595 = vset.pattern.permute.xlu0 %v2882_v12 }
 0x1cc   : > { %2584 = vset.pattern.permute.xlu1 %v2895_v29  ;;  %522 = vperm.xlu0 %2595, %v3178_v8  }
 0x1cd   : > { %954 = vperm.xlu1 %2584, %v3178_v8  }
 0x1d0   : > { %2596 = vset.pattern.permute.xlu0 %v2885_v16 }
 0x1d1   : > { %2585 = vset.pattern.permute.xlu1 %v2884_v14  ;;  %610 = vperm.xlu0 %2596, %v3180_v9  }
 0x1d2   : > { %466 = vperm.xlu1 %2585, %v3180_v9  }
 0x1d4   : > { %v3306_v43 = vpop.permute.xlu1 %423 }
 0x1d5   : > { %614 = vperm.xlu0 %2596, %v3172_v6   ;;  %v3312_v45 = vpop.trf.xlu0 }
 0x1d6   : > { %2586 = vset.pattern.permute.xlu1 %v2882_v12 }
 0x1d7   : > { %514 = vperm.xlu1 %2586, %v3180_v9  }
 0x1d9   : > { %2597 = vset.pattern.permute.xlu0 %v2886_v18  ;;  %v3310_v44 = vpop.permute.xlu1 %518  ;;  %v3315_v46 = vpop.trf.xlu0 }
 0x1da   : > { %658 = vperm.xlu0 %2597, %v3180_v9   ;;  %4354 = vst [vmem:[#allocation13_spill] sm:$0xff] %v3315_v46 }
 0x1db   : > { %2587 = vset.pattern.permute.xlu1 %v2883_v13  ;;  %v2907_v13 = vmov 14  }
 0x1dc   : > { %562 = vperm.xlu1 %2587, %v3180_v9  }
 0x1dd   : > { %v3322_v48 = vpop.trf.xlu0 }
 0x1de   : > { %662 = vperm.xlu0 %2597, %v3172_v6   ;;  %v3317_v47 = vpop.permute.xlu1 %566  ;;  %4355 = vst [vmem:[#allocation14_spill] sm:$0xff] %v3322_v48 }
 0x1e1   : > { %v3328_v50 = vpop.trf.xlu0 }
 0x1e2   : > { %2598 = vset.pattern.permute.xlu0 %v2887_v20  ;;  %4356 = vst [vmem:[#allocation15_spill] sm:$0xff] %v3328_v50 }
 0x1e3   : > { %706 = vperm.xlu0 %2598, %v3180_v9   ;;  %v3324_v49 = vpop.permute.xlu1 %413 }
 0x1e7   : > { %710 = vperm.xlu0 %2598, %v3172_v6  }
 0x1e8   : > { %v3330_v51 = vpop.permute.xlu1 %462 }
 0x1eb   : > { %2599 = vset.pattern.permute.xlu0 %v2888_v21 }
 0x1ec   : > { %754 = vperm.xlu0 %2599, %v3180_v9  }
 0x1ed   : > { %v3333_v53 = vpop.permute.xlu1 %510 }
 0x1f0   : > { %758 = vperm.xlu0 %2599, %v3172_v6  }
 0x1f2   : > { %v3339_v55 = vpop.permute.xlu1 %606 }
 0x1f4   : > { %2600 = vset.pattern.permute.xlu0 %v2889_v23  ;;  %v4293_v23 = vmov 18  }
 0x1f5   : > { %802 = vperm.xlu0 %2600, %v3180_v9  }
 0x1f7   : > { %v3346_v58 = vpop.permute.xlu1 %654 }
 0x1f9   : > { %806 = vperm.xlu0 %2600, %v3172_v6  }
 0x1fc   : > { %v498_v52 = vpop.permute.xlu0 %497  ;;  %v3352_v60 = vpop.permute.xlu1 %702 }
 0x1fd   : > { %2601 = vset.pattern.permute.xlu0 %v2891_v25  ;;  %2356 = vpush %v498_v52  ;;  %4357 = vst [vmem:[#allocation16_spill] sm:$0xff] %v3352_v60  ;;  %v431_v25 = vlaneseq }
 0x1fe   : > { %850 = vperm.xlu0 %2601, %v3180_v9  }
 0x200   : > { %v546_v54 = vpop.permute.xlu0 %545 }
 0x201   : > { %2358 = vpush %v546_v54  ;;  %v3358_v63 = vpop.permute.xlu1 %750 }
 0x202   : > { %2360 = vpush %v3197_v15  ;;  %854 = vperm.xlu0 %2601, %v3172_v6   ;;  %4358 = vst [vmem:[#allocation17_spill] sm:$0xff] %v3358_v63  ;;  %v4370_v63 = vmov 18  }
 0x203   : > { %2362 = vpush %v3201_v17  ;;  %v2908_v17 = vmov 15  }
 0x204   : > { %v690_v56 = vpop.permute.xlu0 %689 }
 0x205   : > { %2364 = vpush %v690_v56  ;;  %347 = vxpose.xlu1.b32.start [1/2] (short) (narrow) %v3176_v7, 32 }
 0x206   : > { %2366 = vpush %v3205_v19  ;;  %2602 = vset.pattern.permute.xlu0 %v2893_v27  ;;  %v3364_v2 = vpop.permute.xlu1 %798 }
 0x207   : > { %898 = vperm.xlu0 %2602, %v3180_v9   ;;  %4359 = vst [vmem:[#allocation18_spill] sm:$0xff] %v3364_v2 }
 0x208   : > { %v786_v57 = vpop.permute.xlu0 %785 }
 0x209   : > { %2368 = vpush %v786_v57  ;;  %348 = vxpose.xlu1.b32.end [2/2] (short) (narrow) %v3180_v9, 32 }
 0x20a   : > { %2370 = vpush %v3210_v22 }
 0x20b   : > { %902 = vperm.xlu0 %2602, %v3172_v6   ;;  %v3368_v10 = vpop.permute.xlu1 %846 }
 0x20c   : > { %v882_v59 = vpop.permute.xlu0 %881  ;;  %4360 = vst [vmem:[#allocation19_spill] sm:$0xff] %v3368_v10 }
 0x20d   : > { %2372 = vpush %v882_v59 }
 0x20e   : > { %2374 = vpush %v3216_v24 }
 0x20f   : > { %2603 = vset.pattern.permute.xlu0 %v2895_v29  ;;  %v3413_v29 = vshrl.u32 %v431_v25, 7 }
 0x210   : > { %v978_v61 = vpop.permute.xlu0 %977  ;;  %946 = vperm.xlu0 %2603, %v3180_v9   ;;  %v3372_v12 = vpop.permute.xlu1 %894 }
 0x211   : > { %2376 = vpush %v978_v61  ;;  %4361 = vst [vmem:[#allocation20_spill] sm:$0xff] %v3372_v12  ;;  %v3454_v52 = vsub.s32 3, %v3413_v29  ;;  %v3462_v57 = vsub.s32 4, %v3413_v29  ;;  %v4300_v12 = vmov 23  }
 0x212   : > { %2378 = vpush %v3221_v26 }
 0x213   : > { %4364 = vst [vmem:[#allocation23_spill] sm:$0xff] %v3462_v57 }
 0x214   : > { %v1074_v62 = vpop.permute.xlu0 %1073  ;;  %950 = vperm.xlu0 %2603, %v3172_v6  }
 0x215   : > { %2380 = vpush %v1074_v62  ;;  %v3375_v14 = vpop.permute.xlu1 %942  ;;  %v4285_v62 = vmov 21  }
 0x216   : > { %2382 = vpush %v3227_v28  ;;  %4362 = vst [vmem:[#allocation21_spill] sm:$0xff] %v3375_v14  ;;  %v4297_v28 = vmov 16  }
 0x218   : > { %v1170_v1 = vpop.permute.xlu0 %1169  ;;  %2604 = vset.pattern.permute.xlu0 %v2897_v31 }
 0x219   : > { %2384 = vpush %v1170_v1  ;;  %994 = vperm.xlu0 %2604, %v3180_v9   ;;  %v3470_v1 = vrot.slane %v3312_v45, %v3454_v52 }
 0x21a   : > { %2386 = vpush %v3232_v30  ;;  %v3381_v16 = vpop.permute.xlu1 %990  ;;  %v3419_v30 = vsub.s32 1, %v3413_v29 }
 0x21b   : > { %4363 = vst [vmem:[#allocation22_spill] sm:$0xff] %v3381_v16 }
 0x21c   : > { %v1266_v3 = vpop.permute.xlu0 %1265 }
 0x21d   : > { %2388 = vpush %v1266_v3  ;;  %998 = vperm.xlu0 %2604, %v3172_v6   ;;  %v3473_v3 = vsub.s32 5, %v3413_v29 }
 0x21e   : > { %2390 = vpush %v3238_v32  ;;  %v3424_v32 = vsub.s32 0, %v3413_v29 }
 0x21f   : > { %v3387_v19 = vpop.permute.xlu1 %428 }
 0x220   : > { %v1362_v4 = vpop.permute.xlu0 %1361 }
 0x221   : > { %2605 = vset.pattern.permute.xlu0 %v2906_v11  ;;  %2392 = vpush %v1362_v4 }
 0x222   : > { %1042 = vperm.xlu0 %2605, %v3180_v9  }
 0x224   : > { %v3392_v22 = vpop.permute.xlu1 %570 }
 0x226   : > { %1050 = vperm.xlu0 %2605, %v3178_v8  }
 0x227   : > { %2588 = vset.pattern.permute.xlu1 %v2906_v11 }
 0x229   : > { %v3405_v26 = vpop.permute.xlu1 %618 }
 0x22a   : > { %2606 = vset.pattern.permute.xlu0 %v2907_v13 }
 0x22b   : > { %1086 = vperm.xlu0 %2606, %v3176_v7  }
 0x22e   : > { %s2357_s9 = spop %2356 }
 0x22f   : > { %1094 = vperm.xlu0 %2606, %v3172_v6   ;;  %1038 = vperm.xlu1 %2588, %v3176_v7  }
 0x231   : > { %v3379_v15 = vpop.permute.xlu0 %418 }
 0x232   : > { %s2359_s12 = spop %2358 }
 0x233   : > { %2607 = vset.pattern.permute.xlu0 %v2908_v17  ;;  %2589 = vset.pattern.permute.xlu1 %v2897_v31  ;;  %v4289_v31 = vmov 19   ;;  %s2361_s26 = spop %2360 }
 0x234   : > { %1134 = vperm.xlu0 %2607, %v3176_v7   ;;  %1002 = vperm.xlu1 %2589, %v3178_v8   ;;  %s2363_s14 = spop %2362  ;;  %v3518_v14 = vstv %s2361_s26 }
 0x235   : > { %v1410_v18 = vpop.permute.xlu0 %1409 }
 0x236   : > { %2394 = vpush %v1410_v18  ;;  %v4295_v18 = vmov 17   ;;  %s2365_s20 = spop %2364 }
 0x237   : > { %s2367_s30 = spop %2366 }
 0x238   : > { %1138 = vperm.xlu0 %2607, %v3180_v9   ;;  %2590 = vset.pattern.permute.xlu1 %v2906_v11  ;;  %v3480_v11 = vrot.slane %v3312_v45, %v3462_v57  ;;  %v3542_v2 = vstv %s2367_s30 }
 0x239   : > { %v471_v20 = vpop.permute.xlu0 %470  ;;  %1046 = vperm.xlu1 %2590, %v3172_v6  }
 0x23a   : > { %s2369_s11 = spop %2368 }
 0x23b   : > { %s2371_s22 = spop %2370 }
 0x23c   : > { %1142 = vperm.xlu0 %2607, %v3172_v6  }
 0x23d   : > { %v1458_v21 = vpop.permute.xlu0 %1457  ;;  %2591 = vset.pattern.permute.xlu1 %v2907_v13 }
 0x23e   : > { %2396 = vpush %v1458_v21  ;;  %1090 = vperm.xlu1 %2591, %v3180_v9   ;;  %s2373_s25 = spop %2372 }
 0x23f   : > { %2398 = vpush %v3244_v33  ;;  %v3426_v33 = vpop.permute.xlu1 %666  ;;  %s2375_s5 = spop %2374 }
 0x240   : > { %2400 = vpush %v3251_v34  ;;  %2614 = vset.pattern.permute.xlu0 %v4293_v23  ;;  %v3508_v23 = vsub.s32 6, %v3413_v29 }
 0x241   : > { %2402 = vpush %v3256_v35  ;;  %1278 = vperm.xlu0 %2614, %v3176_v7   ;;  %v3399_v24 = vpop.permute.xlu0 %474  ;;  %v3433_v35 = vrot.slane %v3312_v45, %v3419_v30 }
 0x242   : > { %2404 = vpush %v3262_v36  ;;  %1098 = vperm.xlu1 %2591, %v3178_v8   ;;  %v4287_v36 = vmov 20   ;;  %s2377_s7 = spop %2376 }
 0x243   : > { %2406 = vpush %v3268_v37  ;;  %v3438_v37 = vrot.slane %v3312_v45, %v3424_v32  ;;  %s2379_s10 = spop %2378 }
 0x244   : > { %2408 = vpush %v3275_v38 }
 0x245   : > { %2410 = vpush %v3282_v39  ;;  %1286 = vperm.xlu0 %2614, %v3172_v6   ;;  %v3445_v39 = vsub.s32 2, %v3413_v29 }
 0x246   : > { %2412 = vpush %v3288_v40  ;;  %v3410_v27 = vpop.permute.xlu0 %558  ;;  %2608 = vset.pattern.permute.xlu1 %v4297_v28  ;;  %v3447_v40 = vpop.permute.xlu1 %714  ;;  %s2381_s29 = spop %2380 }
 0x247   : > { %2414 = vpush %v3294_v41  ;;  %1182 = vperm.xlu1 %2608, %v3176_v7   ;;  %v487_v41 = vadd.f32 %v3433_v35, %v471_v20  ;;  %v3459_v56 = vrot.slane %v3312_v45, %v3445_v39  ;;  %v3485_v20 = vstv %s2357_s9  ;;  %s2383_s23 = spop %2382 }
 0x248   : > { %2416 = vpush %v3301_v42  ;;  %v441_v42 = vadd.f32 %v3438_v37, %v3306_v43 }
 0x249   : > { %2618 = vset.pattern.permute.xlu0 %v4289_v31  ;;  %v491_v59 = vmul.f32 0.2, %v487_v41  ;;  %v535_v4 = vadd.f32 %v3459_v56, %v3310_v44  ;;  %v3493_v44 = vrot.slane %v3312_v45, %v3473_v3 }
 0x24a   : > { %1330 = vperm.xlu0 %2618, %v3180_v9   ;;  %v445_v61 = vmul.f32 0.2, %v441_v42  ;;  %v3465_v43 = vpop.permute.xlu1 %762  ;;  %s2385_s6 = spop %2384 }
 0x24b   : > { %v3428_v34 = vpop.permute.xlu0 %522  ;;  %1186 = vperm.xlu1 %2608, %v3180_v9   ;;  %v495_v13 = vmax.f32 %v487_v41, %v491_v59  ;;  %v539_v41 = vmul.f32 0.2, %v535_v4  ;;  %v583_v59 = vadd.f32 %v3470_v1, %v3317_v47  ;;  %s2387_s13 = spop %2386 }
 0x24c   : > { %v449_v21 = vmax.f32 %v441_v42, %v445_v61 }
 0x24d   : > { %v543_v47 = vmax.f32 %v535_v4, %v539_v41 }
 0x24e   : > { %2621 = vset.pattern.permute.xlu0 %v4287_v36  ;;  %v3499_v36 = vpop.permute.xlu1 %810  ;;  %v455_v61 = vmul.f32 %v3489_v5, %v449_v21  ;;  %s2389_s8 = spop %2388 }
 0x24f   : > { %1374 = vperm.xlu0 %2621, %v3176_v7   ;;  %2609 = vset.pattern.permute.xlu1 %v2908_v17  ;;  %s2391_s9 = spop %2390 }
 0x250   : > { %v3441_v38 = vpop.permute.xlu0 %610  ;;  %1146 = vperm.xlu1 %2609, %v3178_v8  }
 0x252   : > { %v3515_v21 = vpop.permute.xlu1 %858 }
 0x253   : > { %1382 = vperm.xlu0 %2621, %v3172_v6   ;;  %4366 = vst [vmem:[#allocation24_spill] sm:$0xff] %v3515_v21 }
 0x254   : > { %v615_v54 = vpop.permute.xlu0 %614  ;;  %2610 = vset.pattern.permute.xlu1 %v4297_v28 }
 0x255   : > { %1190 = vperm.xlu1 %2610, %v3172_v6   ;;  %v631_v25 = vadd.f32 %v3480_v11, %v615_v54 }
 0x257   : > { %2625 = vset.pattern.permute.xlu0 %v4285_v62  ;;  %v503_v62 = vmul.f32 %v3485_v20, %v495_v13  ;;  %v635_v31 = vmul.f32 0.2, %v631_v25 }
 0x258   : > { %1426 = vperm.xlu0 %2625, %v3180_v9  }
 0x259   : > { %v3482_v17 = vpop.permute.xlu0 %658  ;;  %2611 = vset.pattern.permute.xlu1 %v4295_v18  ;;  %v587_v18 = vmul.f32 0.2, %v583_v59  ;;  %v507_v13 = vadd.f32 %v503_v62, %v455_v61  ;;  %v639_v16 = vmax.f32 %v631_v25, %v635_v31  ;;  %v724_v62 = vrot.slane %v3312_v45, %v3508_v23 }
 0x25a   : > { %1230 = vperm.xlu1 %2611, %v3176_v7  }
 0x25b   : > { %v591_v4 = vmax.f32 %v583_v59, %v587_v18  ;;  %v4367_v18 = vmov 17   ;;  %v3529_v59 = vstv %s2365_s20 }
 0x25c   : > { %2628 = vset.pattern.permute.xlu0 %v4291_v0  ;;  %v3505_v0 = vstv %s2359_s12  ;;  %s2393_s12 = spop %2392 }
 0x25d   : > { %1470 = vperm.xlu0 %2628, %v3176_v7   ;;  %v663_v42 = vpop.permute.xlu0 %662  ;;  %v551_v48 = vmul.f32 %v3505_v0, %v543_v47  ;;  %v599_v31 = vmul.f32 %v3518_v14, %v591_v4  ;;  %v4304_v4 = vmov 24  }
 0x25e   : > { %v679_v54 = vadd.f32 %v3493_v44, %v663_v42  ;;  %1234 = vperm.xlu1 %2611, %v3180_v9   ;;  %v4365_v42 = vmov 16  }
 0x25f   : > { %v555_v41 = vadd.f32 %v551_v48, %v507_v13  ;;  %v3532_v48 = vpop.permute.xlu1 %906 }
 0x260   : > { %v683_v28 = vmul.f32 0.2, %v679_v54  ;;  %4368 = vst [vmem:[#allocation25_spill] sm:$0xff] %v3532_v48 }
 0x261   : > { %1478 = vperm.xlu0 %2628, %v3172_v6  }
 0x262   : > { %v3511_v50 = vpop.permute.xlu0 %706  ;;  %2612 = vset.pattern.permute.xlu1 %v4365_v42  ;;  %v687_v61 = vmax.f32 %v679_v54, %v683_v28  ;;  %v3523_v42 = vstv %s2363_s14  ;;  %v603_v28 = vadd.f32 %v599_v31, %v555_v41 }
 0x263   : > { %1194 = vperm.xlu1 %2612, %v3178_v8   ;;  %v647_v25 = vmul.f32 %v3523_v42, %v639_v16  ;;  %v3549_v31 = vpop.permute.xlu1 %954 }
 0x264   : > { %v695_v54 = vmul.f32 %v3529_v59, %v687_v61  ;;  %4371 = vst [vmem:[#allocation27_spill] sm:$0xff] %v3549_v31  ;;  %v728_v31 = vadd.f32 %v724_v62, %v3447_v40 }
 0x265   : > { %2632 = vset.pattern.permute.xlu0 %v4300_v12  ;;  %v3536_v12 = vsub.s32 7, %v3413_v29  ;;  %v651_v16 = vadd.f32 %v647_v25, %v603_v28 }
 0x266   : > { %1522 = vperm.xlu0 %2632, %v3180_v9   ;;  %v711_v47 = vpop.permute.xlu0 %710 }
 0x267   : > { %v727_v10 = vadd.f32 %v724_v62, %v711_v47  ;;  %2613 = vset.pattern.permute.xlu1 %v4367_v18  ;;  %v699_v41 = vadd.f32 %v695_v54, %v651_v16  ;;  %v772_v29 = vrot.slane %v3312_v45, %v3536_v12  ;;  %v4302_v54 = vmov 25   ;;  %s2395_s26 = spop %2394 }
 0x268   : > { %1238 = vperm.xlu1 %2613, %v3172_v6   ;;  %v732_v62 = vmul.f32 0.2, %v728_v31 }
 0x269   : > { %v731_v13 = vmul.f32 0.2, %v727_v10 }
 0x26a   : > { %2635 = vset.pattern.permute.xlu0 %v4304_v4 }
 0x26b   : > { %v735_v47 = vmax.f32 %v727_v10, %v731_v13  ;;  %1566 = vperm.xlu0 %2635, %v3176_v7   ;;  %v3540_v21 = vpop.permute.xlu0 %754 }
 0x26c   : > { %4369 = vst [vmem:[#allocation26_spill] sm:$0xff] %v3540_v21  ;;  %2615 = vset.pattern.permute.xlu1 %v4370_v63 }
 0x26d   : > { %v743_v61 = vmul.f32 %v3542_v2, %v735_v47  ;;  %1282 = vperm.xlu1 %2615, %v3180_v9   ;;  %v3558_v47 = vstv %s2369_s11 }
 0x26e   : > { %4373 = vst [vmem:[#allocation29_spill] sm:$0xff] %v3558_v47 }
 0x26f   : > { %v747_v25 = vadd.f32 %v743_v61, %v699_v41  ;;  %1574 = vperm.xlu0 %2635, %v3172_v6   ;;  %v759_v10 = vpop.permute.xlu0 %758  ;;  %v3560_v41 = vpop.permute.xlu1 %466  ;;  %v442_v61 = vadd.f32 %v3438_v37, %v3387_v19  ;;  %v584_v37 = vadd.f32 %v3470_v1, %v3392_v22  ;;  %s2397_s14 = spop %2396 }
 0x270   : > { %v775_v28 = vadd.f32 %v772_v29, %v759_v10  ;;  %v4374_v10 = vmov 19   ;;  %s2399_s20 = spop %2398 }
 0x271   : > { %2616 = vset.pattern.permute.xlu1 %v4367_v18  ;;  %v446_v19 = vmul.f32 0.2, %v442_v61  ;;  %v588_v1 = vmul.f32 0.2, %v584_v37  ;;  %s2401_s30 = spop %2400 }
 0x272   : > { %v779_v13 = vmul.f32 0.2, %v775_v28  ;;  %1242 = vperm.xlu1 %2616, %v3178_v8   ;;  %s2403_s11 = spop %2402 }
 0x273   : > { %2639 = vset.pattern.permute.xlu0 %v4302_v54  ;;  %v3568_v54 = vrot.slane %v3315_v46, %v3424_v32  ;;  %v592_v60 = vmax.f32 %v584_v37, %v588_v1 }
 0x274   : > { %v783_v16 = vmax.f32 %v775_v28, %v779_v13  ;;  %1618 = vperm.xlu0 %2639, %v3180_v9   ;;  %v3556_v45 = vpop.permute.xlu0 %802  ;;  %v4306_v13 = vmov 26  }
 0x275   : > { %4372 = vst [vmem:[#allocation28_spill] sm:$0xff] %v3556_v45 }
 0x276   : > { %v791_v18 = vmul.f32 %v3558_v47, %v783_v16  ;;  %2617 = vset.pattern.permute.xlu1 %v4374_v10  ;;  %v632_v16 = vadd.f32 %v3480_v11, %v3405_v26  ;;  %v450_v26 = vmax.f32 %v442_v61, %v446_v19  ;;  %v3590_v11 = vstv %s2371_s22  ;;  %s2405_s22 = spop %2404 }
 0x277   : > { %1326 = vperm.xlu1 %2617, %v3176_v7   ;;  %4376 = vst [vmem:[#allocation31_spill] sm:$0xff] %v3590_v11  ;;  %v736_v61 = vmax.f32 %v728_v31, %v732_v62  ;;  %v3607_v19 = vadd.f32 %v772_v29, %v3465_v43  ;;  %v3616_v43 = vrot.slane %v3315_v46, %v3462_v57 }
 0x278   : > { %v795_v28 = vadd.f32 %v791_v18, %v747_v25  ;;  %2642 = vset.pattern.permute.xlu0 %v4306_v13  ;;  %v807_v4 = vpop.permute.xlu0 %806  ;;  %v680_v25 = vadd.f32 %v3493_v44, %v3426_v33  ;;  %v488_v18 = vadd.f32 %v3433_v35, %v3399_v24  ;;  %v3583_v13 = vpop.permute.xlu1 %514  ;;  %v636_v33 = vmul.f32 0.2, %v632_v16 }
 0x279   : > { %v823_v48 = vadd.f32 %v3568_v54, %v807_v4  ;;  %1662 = vperm.xlu0 %2642, %v3176_v7   ;;  %v456_v45 = vmul.f32 %v3489_v5, %v450_v26  ;;  %4379 = vst [vmem:[#allocation34_spill] sm:$0xff] %v3616_v43  ;;  %v3619_v29 = vmul.f32 %v3518_v14, %v592_v60 }
 0x27a   : > { %v684_v44 = vmul.f32 0.2, %v680_v25  ;;  %v492_v24 = vmul.f32 0.2, %v488_v18  ;;  %v640_v21 = vmax.f32 %v632_v16, %v636_v33  ;;  %v3628_v16 = vmul.f32 %v3542_v2, %v736_v61 }
 0x27b   : > { %v827_v40 = vmul.f32 0.2, %v823_v48  ;;  %2619 = vset.pattern.permute.xlu1 %v4370_v63  ;;  %v3595_v63 = vrot.slane %v3315_v46, %v3419_v30 }
 0x27c   : > { %1290 = vperm.xlu1 %2619, %v3178_v8   ;;  %v563_v47 = vpop.permute.xlu1 %562  ;;  %v688_v31 = vmax.f32 %v680_v25, %v684_v44  ;;  %v496_v62 = vmax.f32 %v488_v18, %v492_v24  ;;  %4381 = vst [vmem:[#allocation36_spill] sm:$0xff] %v3628_v16  ;;  %v3631_v25 = vmul.f32 0.2, %v3607_v19  ;;  %v3635_v18 = vadd.f32 %v3459_v56, %v3428_v34 }
 0x27d   : > { %v831_v4 = vmax.f32 %v823_v48, %v827_v40  ;;  %1670 = vperm.xlu0 %2642, %v3172_v6   ;;  %v3588_v22 = vpop.permute.xlu0 %850  ;;  %4377 = vst [vmem:[#allocation32_spill] sm:$0xff] %v3595_v63  ;;  %v3599_v48 = vrot.slane %v3315_v46, %v3445_v39  ;;  %v3603_v40 = vrot.slane %v3315_v46, %v3454_v52  ;;  %v4313_v44 = vmov 28  }
 0x27e   : > { %4375 = vst [vmem:[#allocation30_spill] sm:$0xff] %v3588_v22  ;;  %v3625_v37 = vmul.f32 %v3529_v59, %v688_v31  ;;  %v3651_v56 = vadd.f32 %v3568_v54, %v3499_v36  ;;  %v3653_v24 = vstv %s2373_s25  ;;  %v540_v54 = vmul.f32 0.2, %v3635_v18  ;;  %s2407_s25 = spop %2406 }
 0x27f   : > { %v839_v35 = vmul.f32 %v3590_v11, %v831_v4  ;;  %4378 = vst [vmem:[#allocation33_spill] sm:$0xff] %v3603_v40  ;;  %v4315_v11 = vmov 27   ;;  %4384 = vst [vmem:[#allocation38_spill] sm:$0xff] %v3653_v24 }
 0x280   : > { %2620 = vset.pattern.permute.xlu1 %v4374_v10  ;;  %4380 = vst [vmem:[#allocation35_spill] sm:$0xff] %v3625_v37 }
 0x281   : > { %v843_v4 = vadd.f32 %v839_v35, %v795_v28  ;;  %2646 = vset.pattern.permute.xlu0 %v4315_v11  ;;  %v855_v22 = vpop.permute.xlu0 %854  ;;  %1334 = vperm.xlu1 %2620, %v3172_v6   ;;  %v3622_v28 = vmul.f32 %v3523_v42, %v640_v21 }
 0x282   : > { %v871_v40 = vadd.f32 %v3595_v63, %v855_v22  ;;  %1714 = vperm.xlu0 %2646, %v3180_v9   ;;  %v4382_v22 = vmov 20  }
 0x284   : > { %v875_v35 = vmul.f32 0.2, %v871_v40 }
 0x285   : > { %2622 = vset.pattern.permute.xlu1 %v4382_v22  ;;  %v3638_v60 = vpop.trf.xlu1 }
 0x286   : > { %v879_v21 = vmax.f32 %v871_v40, %v875_v35  ;;  %v434_v26 = vrot.slane %v3638_v60, %v3424_v32  ;;  %v480_v1 = vrot.slane %v3638_v60, %v3419_v30  ;;  %v528_v33 = vrot.slane %v3638_v60, %v3445_v39  ;;  %2649 = vset.pattern.permute.xlu0 %v4313_v44  ;;  %v3647_v34 = vpop.permute.xlu0 %898 }
 0x287   : > { %4383 = vst [vmem:[#allocation37_spill] sm:$0xff] %v3647_v34  ;;  %v504_v40 = vmul.f32 %v3485_v20, %v496_v62  ;;  %v576_v61 = vrot.slane %v3638_v60, %v3454_v52  ;;  %1378 = vperm.xlu1 %2622, %v3180_v9   ;;  %1758 = vperm.xlu0 %2649, %v3176_v7  }
 0x288   : > { %v887_v31 = vmul.f32 %v3653_v24, %v879_v21  ;;  %v439_v35 = vadd.f32 %v434_v26, %v3324_v49  ;;  %v440_v44 = vadd.f32 %v434_v26, %v3379_v15  ;;  %v485_v36 = vadd.f32 %v480_v1, %v3330_v51 }
 0x289   : > { %v486_v11 = vadd.f32 %v480_v1, %v3560_v41  ;;  %v533_v62 = vadd.f32 %v528_v33, %v3333_v53  ;;  %v534_v46 = vadd.f32 %v528_v33, %v3583_v13  ;;  %v3671_v15 = vadd.f32 %v576_v61, %v3410_v27 }
 0x28a   : > { %v3668_v43 = vadd.f32 %v887_v31, %v843_v4  ;;  %v443_v16 = vmul.f32 0.2, %v439_v35  ;;  %v444_v37 = vmul.f32 0.2, %v440_v44  ;;  %v489_v21 = vmul.f32 0.2, %v485_v36  ;;  %v903_v24 = vpop.permute.xlu0 %902 }
 0x28b   : > { %v490_v49 = vmul.f32 0.2, %v486_v11  ;;  %v538_v63 = vmul.f32 0.2, %v534_v46  ;;  %v624_v51 = vrot.slane %v3638_v60, %v3462_v57  ;;  %2623 = vset.pattern.permute.xlu1 %v4374_v10  ;;  %1766 = vperm.xlu0 %2649, %v3172_v6   ;;  %v582_v4 = vadd.f32 %v576_v61, %v563_v47 }
 0x28c   : > { %v447_v53 = vmax.f32 %v439_v35, %v443_v16  ;;  %v448_v41 = vmax.f32 %v440_v44, %v444_v37  ;;  %v493_v13 = vmax.f32 %v485_v36, %v489_v21  ;;  %1338 = vperm.xlu1 %2623, %v3178_v8   ;;  %v3678_v26 = vstv %s2375_s5  ;;  %s2409_s5 = spop %2408 }
 0x28d   : > { %v508_v1 = vadd.f32 %v504_v40, %v456_v45  ;;  %v494_v33 = vmax.f32 %v486_v11, %v490_v49  ;;  %v537_v31 = vmul.f32 0.2, %v533_v62  ;;  %v544_v27 = vmax.f32 %v3635_v18, %v540_v54 }
 0x28e   : > { %v453_v34 = vmul.f32 %v3489_v5, %v447_v53  ;;  %v672_v10 = vrot.slane %v3638_v60, %v3473_v3  ;;  %v919_v57 = vadd.f32 %v3599_v48, %v903_v24  ;;  %v501_v37 = vmul.f32 %v3485_v20, %v493_v13 }
 0x28f   : > { %v2922_v16 = vmov 29   ;;  %v3687_v47 = vpop.permute.xlu0 %946  ;;  %v454_v45 = vmul.f32 %v3489_v5, %v448_v41  ;;  %v502_v11 = vmul.f32 %v3485_v20, %v494_v33  ;;  %v542_v44 = vmax.f32 %v534_v46, %v538_v63 }
 0x290   : > { %2653 = vset.pattern.permute.xlu0 %v2922_v16  ;;  %v585_v18 = vmul.f32 0.2, %v3671_v15  ;;  %v3693_v40 = vadd.f32 %v624_v51, %v3339_v55  ;;  %v923_v61 = vmul.f32 0.2, %v919_v57  ;;  %v586_v35 = vmul.f32 0.2, %v582_v4 }
 0x291   : > { %v4385_v24 = vmov 21   ;;  %1810 = vperm.xlu0 %2653, %v3180_v9   ;;  %v541_v36 = vmax.f32 %v533_v62, %v537_v31  ;;  %v506_v54 = vadd.f32 %v502_v11, %v454_v45  ;;  %v550_v21 = vmul.f32 %v3505_v0, %v542_v44 }
 0x292   : > { %2624 = vset.pattern.permute.xlu1 %v4385_v24  ;;  %v630_v5 = vadd.f32 %v624_v51, %v3441_v38  ;;  %v552_v46 = vmul.f32 %v3505_v0, %v544_v27  ;;  %v3702_v20 = vadd.f32 %v672_v10, %v3346_v58  ;;  %v927_v55 = vmax.f32 %v919_v57, %v923_v61  ;;  %v3712_v58 = vpop.trf.xlu1 }
 0x293   : > { %1422 = vperm.xlu1 %2624, %v3176_v7   ;;  %v590_v63 = vmax.f32 %v582_v4, %v586_v35  ;;  %v505_v49 = vadd.f32 %v501_v37, %v453_v34  ;;  %v554_v53 = vadd.f32 %v550_v21, %v506_v54  ;;  %v678_v13 = vadd.f32 %v672_v10, %v3482_v17  ;;  %v3705_v62 = vpop.permute.xlu0 %950  ;;  %v4386_v35 = vld [vmem:[#allocation26_spill] sm:$0xff] }
 0x294   : > { %v634_v41 = vmul.f32 0.2, %v630_v5  ;;  %v589_v33 = vmax.f32 %v3671_v15, %v585_v18  ;;  %v633_v38 = vmul.f32 0.2, %v3693_v40  ;;  %v935_v51 = vmul.f32 %v3678_v26, %v927_v55 }
 0x295   : > { %v598_v31 = vmul.f32 %v3518_v14, %v590_v63  ;;  %v4327_v27 = vmov 30   ;;  %v549_v57 = vmul.f32 %v3505_v0, %v541_v36  ;;  %v682_v4 = vmul.f32 0.2, %v678_v13 }
 0x296   : > { %2656 = vset.pattern.permute.xlu0 %v4327_v27  ;;  %v638_v34 = vmax.f32 %v630_v5, %v634_v41  ;;  %v720_v17 = vrot.slane %v3638_v60, %v3508_v23  ;;  %v784_v15 = vmax.f32 %v3607_v19, %v3631_v25  ;;  %v3722_v10 = vadd.f32 %v935_v51, %v3668_v43 }
 0x297   : > { %2626 = vset.pattern.permute.xlu1 %v4382_v22  ;;  %1854 = vperm.xlu0 %2656, %v3176_v7   ;;  %v602_v37 = vadd.f32 %v598_v31, %v554_v53  ;;  %v768_v45 = vrot.slane %v3638_v60, %v3536_v12  ;;  %v556_v0 = vadd.f32 %v552_v46, %v508_v1  ;;  %v681_v22 = vmul.f32 0.2, %v3702_v20  ;;  %v4388_v53 = vld [vmem:[#allocation28_spill] sm:$0xff] }
 0x298   : > { %1386 = vperm.xlu1 %2626, %v3178_v8   ;;  %v553_v11 = vadd.f32 %v549_v57, %v505_v49  ;;  %v646_v44 = vmul.f32 %v3523_v42, %v638_v34  ;;  %v686_v18 = vmax.f32 %v678_v13, %v682_v4  ;;  %v726_v61 = vadd.f32 %v720_v17, %v3511_v50  ;;  %v3733_v25 = vpop.permute.xlu0 %994  ;;  %v4387_v50 = vld [vmem:[#allocation16_spill] sm:$0xff]  ;;  %v4389_v57 = vld [vmem:[#allocation17_spill] sm:$0xff]  ;;  %v4390_v4 = vld [vmem:[#allocation30_spill] sm:$0xff] }
 0x299   : > { %v774_v19 = vadd.f32 %v768_v45, %v4386_v35  ;;  %v816_v43 = vrot.slane %v3712_v58, %v3424_v32  ;;  %v3736_v60 = vmul.f32 0.2, %v3651_v56  ;;  %v597_v1 = vmul.f32 %v3518_v14, %v589_v33 }
 0x29a   : > { %v637_v36 = vmax.f32 %v3693_v40, %v633_v38  ;;  %v650_v54 = vadd.f32 %v646_v44, %v602_v37  ;;  %v694_v21 = vmul.f32 %v3529_v59, %v686_v18  ;;  %v3743_v5 = vadd.f32 %v720_v17, %v4387_v50 }
 0x29b   : > { %1862 = vperm.xlu0 %2656, %v3172_v6   ;;  %v730_v46 = vmul.f32 0.2, %v726_v61  ;;  %v778_v55 = vmul.f32 0.2, %v774_v19  ;;  %v604_v63 = vadd.f32 %v3619_v29, %v556_v0  ;;  %v601_v49 = vadd.f32 %v597_v1, %v553_v11  ;;  %v4391_v0 = vld [vmem:[#allocation29_spill] sm:$0xff] }
 0x29c   : > { %2627 = vset.pattern.permute.xlu1 %v4385_v24  ;;  %v822_v41 = vadd.f32 %v816_v43, %v4388_v53  ;;  %v864_v14 = vrot.slane %v3712_v58, %v3419_v30  ;;  %v685_v40 = vmax.f32 %v3702_v20, %v681_v22  ;;  %v698_v13 = vadd.f32 %v694_v21, %v650_v54  ;;  %v999_v51 = vpop.permute.xlu0 %998  ;;  %v4393_v21 = vld [vmem:[#allocation18_spill] sm:$0xff] }
 0x29d   : > { %1430 = vperm.xlu1 %2627, %v3172_v6   ;;  %v734_v33 = vmax.f32 %v726_v61, %v730_v46  ;;  %v782_v38 = vmax.f32 %v774_v19, %v778_v55  ;;  %v645_v31 = vmul.f32 %v3523_v42, %v637_v36  ;;  %v3754_v34 = vadd.f32 %v768_v45, %v4389_v57  ;;  %v4398_v57 = vld [vmem:[#allocation35_spill] sm:$0xff] }
 0x29e   : > { %v826_v29 = vmul.f32 0.2, %v822_v41  ;;  %v870_v17 = vadd.f32 %v864_v14, %v4390_v4  ;;  %v4325_v37 = vmov 31   ;;  %v3759_v11 = vmul.f32 %v4391_v0, %v784_v15 }
 0x29f   : > { %2660 = vset.pattern.permute.xlu0 %v4325_v37  ;;  %v832_v20 = vmax.f32 %v3651_v56, %v3736_v60  ;;  %v729_v44 = vmul.f32 0.2, %v3743_v5  ;;  %v742_v18 = vmul.f32 %v3542_v2, %v734_v33  ;;  %v652_v42 = vadd.f32 %v3622_v28, %v604_v63  ;;  %v4396_v33 = vld [vmem:[#allocation24_spill] sm:$0xff] }
 0x2a0   : > { %1906 = vperm.xlu0 %2660, %v3180_v9   ;;  %v649_v45 = vadd.f32 %v645_v31, %v601_v49  ;;  %v830_v22 = vmax.f32 %v822_v41, %v826_v29  ;;  %v874_v61 = vmul.f32 0.2, %v870_v17  ;;  %v4392_v35 = vmov 22   ;;  %v4394_v49 = vld [vmem:[#allocation31_spill] sm:$0xff]  ;;  %v4395_v41 = vld [vmem:[#allocation37_spill] sm:$0xff] }
 0x2a1   : > { %2629 = vset.pattern.permute.xlu1 %v4392_v35  ;;  %v693_v19 = vmul.f32 %v3529_v59, %v685_v40  ;;  %v746_v15 = vadd.f32 %v742_v18, %v698_v13  ;;  %v790_v1 = vmul.f32 %v4391_v0, %v782_v38  ;;  %v912_v36 = vrot.slane %v3712_v58, %v3445_v39  ;;  %v1043_v55 = vpop.permute.xlu0 %1042  ;;  %v3785_v13 = vpop.trf.xlu1  ;;  %v4397_v38 = vld [vmem:[#allocation32_spill] sm:$0xff] }
 0x2a2   : > { %1474 = vperm.xlu1 %2629, %v3180_v9   ;;  %v777_v54 = vmul.f32 0.2, %v3754_v34  ;;  %v3775_v50 = vadd.f32 %v816_v43, %v4393_v21  ;;  %v878_v28 = vmax.f32 %v870_v17, %v874_v61  ;;  %v3779_v46 = vrot.slane %v3712_v58, %v3454_v52 }
 0x2a3   : > { %v733_v59 = vmax.f32 %v3743_v5, %v729_v44  ;;  %v794_v63 = vadd.f32 %v790_v1, %v746_v15  ;;  %v838_v53 = vmul.f32 %v4394_v49, %v830_v22  ;;  %v918_v40 = vadd.f32 %v912_v36, %v4395_v41  ;;  %v4399_v44 = vld [vmem:[#allocation38_spill] sm:$0xff]  ;;  %v4400_v1 = vld [vmem:[#allocation33_spill] sm:$0xff]  ;;  %v4401_v41 = vld [vmem:[#allocation23_spill] sm:$0xff] }
 0x2a4   : > { %1914 = vperm.xlu0 %2660, %v3178_v8   ;;  %v3787_v43 = vstv %s2377_s7  ;;  %v3791_v31 = vadd.f32 %v4397_v38, %v4396_v33  ;;  %v700_v29 = vadd.f32 %v4398_v57, %v652_v42  ;;  %v966_v5 = vadd.f32 %v3779_v46, %v3687_v47  ;;  %v4403_v38 = vld [vmem:[#allocation36_spill] sm:$0xff]  ;;  %s2411_s7 = spop %2410 }
 0x2a5   : > { %v697_v4 = vadd.f32 %v693_v19, %v649_v45  ;;  %v842_v17 = vadd.f32 %v838_v53, %v794_v63  ;;  %v886_v18 = vmul.f32 %v4399_v44, %v878_v28  ;;  %v922_v22 = vmul.f32 0.2, %v918_v40  ;;  %v4402_v63 = vld [vmem:[#allocation19_spill] sm:$0xff]  ;;  %v3818_v27 = vpop.trf.xlu1 }
 0x2a6   : > { %2630 = vset.pattern.permute.xlu1 %v4385_v24  ;;  %v781_v61 = vmax.f32 %v3754_v34, %v777_v54  ;;  %v970_v15 = vmul.f32 0.2, %v966_v5  ;;  %v967_v21 = vadd.f32 %v4400_v1, %v3705_v62  ;;  %v3803_v42 = vrot.slane %v3712_v58, %v4401_v41  ;;  %v3808_v24 = vpop.permute.xlu0 %1050 }
 0x2a7   : > { %1434 = vperm.xlu1 %2630, %v3178_v8   ;;  %v741_v47 = vmul.f32 %v3542_v2, %v733_v59  ;;  %v825_v45 = vmul.f32 0.2, %v3775_v50  ;;  %v890_v19 = vadd.f32 %v886_v18, %v842_v17  ;;  %v926_v28 = vmax.f32 %v918_v40, %v922_v22  ;;  %v4404_v2 = vld [vmem:[#allocation34_spill] sm:$0xff] }
 0x2a8   : > { %v869_v34 = vadd.f32 %v864_v14, %v4402_v63  ;;  %v974_v54 = vmax.f32 %v966_v5, %v970_v15  ;;  %v971_v53 = vmul.f32 0.2, %v967_v21  ;;  %v1014_v62 = vadd.f32 %v3803_v42, %v3733_v25 }
 0x2a9   : > { %v3813_v33 = vstv %s2379_s10  ;;  %v748_v57 = vadd.f32 %v4403_v38, %v700_v29  ;;  %v934_v37 = vmul.f32 %v3678_v26, %v926_v28  ;;  %v1015_v59 = vadd.f32 %v4404_v2, %v999_v51  ;;  %s2413_s10 = spop %2412 }
 0x2aa   : > { %v745_v40 = vadd.f32 %v741_v47, %v697_v4  ;;  %v789_v17 = vmul.f32 %v4391_v0, %v781_v61  ;;  %v975_v18 = vmax.f32 %v967_v21, %v971_v53  ;;  %v1018_v14 = vmul.f32 0.2, %v1014_v62  ;;  %v4406_v0 = vld [vmem:[#allocation20_spill] sm:$0xff] }
 0x2ab   : > { %v4405_v5 = vmov 23   ;;  %v938_v22 = vadd.f32 %v934_v37, %v890_v19  ;;  %v982_v25 = vmul.f32 %v3787_v43, %v974_v54  ;;  %v1019_v15 = vmul.f32 0.2, %v1015_v59  ;;  %v3829_v19 = vpop.permute.xlu0 %1086 }
 0x2ac   : > { %2631 = vset.pattern.permute.xlu1 %v4405_v5  ;;  %v1056_v29 = vrot.slane %v3712_v58, %v3473_v3  ;;  %v829_v51 = vmax.f32 %v3775_v50, %v825_v45  ;;  %v873_v28 = vmul.f32 0.2, %v869_v34  ;;  %v983_v4 = vmul.f32 %v3787_v43, %v975_v18  ;;  %v4407_v45 = vld [vmem:[#allocation25_spill] sm:$0xff] }
 0x2ad   : > { %1518 = vperm.xlu1 %2631, %v3176_v7   ;;  %v1022_v47 = vmax.f32 %v1014_v62, %v1018_v14  ;;  %v917_v61 = vadd.f32 %v912_v36, %v4406_v0  ;;  %v986_v21 = vadd.f32 %v982_v25, %v938_v22  ;;  %v1023_v63 = vmax.f32 %v1015_v59, %v1019_v15 }
 0x2ae   : > { %v1062_v37 = vadd.f32 %v1056_v29, %v1043_v55  ;;  %v876_v54 = vmul.f32 0.2, %v3791_v31  ;;  %v3832_v53 = vstv %s2381_s29  ;;  %v987_v38 = vadd.f32 %v983_v4, %v3722_v10  ;;  %v1039_v55 = vpop.permute.xlu1 %1038  ;;  %v4408_v4 = vld [vmem:[#allocation21_spill] sm:$0xff]  ;;  %s2415_s29 = spop %2414 }
 0x2af   : > { %v1030_v50 = vmul.f32 %v3813_v33, %v1022_v47  ;;  %v920_v18 = vadd.f32 %v3599_v48, %v4407_v45  ;;  %v793_v62 = vadd.f32 %v789_v17, %v745_v40  ;;  %v1031_v14 = vmul.f32 %v3813_v33, %v1023_v63  ;;  %v4409_v17 = vld [vmem:[#allocation27_spill] sm:$0xff]  ;;  %v1095_v0 = vpop.permute.xlu0 %1094  ;;  %v4410_v63 = vld [vmem:[#allocation13_spill] sm:$0xff] }
 0x2b0   : > { %v1066_v36 = vmul.f32 0.2, %v1062_v37  ;;  %v796_v59 = vadd.f32 %v3759_v11, %v748_v57  ;;  %v837_v22 = vmul.f32 %v4394_v49, %v829_v51  ;;  %v877_v25 = vmax.f32 %v869_v34, %v873_v28 }
 0x2b1   : > { %2633 = vset.pattern.permute.xlu1 %v4392_v35  ;;  %v1034_v15 = vadd.f32 %v1030_v50, %v986_v21  ;;  %v921_v10 = vmul.f32 0.2, %v917_v61  ;;  %v965_v47 = vadd.f32 %v3779_v46, %v4408_v4  ;;  %v3845_v48 = vadd.f32 %v1031_v14, %v987_v38 }
 0x2b2   : > { %1482 = vperm.xlu1 %2633, %v3178_v8   ;;  %v1070_v40 = vmax.f32 %v1062_v37, %v1066_v36  ;;  %v840_v35 = vmul.f32 %v4394_v49, %v832_v20  ;;  %v880_v11 = vmax.f32 %v3791_v31, %v876_v54  ;;  %v924_v57 = vmul.f32 0.2, %v920_v18  ;;  %v4411_v49 = vld [vmem:[#allocation22_spill] sm:$0xff] }
 0x2b3   : > { %v968_v34 = vadd.f32 %v4400_v1, %v4409_v17  ;;  %v841_v51 = vadd.f32 %v837_v22, %v793_v62  ;;  %v885_v46 = vmul.f32 %v4399_v44, %v877_v25  ;;  %v3858_v37 = vrot.slane %v4410_v63, %v3508_v23  ;;  %v1003_v56 = vpop.permute.xlu1 %1002 }
 0x2b4   : > { %v1078_v28 = vmul.f32 %v3832_v53, %v1070_v40  ;;  %v844_v21 = vadd.f32 %v840_v35, %v796_v59  ;;  %v925_v60 = vmax.f32 %v917_v61, %v921_v10  ;;  %v969_v20 = vmul.f32 0.2, %v965_v47 }
 0x2b5   : > { %v1013_v31 = vadd.f32 %v3803_v42, %v4411_v49  ;;  %v888_v54 = vmul.f32 %v4399_v44, %v880_v11  ;;  %v1111_v38 = vadd.f32 %v3858_v37, %v1095_v0  ;;  %v1061_v50 = vadd.f32 %v1056_v29, %v1039_v55 }
 0x2b6   : > { %2634 = vset.pattern.permute.xlu1 %v4405_v5  ;;  %v3863_v1 = vadd.f32 %v1078_v28, %v1034_v15  ;;  %v1016_v45 = vadd.f32 %v4404_v2, %v1003_v56  ;;  %v928_v62 = vmax.f32 %v920_v18, %v924_v57  ;;  %v972_v14 = vmul.f32 0.2, %v968_v34 }
 0x2b7   : > { %1526 = vperm.xlu1 %2634, %v3172_v6   ;;  %v889_v36 = vadd.f32 %v885_v46, %v841_v51  ;;  %v892_v59 = vadd.f32 %v888_v54, %v844_v21  ;;  %v1060_v61 = vrot.slane %v4410_v63, %v3473_v3  ;;  %v1104_v42 = vrot.slane %v3712_v58, %v3508_v23 }
 0x2b8   : > { %v933_v22 = vmul.f32 %v3678_v26, %v925_v60  ;;  %v973_v25 = vmax.f32 %v965_v47, %v969_v20  ;;  %v1017_v15 = vmul.f32 0.2, %v1013_v31  ;;  %v1020_v44 = vmul.f32 0.2, %v1016_v45  ;;  %v1047_v29 = vpop.permute.xlu1 %1046  ;;  %v1135_v47 = vpop.permute.xlu0 %1134 }
 0x2b9   : > { %v4412_v10 = vmov 24   ;;  %v1115_v55 = vmul.f32 0.2, %v1111_v38  ;;  %v1065_v2 = vmul.f32 0.2, %v1061_v50  ;;  %v1152_v18 = vrot.slane %v3712_v58, %v3536_v12 }
 0x2ba   : > { %v1063_v4 = vadd.f32 %v1060_v61, %v1047_v29  ;;  %v936_v40 = vmul.f32 %v3678_v26, %v928_v62  ;;  %v976_v35 = vmax.f32 %v968_v34, %v972_v14  ;;  %v937_v11 = vadd.f32 %v933_v22, %v889_v36 }
 0x2bb   : > { %2636 = vset.pattern.permute.xlu1 %v4412_v10  ;;  %v1064_v57 = vadd.f32 %v1060_v61, %v3808_v24  ;;  %v1109_v17 = vadd.f32 %v1104_v42, %v3829_v19  ;;  %v981_v0 = vmul.f32 %v3787_v43, %v973_v25  ;;  %v1021_v21 = vmax.f32 %v1013_v31, %v1017_v15 }
 0x2bc   : > { %1570 = vperm.xlu1 %2636, %v3180_v9   ;;  %v1067_v51 = vmul.f32 0.2, %v1063_v4  ;;  %v940_v28 = vadd.f32 %v936_v40, %v892_v59  ;;  %v1024_v46 = vmax.f32 %v1016_v45, %v1020_v44  ;;  %v1119_v58 = vmax.f32 %v1111_v38, %v1115_v55  ;;  %v1139_v45 = vpop.permute.xlu0 %1138 }
 0x2bd   : > { %v1069_v56 = vmax.f32 %v1061_v50, %v1065_v2  ;;  %v1157_v60 = vadd.f32 %v1152_v18, %v1135_v47  ;;  %v1091_v26 = vpop.permute.xlu1 %1090  ;;  %v984_v34 = vmul.f32 %v3787_v43, %v976_v35  ;;  %v985_v24 = vadd.f32 %v981_v0, %v937_v11 }
 0x2be   : > { %v1071_v20 = vmax.f32 %v1063_v4, %v1067_v51  ;;  %v1068_v49 = vmul.f32 0.2, %v1064_v57  ;;  %v1110_v19 = vadd.f32 %v1104_v42, %v1091_v26  ;;  %v1124_v54 = vstv %s2383_s23  ;;  %s2417_s23 = spop %2416 }
 0x2bf   : > { %v1113_v62 = vmul.f32 0.2, %v1109_v17  ;;  %v988_v31 = vadd.f32 %v984_v34, %v940_v28  ;;  %v1029_v38 = vmul.f32 %v3813_v33, %v1021_v21  ;;  %v1032_v50 = vmul.f32 %v3813_v33, %v1024_v46 }
 0x2c0   : > { %2637 = vset.pattern.permute.xlu1 %v4405_v5  ;;  %v1079_v14 = vmul.f32 %v3832_v53, %v1071_v20  ;;  %v1114_v36 = vmul.f32 0.2, %v1110_v19  ;;  %v1127_v5 = vmul.f32 %v1124_v54, %v1119_v58  ;;  %v1077_v59 = vmul.f32 %v3832_v53, %v1069_v56  ;;  %v1143_v46 = vpop.permute.xlu0 %1142 }
 0x2c1   : > { %1530 = vperm.xlu1 %2637, %v3178_v8   ;;  %v1161_v43 = vmul.f32 0.2, %v1157_v60  ;;  %v1099_v22 = vpop.permute.xlu1 %1098  ;;  %v1072_v25 = vmax.f32 %v1064_v57, %v1068_v49  ;;  %v1033_v42 = vadd.f32 %v1029_v38, %v985_v24  ;;  %v4413_v44 = vmov 25  }
 0x2c2   : > { %v1083_v61 = vadd.f32 %v1079_v14, %v3845_v48  ;;  %v1118_v15 = vmax.f32 %v1110_v19, %v1114_v36  ;;  %v1112_v29 = vadd.f32 %v3858_v37, %v1099_v22  ;;  %v1117_v55 = vmax.f32 %v1109_v17, %v1113_v62 }
 0x2c3   : > { %v1158_v2 = vadd.f32 %v1152_v18, %v1139_v45  ;;  %v1200_v33 = vrot.slane %v3785_v13, %v3424_v32  ;;  %v1036_v40 = vadd.f32 %v1032_v50, %v988_v31  ;;  %v1081_v11 = vadd.f32 %v1077_v59, %v1033_v42 }
 0x2c4   : > { %v3892_v4 = vadd.f32 %v1127_v5, %v1083_v61  ;;  %v1126_v35 = vmul.f32 %v1124_v54, %v1118_v15  ;;  %v1116_v48 = vmul.f32 0.2, %v1112_v29  ;;  %v1165_v57 = vmax.f32 %v1157_v60, %v1161_v43  ;;  %v4415_v15 = vld [vmem:[#allocation14_spill] sm:$0xff] }
 0x2c5   : > { %2638 = vset.pattern.permute.xlu1 %v4413_v44  ;;  %v1172_v47 = vstv %s2385_s6  ;;  %v1080_v51 = vmul.f32 %v3832_v53, %v1072_v25  ;;  %v1125_v28 = vmul.f32 %v1124_v54, %v1117_v55  ;;  %v1162_v0 = vmul.f32 0.2, %v1158_v2 }
 0x2c6   : > { %1614 = vperm.xlu1 %2638, %v3176_v7   ;;  %v1130_v37 = vadd.f32 %v1126_v35, %v3863_v1  ;;  %v1120_v17 = vmax.f32 %v1112_v29, %v1116_v48  ;;  %v1183_v18 = vpop.permute.xlu1 %1182  ;;  %v1173_v60 = vmul.f32 %v1172_v47, %v1165_v57  ;;  %v1156_v53 = vrot.slane %v4410_v63, %v3536_v12 }
 0x2c7   : > { %v1205_v21 = vadd.f32 %v1200_v33, %v1183_v18  ;;  %v1084_v58 = vadd.f32 %v1080_v51, %v1036_v40  ;;  %v1129_v20 = vadd.f32 %v1125_v28, %v1081_v11  ;;  %v1166_v24 = vmax.f32 %v1158_v2, %v1162_v0 }
 0x2c8   : > { %v1128_v56 = vmul.f32 %v1124_v54, %v1120_v17  ;;  %v1159_v49 = vadd.f32 %v1156_v53, %v1143_v46  ;;  %v4414_v61 = vmov 26   ;;  %v1204_v29 = vrot.slane %v4415_v15, %v3424_v32 }
 0x2c9   : > { %v1209_v26 = vmul.f32 0.2, %v1205_v21  ;;  %v1177_v14 = vadd.f32 %v1173_v60, %v1129_v20  ;;  %v1174_v38 = vmul.f32 %v1172_v47, %v1166_v24  ;;  %v1248_v57 = vrot.slane %v3785_v13, %v3419_v30 }
 0x2ca   : > { %2640 = vset.pattern.permute.xlu1 %v4412_v10  ;;  %v1132_v1 = vadd.f32 %v1128_v56, %v1084_v58  ;;  %v1187_v34 = vpop.permute.xlu1 %1186  ;;  %v1220_v10 = vstv %s2387_s13  ;;  %v1163_v50 = vmul.f32 0.2, %v1159_v49  ;;  %v4416_v0 = vmov 27  }
 0x2cb   : > { %1578 = vperm.xlu1 %2640, %v3178_v8   ;;  %v1213_v19 = vmax.f32 %v1205_v21, %v1209_v26  ;;  %v1206_v62 = vadd.f32 %v1200_v33, %v1187_v34  ;;  %v1178_v59 = vadd.f32 %v1174_v38, %v1130_v37  ;;  %v1268_v56 = vstv %s2389_s8 }
 0x2cc   : > { %v1167_v25 = vmax.f32 %v1159_v49, %v1163_v50  ;;  %v4417_v50 = vmov 28  }
 0x2cd   : > { %v1221_v54 = vmul.f32 %v1220_v10, %v1213_v19  ;;  %v1210_v31 = vmul.f32 0.2, %v1206_v62  ;;  %v1252_v19 = vrot.slane %v4415_v15, %v3419_v30 }
 0x2ce   : > { %v1175_v35 = vmul.f32 %v1172_v47, %v1167_v25 }
 0x2cf   : > { %2641 = vset.pattern.permute.xlu1 %v4413_v44  ;;  %v1225_v45 = vadd.f32 %v1221_v54, %v1177_v14  ;;  %v1214_v36 = vmax.f32 %v1206_v62, %v1210_v31  ;;  %v1147_v63 = vpop.permute.xlu1 %1146 }
 0x2d0   : > { %1622 = vperm.xlu1 %2641, %v3172_v6   ;;  %v1160_v5 = vadd.f32 %v1156_v53, %v1147_v63  ;;  %v1179_v18 = vadd.f32 %v1175_v35, %v3892_v4  ;;  %v1279_v63 = vpop.permute.xlu0 %1278 }
 0x2d1   : > { %v1222_v43 = vmul.f32 %v1220_v10, %v1214_v36 }
 0x2d2   : > { %v1164_v22 = vmul.f32 0.2, %v1160_v5 }
 0x2d3   : > { %v1226_v42 = vadd.f32 %v1222_v43, %v1178_v59 }
 0x2d4   : > { %2643 = vset.pattern.permute.xlu1 %v4414_v61  ;;  %v1168_v55 = vmax.f32 %v1160_v5, %v1164_v22  ;;  %v1191_v2 = vpop.permute.xlu1 %1190 }
 0x2d5   : > { %1666 = vperm.xlu1 %2643, %v3180_v9   ;;  %v1207_v33 = vadd.f32 %v1204_v29, %v1191_v2 }
 0x2d6   : > { %v1176_v40 = vmul.f32 %v1172_v47, %v1168_v55  ;;  %v1316_v55 = vstv %s2391_s9  ;;  %s2302_s9 = sshll.u32 %s3133_s0, 4 }
 0x2d7   : > { %v1211_v48 = vmul.f32 0.2, %v1207_v33 }
 0x2d8   : > { %v1180_v11 = vadd.f32 %v1176_v40, %v1132_v1 }
 0x2d9   : > { %2644 = vset.pattern.permute.xlu1 %v4413_v44  ;;  %v1215_v51 = vmax.f32 %v1207_v33, %v1211_v48  ;;  %v1231_v37 = vpop.permute.xlu1 %1230  ;;  %v1344_v48 = vrot.slane %v3785_v13, %v3454_v52 }
 0x2da   : > { %1626 = vperm.xlu1 %2644, %v3178_v8   ;;  %v1253_v17 = vadd.f32 %v1248_v57, %v1231_v37 }
 0x2db   : > { %v1223_v28 = vmul.f32 %v1220_v10, %v1215_v51 }
 0x2dc   : > { %v1257_v21 = vmul.f32 0.2, %v1253_v17 }
 0x2dd   : > { %v1227_v44 = vadd.f32 %v1223_v28, %v1179_v18  ;;  %v1235_v47 = vpop.permute.xlu1 %1234  ;;  %v1300_v18 = vrot.slane %v4415_v15, %v3445_v39 }
 0x2de   : > { %2645 = vset.pattern.permute.xlu1 %v4416_v0  ;;  %v1261_v46 = vmax.f32 %v1253_v17, %v1257_v21  ;;  %v1254_v58 = vadd.f32 %v1248_v57, %v1235_v47  ;;  %v1287_v57 = vpop.permute.xlu0 %1286 }
 0x2df   : > { %1710 = vperm.xlu1 %2645, %v3176_v7   ;;  %v1303_v21 = vadd.f32 %v1300_v18, %v1287_v57  ;;  %v1412_v57 = vstv %s2395_s26 }
 0x2e0   : > { %v1269_v20 = vmul.f32 %v1268_v56, %v1261_v46  ;;  %v1258_v60 = vmul.f32 0.2, %v1254_v58 }
 0x2e2   : > { %v1273_v53 = vadd.f32 %v1269_v20, %v1225_v45  ;;  %v1262_v4 = vmax.f32 %v1254_v58, %v1258_v60  ;;  %v1195_v26 = vpop.permute.xlu1 %1194  ;;  %v1296_v45 = vrot.slane %v3785_v13, %v3445_v39  ;;  %v1364_v60 = vstv %s2393_s12  ;;  %s253_s12 = scalar_lea.vmem [#allocation8], %s2302_s9 }
 0x2e3   : > { %2647 = vset.pattern.permute.xlu1 %v4414_v61  ;;  %v1208_v1 = vadd.f32 %v1204_v29, %v1195_v26  ;;  %s2189_s26 = sshll.u32 %s253_s12, 4  ;;  %s4224_s26 = int_to_ptr.vmem [resolvable:$true] %s2189_s26 }
 0x2e4   : > { %1674 = vperm.xlu1 %2647, %v3178_v8   ;;  %v1270_v34 = vmul.f32 %v1268_v56, %v1262_v4  ;;  %v1301_v22 = vadd.f32 %v1296_v45, %v1279_v63  ;;  %v1331_v4 = vpop.permute.xlu0 %1330  ;;  %v4418_v63 = vmov 30  }
 0x2e5   : > { %v1212_v24 = vmul.f32 0.2, %v1208_v1 }
 0x2e6   : > { %v1274_v49 = vadd.f32 %v1270_v34, %v1226_v42  ;;  %v1305_v33 = vmul.f32 0.2, %v1301_v22 }
 0x2e7   : > { %v1216_v62 = vmax.f32 %v1208_v1, %v1212_v24  ;;  %v1239_v14 = vpop.permute.xlu1 %1238  ;;  %v1307_v1 = vmul.f32 0.2, %v1303_v21 }
 0x2e8   : > { %2648 = vset.pattern.permute.xlu1 %v4416_v0  ;;  %v1255_v54 = vadd.f32 %v1252_v19, %v1239_v14  ;;  %v1309_v17 = vmax.f32 %v1301_v22, %v1305_v33 }
 0x2e9   : > { %1718 = vperm.xlu1 %2648, %v3172_v6   ;;  %v1224_v31 = vmul.f32 %v1220_v10, %v1216_v62  ;;  %v1348_v62 = vrot.slane %v4415_v15, %v3454_v52 }
 0x2ea   : > { %v1259_v38 = vmul.f32 0.2, %v1255_v54  ;;  %v1317_v46 = vmul.f32 %v1316_v55, %v1309_v17 }
 0x2eb   : > { %v1228_v36 = vadd.f32 %v1224_v31, %v1180_v11  ;;  %v1311_v31 = vmax.f32 %v1303_v21, %v1307_v1 }
 0x2ec   : > { %v1263_v5 = vmax.f32 %v1255_v54, %v1259_v38  ;;  %v1283_v59 = vpop.permute.xlu1 %1282  ;;  %v1321_v34 = vadd.f32 %v1317_v46, %v1273_v53 }
 0x2ed   : > { %2650 = vset.pattern.permute.xlu1 %v4417_v50  ;;  %v1302_v43 = vadd.f32 %v1296_v45, %v1283_v59  ;;  %v1392_v59 = vrot.slane %v3785_v13, %v4401_v41 }
 0x2ee   : > { %1762 = vperm.xlu1 %2650, %v3180_v9   ;;  %v1271_v61 = vmul.f32 %v1268_v56, %v1263_v5  ;;  %v1319_v5 = vmul.f32 %v1316_v55, %v1311_v31 }
 0x2ef   : > { %v1306_v25 = vmul.f32 0.2, %v1302_v43 }
 0x2f0   : > { %v1275_v10 = vadd.f32 %v1271_v61, %v1227_v44  ;;  %v1375_v61 = vpop.permute.xlu0 %1374 }
 0x2f1   : > { %v1310_v42 = vmax.f32 %v1302_v43, %v1306_v25  ;;  %v1243_v29 = vpop.permute.xlu1 %1242  ;;  %v1397_v33 = vadd.f32 %v1392_v59, %v1375_v61 }
 0x2f2   : > { %2651 = vset.pattern.permute.xlu1 %v4416_v0  ;;  %v1256_v2 = vadd.f32 %v1252_v19, %v1243_v29 }
 0x2f3   : > { %1722 = vperm.xlu1 %2651, %v3178_v8   ;;  %v1318_v40 = vmul.f32 %v1316_v55, %v1310_v42  ;;  %v1323_v42 = vadd.f32 %v1319_v5, %v1275_v10 }
 0x2f4   : > { %v1260_v35 = vmul.f32 0.2, %v1256_v2 }
 0x2f5   : > { %v1322_v11 = vadd.f32 %v1318_v40, %v1274_v49 }
 0x2f6   : > { %v1264_v51 = vmax.f32 %v1256_v2, %v1260_v35  ;;  %v1327_v37 = vpop.permute.xlu1 %1326 }
 0x2f7   : > { %2652 = vset.pattern.permute.xlu1 %v2922_v16  ;;  %v1349_v28 = vadd.f32 %v1344_v48, %v1327_v37  ;;  %v1401_v37 = vmul.f32 0.2, %v1397_v33 }
 0x2f8   : > { %1806 = vperm.xlu1 %2652, %v3176_v7   ;;  %v1272_v0 = vmul.f32 %v1268_v56, %v1264_v51  ;;  %v1350_v56 = vadd.f32 %v1344_v48, %v1331_v4 }
 0x2f9   : > { %v1353_v44 = vmul.f32 0.2, %v1349_v28  ;;  %v1405_v46 = vmax.f32 %v1397_v33, %v1401_v37 }
 0x2fa   : > { %v1276_v47 = vadd.f32 %v1272_v0, %v1228_v36  ;;  %v1354_v45 = vmul.f32 0.2, %v1350_v56  ;;  %v1440_v0 = vrot.slane %v3785_v13, %v3473_v3 }
 0x2fb   : > { %v1357_v58 = vmax.f32 %v1349_v28, %v1353_v44  ;;  %v1291_v20 = vpop.permute.xlu1 %1290  ;;  %v4419_v28 = vmov 31   ;;  %v1413_v1 = vmul.f32 %v1412_v57, %v1405_v46 }
 0x2fc   : > { %2654 = vset.pattern.permute.xlu1 %v4417_v50  ;;  %v1304_v26 = vadd.f32 %v1300_v18, %v1291_v20  ;;  %v1358_v25 = vmax.f32 %v1350_v56, %v1354_v45  ;;  %v1460_v56 = vstv %s2397_s14  ;;  %s2328_s14 = sshll.u32 %s2975_s19, 8  ;;  %s2176_s19 = scalar_lea.sflag [#allocation4], %s3133_s0 }
 0x2fd   : > { %1770 = vperm.xlu1 %2654, %v3178_v8   ;;  %v1365_v24 = vmul.f32 %v1364_v60, %v1357_v58  ;;  %v1396_v58 = vrot.slane %v4415_v15, %v4401_v41 }
 0x2fe   : > { %v1308_v49 = vmul.f32 0.2, %v1304_v26 }
 0x2ff   : > { %v1369_v19 = vadd.f32 %v1365_v24, %v1321_v34 }
 0x300   : > { %v1312_v14 = vmax.f32 %v1304_v26, %v1308_v49  ;;  %v1335_v54 = vpop.permute.xlu1 %1334 }
 0x301   : > { %2655 = vset.pattern.permute.xlu1 %v2922_v16  ;;  %v1351_v38 = vadd.f32 %v1348_v62, %v1335_v54  ;;  %v1417_v54 = vadd.f32 %v1413_v1, %v1369_v19  ;;  %v1488_v19 = vrot.slane %v3785_v13, %v3508_v23 }
 0x302   : > { %1814 = vperm.xlu1 %2655, %v3172_v6   ;;  %v1320_v50 = vmul.f32 %v1316_v55, %v1312_v14 }
 0x303   : > { %v1355_v36 = vmul.f32 0.2, %v1351_v38 }
 0x304   : > { %v1324_v53 = vadd.f32 %v1320_v50, %v1276_v47 }
 0x305   : > { %v1359_v43 = vmax.f32 %v1351_v38, %v1355_v36 }
 0x306   : > { %2657 = vset.pattern.permute.xlu1 %v4418_v63  ;;  %v1379_v22 = vpop.permute.xlu1 %1378 }
 0x307   : > { %1858 = vperm.xlu1 %2657, %v3180_v9   ;;  %v1367_v29 = vmul.f32 %v1364_v60, %v1359_v43  ;;  %v1398_v2 = vadd.f32 %v1392_v59, %v1379_v22  ;;  %v1366_v9 = vmul.f32 %v1364_v60, %v1358_v25 }
 0x309   : > { %v1371_v40 = vadd.f32 %v1367_v29, %v1323_v42  ;;  %v1402_v35 = vmul.f32 0.2, %v1398_v2  ;;  %v1370_v17 = vadd.f32 %v1366_v9, %v1322_v11 }
 0x30b   : > { %2658 = vset.pattern.permute.xlu1 %v2922_v16  ;;  %v1406_v55 = vmax.f32 %v1398_v2, %v1402_v35  ;;  %v1339_v48 = vpop.permute.xlu1 %1338  ;;  %v1383_v16 = vpop.permute.xlu0 %1382 }
 0x30c   : > { %1818 = vperm.xlu1 %2658, %v3178_v8   ;;  %v1352_v51 = vadd.f32 %v1348_v62, %v1339_v48  ;;  %v1399_v11 = vadd.f32 %v1396_v58, %v1383_v16 }
 0x30d   : > { %v1414_v18 = vmul.f32 %v1412_v57, %v1406_v55 }
 0x30e   : > { %v1356_v10 = vmul.f32 0.2, %v1352_v51  ;;  %v1403_v14 = vmul.f32 0.2, %v1399_v11 }
 0x30f   : > { %v1418_v21 = vadd.f32 %v1414_v18, %v1370_v17  ;;  %v1427_v34 = vpop.permute.xlu0 %1426  ;;  %v1508_v18 = vstv %s2399_s20 }
 0x310   : > { %2659 = vset.pattern.permute.xlu1 %v4419_v28  ;;  %v1360_v44 = vmax.f32 %v1352_v51, %v1356_v10 }
 0x311   : > { %1902 = vperm.xlu1 %2659, %v3176_v7  }
 0x312   : > { %v1423_v47 = vpop.permute.xlu1 %1422  ;;  %v1368_v4 = vmul.f32 %v1364_v60, %v1360_v44  ;;  %v1446_v60 = vadd.f32 %v1440_v0, %v1427_v34  ;;  %v3962_v44 = vrot.slane %v3785_v13, %v3536_v12 }
 0x313   : > { %v1445_v20 = vadd.f32 %v1440_v0, %v1423_v47  ;;  %v1471_v25 = vpop.permute.xlu0 %1470 }
 0x314   : > { %v1372_v7 = vadd.f32 %v1368_v4, %v1324_v53  ;;  %v1450_v5 = vmul.f32 0.2, %v1446_v60  ;;  %v1493_v9 = vadd.f32 %v1488_v19, %v1471_v25  ;;  %v1492_v4 = vrot.slane %v4415_v15, %v3508_v23 }
 0x315   : > { %2661 = vset.pattern.permute.xlu1 %v4418_v63  ;;  %v1449_v26 = vmul.f32 0.2, %v1445_v20  ;;  %v1407_v63 = vmax.f32 %v1399_v11, %v1403_v14 }
 0x316   : > { %1866 = vperm.xlu1 %2661, %v3178_v8   ;;  %v1444_v8 = vrot.slane %v4415_v15, %v3473_v3  ;;  %v1497_v10 = vmul.f32 0.2, %v1493_v9 }
 0x317   : > { %v1453_v24 = vmax.f32 %v1445_v20, %v1449_v26  ;;  %v1387_v49 = vpop.permute.xlu1 %1386  ;;  %v1415_v22 = vmul.f32 %v1412_v57, %v1407_v63 }
 0x318   : > { %v1400_v62 = vadd.f32 %v1396_v58, %v1387_v49  ;;  %v1501_v20 = vmax.f32 %v1493_v9, %v1497_v10  ;;  %v3969_v49 = vstv %s2401_s30 }
 0x319   : > { %v1461_v31 = vmul.f32 %v1460_v56, %v1453_v24  ;;  %v1419_v33 = vadd.f32 %v1415_v22, %v1371_v40  ;;  %v1479_v40 = vpop.permute.xlu0 %1478 }
 0x31a   : > { %2662 = vset.pattern.permute.xlu1 %v4419_v28  ;;  %v1404_v38 = vmul.f32 0.2, %v1400_v62  ;;  %v1509_v34 = vmul.f32 %v1508_v18, %v1501_v20 }
 0x31b   : > { %1910 = vperm.xlu1 %2662, %v3172_v6   ;;  %v1465_v50 = vadd.f32 %v1461_v31, %v1417_v54  ;;  %v1454_v6 = vmax.f32 %v1446_v60, %v1450_v5 }
 0x31c   : > { %v1408_v45 = vmax.f32 %v1400_v62, %v1404_v38  ;;  %v1431_v36 = vpop.permute.xlu1 %1430 }
 0x31d   : > { %v1447_v53 = vadd.f32 %v1444_v8, %v1431_v36  ;;  %v1462_v51 = vmul.f32 %v1460_v56, %v1454_v6  ;;  %v1513_v54 = vadd.f32 %v1509_v34, %v1465_v50 }
 0x31e   : > { %v1416_v59 = vmul.f32 %v1412_v57, %v1408_v45 }
 0x31f   : > { %v1451_v43 = vmul.f32 0.2, %v1447_v53  ;;  %v1466_v16 = vadd.f32 %v1462_v51, %v1418_v21  ;;  %v1495_v21 = vadd.f32 %v1492_v4, %v1479_v40 }
 0x320   : > { %v1420_v61 = vadd.f32 %v1416_v59, %v1372_v7 }
 0x321   : > { %v1455_v42 = vmax.f32 %v1447_v53, %v1451_v43  ;;  %v1475_v29 = vpop.permute.xlu1 %1474  ;;  %v1499_v14 = vmul.f32 0.2, %v1495_v21 }
 0x322   : > { %v1494_v2 = vadd.f32 %v1488_v19, %v1475_v29 }
 0x323   : > { %v1463_v35 = vmul.f32 %v1460_v56, %v1455_v42  ;;  %v1503_v63 = vmax.f32 %v1495_v21, %v1499_v14  ;;  %v4046_v14 = vstv %s2403_s11  ;;  %s4222_s11 = scalar_lea.hbm %s4273_s4, %s2328_s14 }
 0x324   : > { %v1498_v55 = vmul.f32 0.2, %v1494_v2 }
 0x325   : > { %v1467_v48 = vadd.f32 %v1463_v35, %v1419_v33  ;;  %v1511_v50 = vmul.f32 %v1508_v18, %v1503_v63  ;;  %v4057_v63 = vrot.slane %v3818_v27, %v4401_v41 }
 0x326   : > { %v1502_v37 = vmax.f32 %v1494_v2, %v1498_v55  ;;  %v1435_v17 = vpop.permute.xlu1 %1434 }
 0x327   : > { %v1448_v28 = vadd.f32 %v1444_v8, %v1435_v17  ;;  %v1523_v8 = vpop.permute.xlu0 %1522  ;;  %v1515_v25 = vadd.f32 %v1511_v50, %v1467_v48  ;;  %v4063_v50 = vrot.slane %v3818_v27, %v3473_v3 }
 0x328   : > { %v1510_v0 = vmul.f32 %v1508_v18, %v1502_v37 }
 0x329   : > { %v1452_v57 = vmul.f32 0.2, %v1448_v28 }
 0x32a   : > { %v3964_v47 = vadd.f32 %v1510_v0, %v1466_v16 }
 0x32b   : > { %v1456_v46 = vmax.f32 %v1448_v28, %v1452_v57  ;;  %v1567_v22 = vpop.permute.xlu0 %1566 }
 0x32c   : > { %v1519_v58 = vpop.permute.xlu1 %1518 }
 0x32d   : > { %v1541_v11 = vadd.f32 %v3962_v44, %v1519_v58  ;;  %v1464_v26 = vmul.f32 %v1460_v56, %v1456_v46  ;;  %v3976_v56 = vrot.slane %v4415_v15, %v3536_v12  ;;  %v1584_v46 = vrot.slane %v3818_v27, %v3424_v32  ;;  %v4423_v58 = vld [vmem:[#allocation15_spill] sm:$0xff] }
 0x32e   : > { %v4010_v20 = vrot.slane %v4423_v58, %v3424_v32  ;;  %v4023_v21 = vrot.slane %v4423_v58, %v3508_v23  ;;  %v1632_v32 = vrot.slane %v3818_v27, %v3419_v30 }
 0x32f   : > { %v1545_v7 = vmul.f32 0.2, %v1541_v11  ;;  %v1468_v1 = vadd.f32 %v1464_v26, %v1420_v61  ;;  %v1575_v6 = vpop.permute.xlu0 %1574  ;;  %v4019_v26 = vrot.slane %v4423_v58, %v4401_v41 }
 0x330   : > { %v1591_v34 = vadd.f32 %v4010_v20, %v1575_v6 }
 0x331   : > { %v1549_v24 = vmax.f32 %v1541_v11, %v1545_v7  ;;  %v1483_v13 = vpop.permute.xlu1 %1482  ;;  %v4015_v11 = vrot.slane %v4423_v58, %v3445_v39  ;;  %4424 = vst [vmem:[#allocation17_spill] sm:$0xff] %v4019_v26  ;;  %v1589_v7 = vadd.f32 %v1584_v46, %v1567_v22 }
 0x332   : > { %v1496_v62 = vadd.f32 %v1492_v4, %v1483_v13  ;;  %v1542_v4 = vadd.f32 %v3962_v44, %v1523_v8  ;;  %v4033_v44 = vrot.slane %v4423_v58, %v3419_v30  ;;  %v4040_v13 = vrot.slane %v4423_v58, %v3454_v52 }
 0x333   : > { %v1557_v31 = vmul.f32 %v3969_v49, %v1549_v24  ;;  %v1619_v33 = vpop.permute.xlu0 %1618  ;;  %v1680_v24 = vrot.slane %v3818_v27, %v3445_v39 }
 0x334   : > { %v1500_v60 = vmul.f32 0.2, %v1496_v62  ;;  %4426 = vst [vmem:[#allocation29_spill] sm:$0xff] %v4040_v13  ;;  %v1638_v30 = vadd.f32 %v1632_v32, %v1619_v33  ;;  %v1546_v39 = vmul.f32 0.2, %v1542_v4  ;;  %v4073_v33 = vrot.slane %v3818_v27, %v3508_v23 }
 0x335   : > { %v3972_v38 = vadd.f32 %v1557_v31, %v1513_v54  ;;  %v4048_v54 = vstv %s2405_s22  ;;  %v1728_v31 = vrot.slane %v3818_v27, %v3454_v52  ;;  %v4065_v52 = vstv %s2409_s5  ;;  %s2778_s22 = scalar_lea.vmem %s4224_s26, 256 }
 0x336   : > { %v1504_v45 = vmax.f32 %v1496_v62, %v1500_v60  ;;  %v1527_v36 = vpop.permute.xlu1 %1526  ;;  %v4044_v62 = vrot.slane %v4423_v58, %v3473_v3  ;;  %v1642_v6 = vmul.f32 0.2, %v1638_v30  ;;  %v1550_v3 = vmax.f32 %v1542_v4, %v1546_v39  ;;  %p2779_p1 = scmp.ne.s32.totalorder %s4224_s26, %s2778_s22 }
 0x337   : > { %v1543_v53 = vadd.f32 %v3976_v56, %v1527_v36  ;;  %v1663_v9 = vpop.permute.xlu0 %1662 }
 0x338   : > { %v1512_v5 = vmul.f32 %v1508_v18, %v1504_v45  ;;  %4427 = vst [vmem:[#allocation18_spill] sm:$0xff] %v4044_v62  ;;  %v1685_v45 = vadd.f32 %v1680_v24, %v1663_v9  ;;  %v4075_v9 = vstv %s2413_s10  ;;  %v1646_v13 = vmax.f32 %v1638_v30, %v1642_v6  ;;  %p2780_p0 = pnand %p2779_p1, %p4441_p4 }
 0x339   : > { %v1547_v59 = vmul.f32 0.2, %v1543_v53 }
 0x33a   : > { %v3979_v43 = vadd.f32 %v1512_v5, %v1468_v1  ;;  %v4029_v1 = vrot.slane %v4423_v58, %v3536_v12  ;;  %v1593_v5 = vmul.f32 0.2, %v1589_v7  ;;  %p2781_p2 = pneg %p2780_p0 }
 0x33b   : > { %v1551_v19 = vmax.f32 %v1543_v53, %v1547_v59  ;;  %v1571_v61 = vpop.permute.xlu1 %1570  ;;  %v1671_v51 = vpop.permute.xlu0 %1670  ;;  %v4059_v53 = vstv %s2407_s25  ;;  %s2926_s25 = smov [#allocation8]  }
 0x33c   : > { %4420 = vst [vmem:[#allocation26_spill] sm:$0xff] %v3979_v43  ;;  %4425 = vst [vmem:[#allocation30_spill] sm:$0xff] %v4029_v1  ;;  %v1687_v36 = vadd.f32 %v4015_v11, %v1671_v51  ;;  %v1689_v51 = vmul.f32 0.2, %v1685_v45  ;;  %v4077_v1 = vstv %s2415_s29  ;;  %s2782_s5 = sshll.u32 %s2926_s25, 4  ;;  %s2783_s5 = int_to_ptr.vmem [resolvable:$false] %s2782_s5 }
 0x33d   : > { %v1559_v42 = vmul.f32 %v3969_v49, %v1551_v19  ;;  %v1595_v19 = vmul.f32 0.2, %v1591_v34  ;;  %p2785_p5 = scmp.lt.s32.totalorder %s4224_s26, %s2783_s5 }
 0x33f   : > { %v3982_v29 = vadd.f32 %v1559_v42, %v1515_v25  ;;  %v1715_v48 = vpop.permute.xlu0 %1714  ;;  %v1590_v25 = vadd.f32 %v1584_v46, %v1571_v61  ;;  %v4068_v42 = vstv %s2411_s7  ;;  %v1599_v62 = vmax.f32 %v1591_v34, %v1595_v19  ;;  %s2784_s7 = scalar_lea.vmem %s2783_s5, 512 }
 0x340   : > { %v3984_v15 = vpop.permute.xlu1 %1530  ;;  %v1734_v59 = vadd.f32 %v1728_v31, %v1715_v48  ;;  %v1691_v48 = vmul.f32 0.2, %v1687_v36  ;;  %p2786_p12 = scmp.lt.s32.totalorder %s2784_s7, %s2778_s22 }
 0x341   : > { %4421 = vst [vmem:[#allocation16_spill] sm:$0xff] %v3982_v29  ;;  %v4081_v29 = vstv %s2417_s23  ;;  %v1607_v6 = vmul.f32 %v4046_v14, %v1599_v62 }
 0x342   : > { %v1738_v61 = vmul.f32 0.2, %v1734_v59  ;;  %4429 = vst [vmem:[#allocation37_spill] sm:$0xff] %v4081_v29  ;;  %p2787_p13 = por %p2786_p12, %p2785_p5 }
 0x343   : > { %v1759_v28 = vpop.permute.xlu0 %1758 }
 0x344   : > { %v1781_v22 = vadd.f32 %v4057_v63, %v1759_v28  ;;  %v1597_v28 = vmax.f32 %v1589_v7, %v1593_v5  ;;  %v1693_v7 = vmax.f32 %v1685_v45, %v1689_v51  ;;  %v1695_v5 = vmax.f32 %v1687_v36, %v1691_v48  ;;  %p2788_p6 = pnand %p2787_p13, %p2781_p2 }
 0x345   : > { %v3986_v2 = vpop.permute.xlu1 %1614  ;;  %v1742_v19 = vmax.f32 %v1734_v59, %v1738_v61 }
 0x346   : > { %v1637_v23 = vadd.f32 %v1632_v32, %v3986_v2  ;;  %v1605_v34 = vmul.f32 %v4046_v14, %v1597_v28  ;;  %v1701_v59 = vmul.f32 %v4059_v53, %v1693_v7 }
 0x347   : > { %v4000_v16 = vpop.permute.xlu0 %1766 }
 0x348   : > { %v4085_v4 = vadd.f32 %v4019_v26, %v4000_v16  ;;  %v1641_v26 = vmul.f32 0.2, %v1637_v23 }
 0x34a   : > { %v3988_v35 = vpop.permute.xlu1 %1578  ;;  %v4097_v45 = vmul.f32 0.2, %v4085_v4  ;;  %v1645_v51 = vmax.f32 %v1637_v23, %v1641_v26 }
 0x34b   : > { %v1811_v57 = vpop.permute.xlu0 %1810 }
 0x34c   : > { %v1830_v41 = vadd.f32 %v4063_v50, %v1811_v57  ;;  %v1785_v57 = vmul.f32 0.2, %v1781_v22 }
 0x34e   : > { %v1834_v39 = vmul.f32 0.2, %v1830_v41  ;;  %v1789_v16 = vmax.f32 %v1781_v22, %v1785_v57 }
 0x34f   : > { %v3990_v55 = vpop.permute.xlu1 %1622  ;;  %v1855_v60 = vpop.permute.xlu0 %1854 }
 0x350   : > { %v1877_v46 = vadd.f32 %v4073_v33, %v1855_v60  ;;  %v4090_v60 = vrot.slane %v3818_v27, %v3536_v12  ;;  %v1838_v36 = vmax.f32 %v1830_v41, %v1834_v39  ;;  %v1544_v27 = vadd.f32 %v3976_v56, %v3984_v15 }
 0x351   : > { %v4115_v56 = vmul.f32 %v4068_v42, %v1789_v16 }
 0x352   : > { %v1881_v2 = vmul.f32 0.2, %v1877_v46  ;;  %v1548_v48 = vmul.f32 0.2, %v1544_v27 }
 0x353   : > { %v1863_v43 = vpop.permute.xlu0 %1862 }
 0x354   : > { %v3992_v37 = vpop.permute.xlu1 %1666  ;;  %v4112_v22 = vadd.f32 %v4023_v21, %v1863_v43  ;;  %v1592_v43 = vadd.f32 %v4010_v20, %v3988_v35  ;;  %v1552_v20 = vmax.f32 %v1544_v27, %v1548_v48 }
 0x355   : > { %v1686_v32 = vadd.f32 %v1680_v24, %v3992_v37  ;;  %v4103_v37 = vmul.f32 %v4059_v53, %v1695_v5  ;;  %v1639_v24 = vadd.f32 %v4033_v44, %v3990_v55 }
 0x356   : > { %v4135_v26 = vmul.f32 0.2, %v4112_v22 }
 0x357   : > { %v1907_v12 = vpop.permute.xlu0 %1906  ;;  %v1643_v61 = vmul.f32 0.2, %v1639_v24 }
 0x358   : > { %v4118_v15 = vadd.f32 %v4090_v60, %v1907_v12  ;;  %v4432_v12 = vld [vmem:[#allocation16_spill] sm:$0xff] }
 0x359   : > { %v3994_v17 = vpop.permute.xlu1 %1626 }
 0x35a   : > { %v1640_v39 = vadd.f32 %v4033_v44, %v3994_v17  ;;  %v4140_v7 = vmul.f32 0.2, %v4118_v15  ;;  %v4431_v17 = vld [vmem:[#allocation29_spill] sm:$0xff] }
 0x35e   : > { %v3996_v18 = vpop.permute.xlu1 %1710 }
 0x35f   : > { %v1733_v62 = vadd.f32 %v1728_v31, %v3996_v18  ;;  %v1791_v18 = vmax.f32 %v4085_v4, %v4097_v45  ;;  %v4124_v31 = vmul.f32 %v4075_v9, %v1838_v36 }
 0x363   : > { %v3998_v10 = vpop.permute.xlu1 %1674 }
 0x364   : > { %v1688_v5 = vadd.f32 %v4015_v11, %v3998_v10  ;;  %v1560_v11 = vmul.f32 %v3969_v49, %v1552_v20  ;;  %v4436_v20 = vld [vmem:[#allocation26_spill] sm:$0xff] }
 0x368   : > { %v4002_v0 = vpop.permute.xlu1 %1718 }
 0x369   : > { %4422 = vst [vmem:[#allocation28_spill] sm:$0xff] %v4002_v0  ;;  %v1558_v0 = vmul.f32 %v3969_v49, %v1550_v3  ;;  %v1654_v3 = vmul.f32 %v4048_v54, %v1646_v13  ;;  %v4109_v13 = vmul.f32 %v4065_v52, %v1742_v19 }
 0x36b   : > { %v1562_v28 = vadd.f32 %v1558_v0, %v3964_v47  ;;  %v1653_v47 = vmul.f32 %v4048_v54, %v1645_v51  ;;  %v4434_v51 = vld [vmem:[#allocation17_spill] sm:$0xff] }
 0x36d   : > { %v4004_v40 = vpop.permute.xlu1 %1762 }
 0x36e   : > { %v1782_v57 = vadd.f32 %v4057_v63, %v4004_v40  ;;  %v1609_v40 = vadd.f32 %v1605_v34, %v3972_v38  ;;  %v1596_v63 = vmul.f32 0.2, %v1592_v43 }
 0x370   : > { %v4430_v16 = vld [vmem:[#allocation28_spill] sm:$0xff]  ;;  %v1786_v36 = vmul.f32 0.2, %v1782_v57  ;;  %v1657_v38 = vadd.f32 %v1653_v47, %v1609_v40 }
 0x371   : > { %v1735_v44 = vadd.f32 %v4431_v17, %v4430_v16 }
 0x372   : > { %v4052_v8 = vpop.permute.xlu1 %1722  ;;  %v1705_v40 = vadd.f32 %v1701_v59, %v1657_v38 }
 0x373   : > { %4428 = vst [vmem:[#allocation31_spill] sm:$0xff] %v4052_v8  ;;  %v1594_v8 = vmul.f32 0.2, %v1590_v25 }
 0x375   : > { %v1598_v29 = vmax.f32 %v1590_v25, %v1594_v8  ;;  %v1885_v8 = vmax.f32 %v1877_v46, %v1881_v2  ;;  %v1690_v25 = vmul.f32 0.2, %v1686_v32  ;;  %v1737_v46 = vmul.f32 0.2, %v1733_v62 }
 0x376   : > { %v1647_v2 = vmax.f32 %v1639_v24, %v1643_v61  ;;  %v1600_v24 = vmax.f32 %v1592_v43, %v1596_v63  ;;  %v1739_v61 = vmul.f32 0.2, %v1735_v44  ;;  %v1564_v63 = vadd.f32 %v1560_v11, %v4436_v20 }
 0x377   : > { %v1807_v58 = vpop.permute.xlu1 %1806  ;;  %v1606_v41 = vmul.f32 %v4046_v14, %v1598_v29  ;;  %v4132_v29 = vmul.f32 %v4077_v1, %v1885_v8  ;;  %v1694_v23 = vmax.f32 %v1686_v32, %v1690_v25  ;;  %v1741_v32 = vmax.f32 %v1733_v62, %v1737_v46 }
 0x378   : > { %v1829_v0 = vadd.f32 %v4063_v50, %v1807_v58  ;;  %v1611_v8 = vadd.f32 %v1607_v6, %v4432_v12  ;;  %v1692_v62 = vmul.f32 0.2, %v1688_v5  ;;  %v1790_v46 = vmax.f32 %v1782_v57, %v1786_v36 }
 0x379   : > { %v1610_v35 = vadd.f32 %v1606_v41, %v1562_v28  ;;  %v1702_v25 = vmul.f32 %v4059_v53, %v1694_v23  ;;  %v1644_v41 = vmul.f32 0.2, %v1640_v39  ;;  %v1655_v28 = vmul.f32 %v4048_v54, %v1647_v2 }
 0x37a   : > { %v4433_v50 = vld [vmem:[#allocation31_spill] sm:$0xff]  ;;  %v1833_v27 = vmul.f32 0.2, %v1829_v0  ;;  %v1749_v6 = vmul.f32 %v4065_v52, %v1741_v32  ;;  %v1915_v32 = vpop.permute.xlu0 %1914  ;;  %v1743_v36 = vmax.f32 %v1735_v44, %v1739_v61 }
 0x37b   : > { %v1736_v58 = vadd.f32 %v4431_v17, %v4433_v50  ;;  %v1658_v34 = vadd.f32 %v1654_v3, %v1610_v35  ;;  %v1648_v17 = vmax.f32 %v1640_v39, %v1644_v41  ;;  %v4435_v3 = vld [vmem:[#allocation18_spill] sm:$0xff]  ;;  %v1659_v12 = vadd.f32 %v1655_v28, %v1611_v8 }
 0x37c   : > { %v1771_v30 = vpop.permute.xlu1 %1770  ;;  %v1753_v57 = vadd.f32 %v1749_v6, %v1705_v40  ;;  %v1798_v39 = vmul.f32 %v4068_v42, %v1790_v46 }
 0x37d   : > { %v1784_v48 = vadd.f32 %v4434_v51, %v1771_v30  ;;  %v1706_v16 = vadd.f32 %v1702_v25, %v1658_v34  ;;  %v1740_v47 = vmul.f32 0.2, %v1736_v58  ;;  %v1608_v30 = vmul.f32 %v4046_v14, %v1600_v24 }
 0x37e   : > { %v1656_v25 = vmul.f32 %v4048_v54, %v1648_v17  ;;  %v1751_v24 = vmul.f32 %v4065_v52, %v1743_v36  ;;  %v1707_v51 = vadd.f32 %v4103_v37, %v1659_v12 }
 0x37f   : > { %v1788_v2 = vmul.f32 0.2, %v1784_v48  ;;  %v1754_v59 = vadd.f32 %v4109_v13, %v1706_v16  ;;  %v1612_v8 = vadd.f32 %v1608_v30, %v1564_v63  ;;  %v1801_v13 = vadd.f32 %v4115_v56, %v1753_v57 }
 0x381   : > { %v1815_v55 = vpop.permute.xlu1 %1814  ;;  %v1792_v11 = vmax.f32 %v1784_v48, %v1788_v2  ;;  %v1802_v54 = vadd.f32 %v1798_v39, %v1754_v59 }
 0x382   : > { %v1831_v49 = vadd.f32 %v4435_v3, %v1815_v55 }
 0x383   : > { %v1800_v16 = vmul.f32 %v4068_v42, %v1792_v11  ;;  %v1850_v37 = vadd.f32 %v4124_v31, %v1802_v54 }
 0x384   : > { %v1835_v38 = vmul.f32 0.2, %v1831_v49 }
 0x386   : > { %v1859_v19 = vpop.permute.xlu1 %1858 }
 0x387   : > { %v1878_v10 = vadd.f32 %v4073_v33, %v1859_v19  ;;  %v1837_v33 = vmax.f32 %v1829_v0, %v1833_v27  ;;  %v1696_v19 = vmax.f32 %v1688_v5, %v1692_v62  ;;  %v1744_v0 = vmax.f32 %v1736_v58, %v1740_v47  ;;  %v4437_v5 = vld [vmem:[#allocation30_spill] sm:$0xff] }
 0x388   : > { %v1928_v27 = vadd.f32 %v4437_v5, %v1915_v32  ;;  %v1660_v62 = vadd.f32 %v1656_v25, %v1612_v8  ;;  %v1755_v47 = vadd.f32 %v1751_v24, %v1707_v51 }
 0x389   : > { %v1882_v43 = vmul.f32 0.2, %v1878_v10  ;;  %v1845_v50 = vmul.f32 %v4075_v9, %v1837_v33  ;;  %v1704_v44 = vmul.f32 %v4059_v53, %v1696_v19  ;;  %v1752_v28 = vmul.f32 %v4065_v52, %v1744_v0  ;;  %v4438_v52 = vld [vmem:[#allocation37_spill] sm:$0xff] }
 0x38a   : > { %v1934_v53 = vmax.f32 %v4118_v15, %v4140_v7  ;;  %v1932_v17 = vmul.f32 0.2, %v1928_v27  ;;  %v1799_v15 = vmul.f32 %v4068_v42, %v1791_v18 }
 0x38b   : > { %v1819_v23 = vpop.permute.xlu1 %1818  ;;  %v1886_v34 = vmax.f32 %v1878_v10, %v1882_v43  ;;  %v1849_v6 = vadd.f32 %v1845_v50, %v1801_v13  ;;  %v1708_v48 = vadd.f32 %v1704_v44, %v1660_v62  ;;  %v1887_v43 = vmax.f32 %v4112_v22, %v4135_v26 }
 0x38c   : > { %v1832_v35 = vadd.f32 %v4435_v3, %v1819_v23  ;;  %v1942_v31 = vmul.f32 %v4438_v52, %v1934_v53  ;;  %v1936_v19 = vmax.f32 %v1928_v27, %v1932_v17  ;;  %v1803_v2 = vadd.f32 %v1799_v15, %v1755_v47  ;;  %v267_v53 = vld [vmem:[#allocation5 + $0x6] sm:$0x3] }
 0x38d   : > { %v1894_v61 = vmul.f32 %v4077_v1, %v1886_v34  ;;  %v1895_v57 = vmul.f32 %v4077_v1, %v1887_v43  ;;  %vm271_vm4 = vnez %v267_v53 }
 0x38e   : > { %v1836_v41 = vmul.f32 0.2, %v1832_v35  ;;  %v1944_v22 = vmul.f32 %v4438_v52, %v1936_v19 }
 0x390   : > { %v1903_v55 = vpop.permute.xlu1 %1902  ;;  %v1840_v10 = vmax.f32 %v1832_v35, %v1836_v41  ;;  %v1756_v35 = vadd.f32 %v1752_v28, %v1708_v48 }
 0x391   : > { %v1925_v14 = vadd.f32 %v4090_v60, %v1903_v55  ;;  %v1839_v60 = vmax.f32 %v1831_v49, %v1835_v38  ;;  %v1898_v49 = vadd.f32 %v1894_v61, %v1850_v37  ;;  %v4439_v61 = vmov 0  }
 0x392   : > { %v1848_v40 = vmul.f32 %v4075_v9, %v1840_v10  ;;  %v1804_v20 = vadd.f32 %v1800_v16, %v1756_v35  ;;  %v266_v10 = vld [vmem:[#allocation5 + $0x4] sm:$0x3]  ;;  %v1981_v47 = vsel %vm271_vm4, 16843009, %v4439_v61 }
 0x393   : > { %v1929_v58 = vmul.f32 0.2, %v1925_v14  ;;  %v1847_v7 = vmul.f32 %v4075_v9, %v1839_v60  ;;  %v1946_v18 = vadd.f32 %v1942_v31, %v1898_v49  ;;  %v265_v60 = vld [vmem:[#allocation5 + $0x2] sm:$0x3]  ;;  %vm270_vm1 = vnez %v266_v10 }
 0x394   : > { %v1852_v45 = vadd.f32 %v1848_v40, %v1804_v20  ;;  %vm269_vm3 = vnez %v265_v60  ;;  %v1985_v40 = vunpack.c.0.s8 %v1981_v47 }
 0x395   : > { %v1933_v46 = vmax.f32 %v1925_v14, %v1929_v58  ;;  %v1867_v23 = vpop.permute.xlu1 %1866  ;;  %v1851_v9 = vadd.f32 %v1847_v7, %v1803_v2  ;;  %v1950_v39 = vmul.f32 %v1946_v18, %v1946_v18  ;;  %v1979_v48 = vsel %vm269_vm3, 16843009, %v4439_v61 }
 0x396   : > { %v1880_v56 = vadd.f32 %v4023_v21, %v1867_v23  ;;  %v1897_v21 = vadd.f32 %v4132_v29, %v1849_v6  ;;  %v264_v6 = vld [vmem:[#allocation5] sm:$0x3]  ;;  %v1983_v17 = vunpack.c.0.s8 %v1979_v48  ;;  %vm1989_vm8 = vcmp.ne.s32.totalorder %v1985_v40, 0 }
 0x397   : > { %v1941_v3 = vmul.f32 %v4438_v52, %v1933_v46  ;;  %v1899_v59 = vadd.f32 %v1895_v57, %v1851_v9  ;;  %v1954_v34 = vsel %vm291_vm0, %v1950_v39, 0.0  ;;  %vm268_vm2 = vnez %v264_v6 }
 0x398   : > { %v1884_v33 = vmul.f32 0.2, %v1880_v56  ;;  %v1980_v46 = vsel %vm270_vm1, 16843009, %v4439_v61  ;;  %v1978_v23 = vsel %vm268_vm2, 16843009, %v4439_v61 }
 0x399   : > { %v1945_v32 = vadd.f32 %v1941_v3, %v1897_v21  ;;  %v1984_v16 = vunpack.c.0.s8 %v1980_v46  ;;  %vm1987_vm7 = vcmp.ne.s32.totalorder %v1983_v17, 0 }
 0x39a   : > { %v1888_v63 = vmax.f32 %v1880_v56, %v1884_v33  ;;  %v1911_v30 = vpop.permute.xlu1 %1910  ;;  %v1982_v56 = vunpack.c.0.s8 %v1978_v23 }
 0x39b   : > { %v1927_v4 = vadd.f32 %v4437_v5, %v1911_v30  ;;  %v1949_v26 = vmul.f32 %v1945_v32, %v1945_v32  ;;  %vm1988_vm5 = vcmp.ne.s32.totalorder %v1984_v16, 0 }
 0x39c   : > { %v1896_v42 = vmul.f32 %v4077_v1, %v1888_v63  ;;  %vm1986_vm6 = vcmp.ne.s32.totalorder %v1982_v56, 0 }
 0x39d   : > { %v1931_v12 = vmul.f32 0.2, %v1927_v4  ;;  %v1953_v55 = vsel %vm291_vm0, %v1949_v26, 0.0 }
 0x39e   : > { %v1900_v29 = vadd.f32 %v1896_v42, %v1852_v45  ;;  %v1955_v14 = vadd.f32 %v1954_v34, %v1953_v55  ;;  %v4440_v55 = vmov 0.0  }
 0x39f   : > { %v1935_v36 = vmax.f32 %v1927_v4, %v1931_v12  ;;  %2344 = vmatprep.mubr.msk.bf16.mxu1 %vm2925_vm9, %v4440_v55  ;;  %2350 = vmatprep.mubr.msk.bf16.mxu0 %vm2925_vm9, %v4440_v55 }
 0x3a0   : > { %v1948_v25 = vadd.f32 %v1944_v22, %v1900_v29 }
 0x3a1   : > { %v1943_v0 = vmul.f32 %v4438_v52, %v1935_v36 }
 0x3a2   : > { %v1952_v38 = vmul.f32 %v1948_v25, %v1948_v25 }
 0x3a3   : > { %v1947_v41 = vadd.f32 %v1943_v0, %v1899_v59 }
 0x3a4   : > { %v1958_v27 = vsel %vm291_vm0, %v1952_v38, 0.0 }
 0x3a5   : > { %v1951_v50 = vmul.f32 %v1947_v41, %v1947_v41 }
 0x3a7   : > { %v1956_v5 = vsel %vm291_vm0, %v1951_v50, 0.0 }
 0x3a8   : > { %v1957_v1 = vadd.f32 %v1956_v5, %v1955_v14 }
 0x3aa   : > { %v1959_v8 = vadd.f32 %v1958_v27, %v1957_v1 }
 0x3ac   : > { %1960 = vadd.xlane.f32.xlu1 %v1959_v8 }
 0x439   : > { %v1961_v44 = vpop.xlane.xlu1 %1960 }
 0x43a   : > { %v1962_v11 = vrot.slane %v1961_v44, 4 }
 0x43c   : > { %v1963_v24 = vadd.f32 %v1962_v11, %v1961_v44 }
 0x43e   : > { %v1964_v54 = vrot.slane %v1963_v24, 2 }
 0x440   : > { %v1965_v13 = vadd.f32 %v1964_v54, %v1963_v24 }
 0x442   : > { %v1966_v58 = vrot.slane %v1965_v13, 1 }
 0x444   : > { %v1967_v62 = vadd.f32 %v1966_v58, %v1965_v13 }
 0x446   : > { %2418 = vpush %v1967_v62 }
 0x477   : > { %s2419_s6 = spop %2418 }
 0x478   : > { %s1969_s13 = sadd.f32 1e-30, %s2419_s6 }
 0x47a   : > { %v1970_v51 = vstv %s1969_s13 }
 0x47b   : > { %2666 = vrsqrt.f32 %v1970_v51 }
 0x485   : > { %v2667_v28 = vpop.eup %2666 }
 0x486   : > { %2420 = vpush %v2667_v28 }
 0x4b7   : > { %s2421_s8 = spop %2420 }
 0x4b8   : > { %v1973_v37 = vstv %s2421_s8 }
 0x4b9   : > { %v1974_v52 = vmul.f32 %v1973_v37, %v1945_v32  ;;  %v1975_v3 = vmul.f32 %v1973_v37, %v1946_v18  ;;  %v1976_v35 = vmul.f32 %v1973_v37, %v1947_v41  ;;  %v1977_v21 = vmul.f32 %v1973_v37, %v1948_v25 }
 0x4bb   : > { %v1992_v33 = vsel %vm1988_vm5, %v1976_v35, -1e+30  ;;  %v1990_v15 = vsel %vm1986_vm6, %v1974_v52, -1e+30  ;;  %v1991_v43 = vsel %vm1987_vm7, %v1975_v3, -1e+30 }
 0x4bc   : > { %v2000_v7 = vsel %vm291_vm0, %v1992_v33, -inf  ;;  %v1994_v49 = vsel %vm291_vm0, %v1990_v15, -inf  ;;  %v1997_v31 = vsel %vm291_vm0, %v1991_v43, -inf  ;;  %v1993_v20 = vsel %vm1989_vm8, %v1977_v21, -1e+30 }
 0x4bd   : > { %2001 = vmax.xlane.f32.xlu1 %v2000_v7  ;;  %1995 = vmax.xlane.f32.xlu0 %v1994_v49  ;;  %v2003_v63 = vsel %vm291_vm0, %v1993_v20, -inf }
 0x4c1   : > { %1998 = vmax.xlane.f32.xlu0 %v1997_v31 }
 0x4c5   : > { %2004 = vmax.xlane.f32.xlu0 %v2003_v63 }
 0x54a   : > { %v2002_v30 = vpop.xlane.xlu1 %2001  ;;  %v1996_v19 = vpop.xlane.xlu0 %1995 }
 0x54b   : > { %v2008_v2 = vsub.f32 %v1992_v33, %v2002_v30  ;;  %v2006_v32 = vsub.f32 %v1990_v15, %v1996_v19 }
 0x54d   : > { %v2010_v4 = vmul.f32 1.442695, %v2006_v32  ;;  %v2014_v45 = vmul.f32 1.442695, %v2008_v2 }
 0x54e   : > { %v1999_v42 = vpop.xlane.xlu0 %1998 }
 0x54f   : > { %v2007_v9 = vsub.f32 %v1991_v43, %v1999_v42  ;;  %2668 = vpow2.f32 %v2010_v4 }
 0x550   : > { %2670 = vpow2.f32 %v2014_v45 }
 0x551   : > { %v2012_v18 = vmul.f32 1.442695, %v2007_v9 }
 0x552   : > { %v2005_v12 = vpop.xlane.xlu0 %2004 }
 0x553   : > { %2672 = vpow2.f32 %v2012_v18  ;;  %v2009_v29 = vsub.f32 %v1993_v20, %v2005_v12 }
 0x555   : > { %v2016_v57 = vmul.f32 1.442695, %v2009_v29 }
 0x557   : > { %2674 = vpow2.f32 %v2016_v57 }
 0x559   : > { %v2669_v22 = vpop.eup %2668 }
 0x55a   : > { %v2018_v26 = vsel %vm291_vm0, %v2669_v22, 0.0  ;;  %v2671_v36 = vpop.eup %2670 }
 0x55b   : > { %2019 = vadd.xlane.f32.xlu1 %v2018_v26  ;;  %v2024_v59 = vsel %vm291_vm0, %v2671_v36, 0.0 }
 0x55d   : > { %v2673_v39 = vpop.eup %2672 }
 0x55e   : > { %v2021_v25 = vsel %vm291_vm0, %v2673_v39, 0.0 }
 0x55f   : > { %2022 = vadd.xlane.f32.xlu0 %v2021_v25  ;;  %2025 = vadd.xlane.f32.xlu1 %v2024_v59 }
 0x561   : > { %v2675_v0 = vpop.eup %2674 }
 0x562   : > { %v2027_v41 = vsel %vm291_vm0, %v2675_v0, 0.0 }
 0x563   : > { %2028 = vadd.xlane.f32.xlu0 %v2027_v41 }
 0x5e8   : > { %v2020_v50 = vpop.xlane.xlu1 %2019 }
 0x5e9   : > { %2676 = vrcp.f32 %v2020_v50 }
 0x5ec   : > { %v2023_v38 = vpop.xlane.xlu0 %2022  ;;  %v2026_v34 = vpop.xlane.xlu1 %2025 }
 0x5ed   : > { %2678 = vrcp.f32 %v2023_v38 }
 0x5ee   : > { %2680 = vrcp.f32 %v2026_v34 }
 0x5f0   : > { %v2029_v14 = vpop.xlane.xlu0 %2028 }
 0x5f1   : > { %2682 = vrcp.f32 %v2029_v14 }
 0x5f3   : > { %v2677_v5 = vpop.eup %2676 }
 0x5f4   : > { %v2034_v27 = vmul.f32 %v2677_v5, %v2669_v22 }
 0x5f7   : > { %v2679_v1 = vpop.eup %2678 }
 0x5f8   : > { %v2035_v8 = vmul.f32 %v2679_v1, %v2673_v39  ;;  %v2681_v44 = vpop.eup %2680 }
 0x5f9   : > { %v2036_v54 = vmul.f32 %v2681_v44, %v2671_v36 }
 0x5fa   : > { %v2038_v11 = vpack.c.bf16 %v2035_v8, %v2034_v27 }
 0x5fb   : > { %v2683_v24 = vpop.eup %2682 }
 0x5fc   : > { %v2037_v13 = vmul.f32 %v2683_v24, %v2675_v0  ;;  %2345 = vmatmul.mubr.msk.bf16.vlgmr.msra.gmra.mrb[0].mxu1 %vm291_vm0, %v2038_v11 }
 0x5fe   : > { %v2039_v58 = vpack.c.bf16 %v2037_v13, %v2036_v54 }
 0x600   : > { %2351 = vmatmul.mubr.msk.bf16.vlgmr.msra.gmra.mrb[4].mxu0 %vm291_vm0, %v2039_v58 }
 0x6cf   : > { %v2079_v62 = vpop.f32.mrb[0].mxu1 }
 0x6d0   : > { %v2134_v51 = vmin.f32 %v2079_v62, 0.0  ;;  %v2346_v28 = vpop.f32.mrb[1].mxu1  ;;  %vm2130_vm10 = vcmp.gt.f32.partialorder %v2079_v62, 0.0 }
 0x6d1   : > { %v2082_v10 = vpop.f32.mrb[2].mxu1 }
 0x6d2   : > { %v2138_v6 = vmul.f32 1.442695, %v2134_v51  ;;  %v2135_v60 = vmin.f32 %v2082_v10, 0.0  ;;  %v2347_v61 = vpop.f32.mrb[3].mxu1  ;;  %vm2131_vm12 = vcmp.gt.f32.partialorder %v2082_v10, 0.0 }
 0x6d3   : > { %v2123_v46 = vpop.f32.mrb[4].mxu0 }
 0x6d4   : > { %2684 = vpow2.f32 %v2138_v6  ;;  %v2140_v23 = vmul.f32 1.442695, %v2135_v60  ;;  %v2136_v53 = vmin.f32 %v2123_v46, 0.0  ;;  %v2352_v48 = vpop.f32.mrb[5].mxu0  ;;  %vm2132_vm13 = vcmp.gt.f32.partialorder %v2123_v46, 0.0 }
 0x6d5   : > { %v2126_v16 = vpop.f32.mrb[6].mxu0 }
 0x6d6   : > { %2686 = vpow2.f32 %v2140_v23  ;;  %v2142_v56 = vmul.f32 1.442695, %v2136_v53  ;;  %v2137_v17 = vmin.f32 %v2126_v16, 0.0  ;;  %v2353_v47 = vpop.f32.mrb[7].mxu0  ;;  %vm2133_vm14 = vcmp.gt.f32.partialorder %v2126_v16, 0.0 }
 0x6d8   : > { %2688 = vpow2.f32 %v2142_v56  ;;  %v2144_v37 = vmul.f32 1.442695, %v2137_v17 }
 0x6da   : > { %2690 = vpow2.f32 %v2144_v37 }
 0x6de   : > { %v2685_v52 = vpop.eup %2684 }
 0x6df   : > { %v2310_v3 = vadd.f32 -1.0, %v2685_v52 }
 0x6e0   : > { %v2687_v35 = vpop.eup %2686 }
 0x6e1   : > { %v2150_v40 = vsel %vm2130_vm10, %v2079_v62, %v2310_v3  ;;  %v2311_v33 = vadd.f32 -1.0, %v2687_v35 }
 0x6e2   : > { %v2689_v15 = vpop.eup %2688  ;;  %v2324_v7 = vpack.c.bf16 %v2150_v40, %v2150_v40 }
 0x6e3   : > { %v2151_v49 = vsel %vm2131_vm12, %v2082_v10, %v2311_v33  ;;  %v2312_v21 = vadd.f32 -1.0, %v2689_v15 }
 0x6e4   : > { %v2691_v43 = vpop.eup %2690  ;;  %2171 = vst.msk [vmem:[%s253_s12] sm:$0xf] %vm2170_vm11, %v2324_v7  ;;  %v2325_v31 = vpack.c.bf16 %v2151_v49, %v2151_v49 }
 0x6e5   : > { %v2152_v20 = vsel %vm2132_vm13, %v2123_v46, %v2312_v21  ;;  %v2313_v63 = vadd.f32 -1.0, %v2691_v43 }
 0x6e6   : > { %2172 = vst.msk [vmem:[%s253_s12 + $0x4] sm:$0xf] %vm2170_vm11, %v2325_v31  ;;  %v2326_v30 = vpack.c.bf16 %v2152_v20, %v2152_v20 }
 0x6e7   : > { %v2153_v19 = vsel %vm2133_vm14, %v2126_v16, %v2313_v63 }
 0x6e8   : > { %2173 = vst.msk [vmem:[%s253_s12 + $0x8] sm:$0xf] %vm2170_vm11, %v2326_v30  ;;  %v2327_v2 = vpack.c.bf16 %v2153_v19, %v2153_v19 }
 0x6ea   : > { %2174 = vst.msk [vmem:[%s253_s12 + $0xc] sm:$0xf] %vm2170_vm11, %v2327_v2 }
 0x6eb   : > { %2791 = shalt.err (!%p2788_p6)
}
 0x6ec   : > { %s2792_s10 = scalar_lea.hbm %s4222_s11, 256  ;;  %s2796_s6 = scalar_lea.hbm %s4273_s4, 1024 }
 0x6ed   : > { %p2793_p11 = scmp.ne.s32.totalorder %s4222_s11, %s2792_s10  ;;  %p2797_p9 = scmp.lt.u32.totalorder %s4222_s11, %s4273_s4 }
 0x6ee   : > { %p2798_p7 = scmp.lt.u32.totalorder %s2796_s6, %s2792_s10  ;;  %p2800_p1 = scmp.lt.u32.totalorder %s2792_s10, %s4222_s11 }
 0x6ef   : > { %p2794_p3 = pnand %p2793_p11, %p4441_p4 }
 0x6f0   : > { %p2799_p10 = por %p2798_p7, %p2797_p9 }
 0x6f1   : > { %p2795_p8 = pneg %p2794_p3 }
 0x6f2   : > { %p2801_p0 = por %p2800_p1, %p2799_p10 }
 0x6f4   : > { %p2802_p2 = pnand %p2801_p0, %p2795_p8 }
 0x6f6   : > { %2805 = shalt.err (!%p2802_p2)
}
 0x6f7   : > { %s2927_s9 = smov 64   ;;  %s2928_s12 = smov 4  }
 0x6f8   : > { %2432 = dma.vmem_to_hbm [thread:$0]  (%p4441_p4), %s4224_s26, 256, %s4222_s11, %s2176_s19, %s2927_s9, %s2927_s9, %s2928_s12  }
 0x6f9 PF: > { %p2454_p5 = scmp.ge.s32.totalorder %s2852_s18, 2  ;;  %s2204_s14 = sand.u32 1, %s2840_s15  }
 0x6fa   : > { %p4442_p12 = scmp.ne.s32.totalorder %s4338_s28, 0  ;;  %s2205_s20 = scalar_lea.sflag [#allocation4], %s2204_s14 }
 0x6fc   : > { %p2446_p13 = pnand %p2454_p5, %p4442_p12 }
 0x6fe   : > { %2835 = dma.done.wait (!%p2446_p13), %s2205_s20, 256  }
 0x6ff   : > { %2837 = vsyncadd (!%p2446_p13), %s2205_s20, 4294967040  ;;  %p16_p6 = scmp.ge.s32.totalorder %s2979_s21, 6   ;;  %s4443_s15 = smov %s2844_s16 }
 0x700   : > { %s4444_s16 = smov %s2848_s17  ;;  %s4445_s17 = smov %s2991_s24 }
 0x701   : > { %s4446_s18 = smov %s2979_s21  ;;  %18 = sbr.rel (!%p16_p6) target bundleno = 7 (0x7), region = 91 }
 0x708   :  { %2210 = vsyncpa [#allocation3], 1 }
 0x709   :  { %2212 = vsyncpa [#allocation3 + $0x1], 1 }
 0x70a   :  { %2213 = vsyncpa [#allocation6], 1 }
 0x70b   :  { %2214 = vsyncpa [#allocation4], 1 }
 0x70c   :  { %2216 = vsyncpa [#allocation4 + $0x1], 1 }

</bundles_post_ra>
